<compile_context>
chip_gen: v6e
topology: v6e:2x2x1
jax: 0.10.0
libtpu: 0.0.40
codegen_flags: <defaults>
</compile_context>

<pallas_src>
import math

import jax
import jax.numpy as jnp
from jax.experimental import pallas as pl
from jax.experimental.pallas import tpu as pltpu

# TODO(synk): `NeuronModel` dynamics is not defined in the provided source; a deterministic
# leaky integrator is assumed:  v' = ALPHA * v + (1 - ALPHA) * i,  output = v'.
ALPHA = 0.9


def _lcm(a, b):
    return a * b // math.gcd(a, b)


def _pick_batch_block(B, H, itemsize=4):
    """Split the batch so (a) the 'parallel' grid axis can shard across TensorCores
    (v7x megacore) and (b) the resident mem block stays <= ~16 MiB per core (v7x has
    64 MiB VMEM/TC vs 128 MiB on v5e/v6e).  Split blocks stay 8-aligned so the (Bb, H)
    state blocks remain legal."""
    Bb = B
    if B % 16 == 0:
        Bb = B // 2
    while Bb % 16 == 0 and Bb * H * H * itemsize > (16 << 20):
        Bb //= 2
    return Bb


def _pick_time_block(T, D, Bb, I, H, *, max_block=256, chunk_budget_bytes=8 << 20):
    """Largest time block that (a) divides T, (b) is a multiple of lcm(8, D) so every
    delay-buffer slot / window boundary is a compile-time constant, and (c) keeps the
    streamed (x, key, val) chunk footprint under a VMEM budget.  Falls back to a single
    full-T chunk (always a legal block shape; t0 == 0 keeps slots static there too)."""
    step = _lcm(8, D)
    bytes_per_t = 2 * Bb * (I + 2 * H) * 4            # double-buffered x + key + val rows
    cap = max(step, min(max_block, chunk_budget_bytes // max(bytes_per_t, 1)))
    tb = (cap // step) * step
    while tb >= step:
        if T % tb == 0:
            return tb
        tb -= step
    return T


def _reading_kernel(x_ref, wx_ref, wh_ref, mem_ref,
                    key_seq_ref, val_seq_ref, kstate_ref, vstate_ref, vbuf_ref,
                    ks_sc, vs_sc, vbuf_sc):
    tt = pl.program_id(1)                  # time-chunk index (sequential recurrence axis)
    Bb, Tt, I = x_ref.shape
    H = wh_ref.shape[0]
    D = vbuf_sc.shape[1]
    mm_dtype = wh_ref.dtype                # matmul operand dtype (f32, or bf16 on v6e/v7x)

    # states is None in the PyTorch module -> zero-init at the first time chunk of every
    # batch block (scratch persists across grid steps, so reset explicitly).
    @pl.when(tt == 0)
    def _():
        ks_sc[...] = jnp.zeros_like(ks_sc)
        vs_sc[...] = jnp.zeros_like(vs_sc)
        vbuf_sc[...] = jnp.zeros_like(vbuf_sc)

    # ---- input projection for the whole chunk: one (Bb*Tt, I) @ (I, H) MXU matmul ------
    # (x @ Wx^T fused into the kernel: no xproj round trip through HBM.)
    xproj = jnp.dot(x_ref[...].reshape(Bb * Tt, I), wx_ref[...],
                    preferred_element_type=jnp.float32).reshape(Bb, Tt, H)

    ks = ks_sc[...]                        # (Bb, H) f32 key state, carried across chunks
    vs = vs_sc[...]                        # (Bb, H) f32 val state

    # ---- feedback-delay windows ---------------------------------------------------------
    # The wrapper guarantees every window starts at a global time that is a multiple of D,
    # so all feedback reads of a window were written *before* the window: both matmuls are
    # batched over the whole window; only the leaky-integrator updates remain serial (VPU).
    for w in range(-(-Tt // D)):
        t0 = w * D                                   # static chunk-local window start
        Wsz = min(D, Tt - t0)                        # static window size (partial tail ok)

        # feedback projection for the whole window: one (Bb*Wsz, H) @ (H, H) matmul
        fb = vbuf_sc[:, pl.ds(0, Wsz), :]            # (Bb, Wsz, H), written by prev window
        ih = jnp.dot(fb.reshape(Bb * Wsz, H).astype(mm_dtype), wh_ref[...],
                     preferred_element_type=jnp.float32).reshape(Bb, Wsz, H)
        i_win = xproj[:, t0:t0 + Wsz, :] + ih        # (Bb, Wsz, H) f32

        # key dynamics: serial but pure VPU work; each step's key goes straight into the
        # chunk's VMEM output block (lane-dense rows, static indices; HBM writeback stays
        # chunk-granular via the BlockSpec).
        for d in range(Wsz):
            ks = ALPHA * ks + (1.0 - ALPHA) * i_win[:, d, :]
            key_seq_ref[:, t0 + d, :] = ks

        # ikv = (key.unsqueeze(1) * mem).sum(2), batched over the window: one
        # (Bb, Wsz, H) x (Bb, H, H) MXU contraction (M = Wsz) instead of Wsz mat-vecs.
        # mem_ref / wh_ref are read at point of use (not hoisted across the unrolled loop).
        key_win = key_seq_ref[:, pl.ds(t0, Wsz), :]
        ikv_win = jnp.einsum('bdj,bij->bdi', key_win.astype(mm_dtype), mem_ref[...],
                             preferred_element_type=jnp.float32)     # (Bb, Wsz, H)

        # val dynamics
        for d in range(Wsz):
            vs = ALPHA * vs + (1.0 - ALPHA) * ikv_win[:, d, :]
            val_seq_ref[:, t0 + d, :] = vs

        # next window's feedback: one slab copy instead of per-step buffer writes
        vbuf_sc[:, pl.ds(0, Wsz), :] = val_seq_ref[:, pl.ds(t0, Wsz), :]

    # carry the recurrent state to the next time chunk
    ks_sc[...] = ks
    vs_sc[...] = vs

    # final states: written exactly once, on the last time chunk of the batch block
    @pl.when(tt == pl.num_programs(1) - 1)
    def _():
        kstate_ref[...] = ks
        vstate_ref[...] = vs
        vbuf_ref[...] = vbuf_sc[...]


def _resident_spec(block_shape, index_map, single_buffer):
    """BlockSpec for operands whose block index never changes.  With pl.Buffered(1) they
    are not double-buffered (halves their VMEM: the v7x 64 MiB lever); falls back to a
    default spec if pipeline_mode is unsupported on this jax version."""
    if single_buffer:
        try:
            return pl.BlockSpec(block_shape, index_map, pipeline_mode=pl.Buffered(1))
        except (TypeError, AttributeError):
            pass
    return pl.BlockSpec(block_shape, index_map)


def reading_layer_forward(x, mem, W, feedback_delay, *, time_block=None, batch_block=None,
                          compute_dtype=jnp.float32, single_buffer_resident=True):
    """x: (B, T, I), mem: (B, H, H), W: (H, I+H).  Returns (key_seq, val_seq, states) with
    states = (key_state (B,H), val_state (B,H), val_buffer (B,D,H)) -- the states=None path
    of the PyTorch module.  compute_dtype=bf16 keeps states in f32 but feeds bf16 MXU
    operands (v6e/v7x lever; re-validate tolerances for long sequences)."""
    B, T, I = x.shape
    H = W.shape[0]
    D = int(feedback_delay)
    assert W.shape[1] == I + H

    wx_t = W[:, :I].T.astype(compute_dtype)          # (I, H) == Wx^T
    wh_t = W[:, I:].T.astype(compute_dtype)          # (H, H) == Wh^T
    x_mm = x.astype(compute_dtype)
    mem_mm = mem.astype(compute_dtype)
    mm_bytes = jnp.dtype(compute_dtype).itemsize

    Bb = _pick_batch_block(B, H, mm_bytes) if batch_block is None else batch_block
    assert B % Bb == 0 and (Bb == B or Bb % 8 == 0)
    Tt = _pick_time_block(T, D, Bb, I, H) if time_block is None else time_block
    assert T % Tt == 0 and (Tt == T or (Tt % 8 == 0 and Tt % D == 0)), (
        "time_block must divide T and be a multiple of 8 and of feedback_delay "
        "(or span the whole sequence)")

    out_shapes = (
        jax.ShapeDtypeStruct((B, T, H), jnp.float32),   # key output sequence
        jax.ShapeDtypeStruct((B, T, H), jnp.float32),   # val output sequence
        jax.ShapeDtypeStruct((B, H), jnp.float32),      # final key state
        jax.ShapeDtypeStruct((B, H), jnp.float32),      # final val state
        jax.ShapeDtypeStruct((B, D, H), jnp.float32),   # final val feedback buffer
    )

    # VMEM working-set estimate -> raise the scoped limit past the v5e 16 MiB / v6e 32 MiB
    # defaults (still well under the v7x 64 MiB per-core physical budget at these tiles).
    est = (2 * Bb * Tt * I * mm_bytes                        # x chunk (double buffered)
           + 2 * 2 * Bb * Tt * H * 4                         # key/val sequence chunks
           + 2 * (Bb * H * H + H * H + I * H) * mm_bytes     # mem / Wh / Wx (<= 2 buffers)
           + (4 * Bb * H + 2 * Bb * D * H) * 4)              # states + feedback buffers
    vmem_limit = int(min(128 << 20, max(32 << 20, 1.5 * est + (4 << 20))))

    def build_and_call(single_buffer):
        grid_spec = pltpu.PrefetchScalarGridSpec(
            num_scalar_prefetch=0,
            grid=(B // Bb, T // Tt),                          # (batch blocks, time chunks)
            in_specs=[
                pl.BlockSpec((Bb, Tt, I), lambda b, t: (b, t, 0)),               # x chunk
                _resident_spec((I, H), lambda b, t: (0, 0), single_buffer),      # Wx^T
                _resident_spec((H, H), lambda b, t: (0, 0), single_buffer),      # Wh^T
                _resident_spec((Bb, H, H), lambda b, t: (b, 0, 0), single_buffer),  # mem
            ],
            out_specs=[
                pl.BlockSpec((Bb, Tt, H), lambda b, t: (b, t, 0)),
                pl.BlockSpec((Bb, Tt, H), lambda b, t: (b, t, 0)),
                pl.BlockSpec((Bb, H), lambda b, t: (b, 0)),
                pl.BlockSpec((Bb, H), lambda b, t: (b, 0)),
                pl.BlockSpec((Bb, D, H), lambda b, t: (b, 0, 0)),
            ],
            scratch_shapes=[
                pltpu.VMEM((Bb, H), jnp.float32),             # key state carry
                pltpu.VMEM((Bb, H), jnp.float32),             # val state carry
                pltpu.VMEM((Bb, D, H), jnp.float32),          # val feedback (delay) buffer
            ],
        )
        return pl.pallas_call(
            _reading_kernel,
            out_shape=out_shapes,
            grid_spec=grid_spec,
            compiler_params=pltpu.CompilerParams(
                dimension_semantics=("parallel", "arbitrary"),  # batch megacore; time recurrent
                vmem_limit_bytes=vmem_limit),
        )(x_mm, wx_t, wh_t, mem_mm)

    try:
        key_seq, val_seq, kst, vst, vbuf = build_and_call(single_buffer_resident)
    except Exception:
        if not single_buffer_resident:
            raise
        # pl.Buffered(1) not supported by this jax/libtpu: double-buffered fallback
        # (costs VMEM only, not correctness).
        key_seq, val_seq, kst, vst, vbuf = build_and_call(False)

    return key_seq, val_seq, (kst, vst, vbuf)


def reading_layer_reference(x, mem, W, feedback_delay):
    """Pure-JAX reference mirroring the PyTorch loop (states=None path)."""
    B, T, I = x.shape
    H = W.shape[0]
    D = feedback_delay
    ks = jnp.zeros((B, H), jnp.float32)
    vs = jnp.zeros((B, H), jnp.float32)
    vbuf = jnp.zeros((B, D, H), jnp.float32)
    keys, vals = [], []
    for t in range(T):
        inp = jnp.concatenate([x[:, t, :], vbuf[:, t % D, :]], axis=-1)
        i_t = jnp.dot(inp, W.T, precision=jax.lax.Precision.HIGHEST)
        ks = ALPHA * ks + (1.0 - ALPHA) * i_t
        ikv = (ks[:, None, :] * mem).sum(axis=2)
        vs = ALPHA * vs + (1.0 - ALPHA) * ikv
        vbuf = vbuf.at[:, t % D, :].set(vs)
        keys.append(ks)
        vals.append(vs)
    return jnp.stack(keys, 1), jnp.stack(vals, 1), (ks, vs, vbuf)


if __name__ == "__main__":
    B, T, I, H, D = 2, 16, 16, 128, 4

    root = jax.random.PRNGKey(0)
    kx, kmem, kw = jax.random.split(root, 3)

    x = jax.random.normal(kx, (B, T, I), jnp.float32)
    mem = jax.random.normal(kmem, (B, H, H), jnp.float32) * 0.1

    # xavier_uniform_(W, gain=sqrt(2)) for W of shape (H, I+H)
    fan_in, fan_out = I + H, H
    bound = math.sqrt(2.0) * math.sqrt(6.0 / (fan_in + fan_out))
    W = jax.random.uniform(kw, (H, I + H), jnp.float32, -bound, bound)

    # time_block=8 -> two time chunks of two D-step windows each: exercises the
    # cross-chunk state carry, the window-batched matmuls, and the static slot indexing.
    key_seq, val_seq, (kst, vst, vbuf) = jax.block_until_ready(
        reading_layer_forward(x, mem, W, D, time_block=8))

    k_ref, v_ref, (ks_ref, vs_ref, vbuf_ref) = reading_layer_reference(x, mem, W, D)

    # Tolerance covers MXU f32 multi-pass vs exact-f32 reference differences.
    assert jnp.allclose(key_seq, k_ref, atol=2e-3, rtol=2e-3)
    assert jnp.allclose(val_seq, v_ref, atol=2e-3, rtol=2e-3)
    assert jnp.allclose(kst, ks_ref, atol=2e-3, rtol=2e-3)
    assert jnp.allclose(vst, vs_ref, atol=2e-3, rtol=2e-3)
    assert jnp.allclose(vbuf, vbuf_ref, atol=2e-3, rtol=2e-3)

    print("KERNEL_OK")
</pallas_src>

<mosaic_0001>
module attributes {stable_mosaic.version = 11 : i64} {
  func.func @_reading_kernel(%arg0: i32, %arg1: i32, %arg2: memref<2x8x16xf32, #tpu.memory_space<vmem>>, %arg3: memref<16x128xf32, #tpu.memory_space<vmem>>, %arg4: memref<128x128xf32, #tpu.memory_space<vmem>>, %arg5: memref<2x128x128xf32, #tpu.memory_space<vmem>>, %arg6: memref<2x8x128xf32, #tpu.memory_space<vmem>>, %arg7: memref<2x8x128xf32, #tpu.memory_space<vmem>>, %arg8: memref<2x128xf32, #tpu.memory_space<vmem>>, %arg9: memref<2x128xf32, #tpu.memory_space<vmem>>, %arg10: memref<2x4x128xf32, #tpu.memory_space<vmem>>, %arg11: memref<2x128xf32, #tpu.memory_space<vmem>>, %arg12: memref<2x128xf32, #tpu.memory_space<vmem>>, %arg13: memref<2x4x128xf32, #tpu.memory_space<vmem>>) attributes {dimension_semantics = [#tpu.dimension_semantics<parallel>, #tpu.dimension_semantics<arbitrary>], iteration_bounds = array<i64: 1, 2>, scalar_prefetch = 0 : i64, scratch_operands = 3 : i64, tpu.core_type = #tpu.core_type<tc>, window_params = [{transform_indices = @transform_0, window_bounds = array<i64: 2, 8, 16>}, {pipeline_mode = #tpu.pipeline_mode<synchronous>, transform_indices = @transform_1, window_bounds = array<i64: 16, 128>}, {pipeline_mode = #tpu.pipeline_mode<synchronous>, transform_indices = @transform_2, window_bounds = array<i64: 128, 128>}, {pipeline_mode = #tpu.pipeline_mode<synchronous>, transform_indices = @transform_3, window_bounds = array<i64: 2, 128, 128>}, {transform_indices = @transform_4, window_bounds = array<i64: 2, 8, 128>}, {transform_indices = @transform_5, window_bounds = array<i64: 2, 8, 128>}, {transform_indices = @transform_6, window_bounds = array<i64: 2, 128>}, {transform_indices = @transform_7, window_bounds = array<i64: 2, 128>}, {transform_indices = @transform_8, window_bounds = array<i64: 2, 4, 128>}]} {
    %c0_i32 = arith.constant 0 : i32
    %0 = arith.cmpi eq, %arg1, %c0_i32 : i32
    %1 = arith.extui %0 : i1 to i32
    %c0_i32_0 = arith.constant 0 : i32
    %2 = arith.cmpi ne, %1, %c0_i32_0 : i32
    scf.if %2 {
      %cst_125 = arith.constant 0.000000e+00 : f32
      %199 = vector.broadcast %cst_125 : f32 to vector<2x128xf32>
      %c0_126 = arith.constant 0 : index
      %c0_127 = arith.constant 0 : index
      %200 = vector.load %arg11[%c0_126, %c0_127] : memref<2x128xf32, #tpu.memory_space<vmem>>, vector<2x128xf32>
      tpu.vector_store %arg11[%c0_126, %c0_127], %199 {strides = array<i32>} : memref<2x128xf32, #tpu.memory_space<vmem>>, vector<2x128xf32>,
      %cst_128 = arith.constant 0.000000e+00 : f32
      %201 = vector.broadcast %cst_128 : f32 to vector<2x128xf32>
      %c0_129 = arith.constant 0 : index
      %c0_130 = arith.constant 0 : index
      %202 = vector.load %arg12[%c0_129, %c0_130] : memref<2x128xf32, #tpu.memory_space<vmem>>, vector<2x128xf32>
      tpu.vector_store %arg12[%c0_129, %c0_130], %201 {strides = array<i32>} : memref<2x128xf32, #tpu.memory_space<vmem>>, vector<2x128xf32>,
      %cst_131 = arith.constant 0.000000e+00 : f32
      %203 = vector.broadcast %cst_131 : f32 to vector<2x4x128xf32>
      %c0_132 = arith.constant 0 : index
      %c0_133 = arith.constant 0 : index
      %c0_134 = arith.constant 0 : index
      %204 = vector.load %arg13[%c0_132, %c0_133, %c0_134] : memref<2x4x128xf32, #tpu.memory_space<vmem>>, vector<2x4x128xf32>
      tpu.vector_store %arg13[%c0_132, %c0_133, %c0_134], %203 {strides = array<i32>} : memref<2x4x128xf32, #tpu.memory_space<vmem>>, vector<2x4x128xf32>,
    } else {
    }
    %c0 = arith.constant 0 : index
    %c0_1 = arith.constant 0 : index
    %c0_2 = arith.constant 0 : index
    %3 = vector.load %arg2[%c0, %c0_1, %c0_2] : memref<2x8x16xf32, #tpu.memory_space<vmem>>, vector<2x8x16xf32>
    %4 = vector.shape_cast %3 : vector<2x8x16xf32> to vector<16x16xf32>
    %c0_3 = arith.constant 0 : index
    %c0_4 = arith.constant 0 : index
    %5 = vector.load %arg3[%c0_3, %c0_4] : memref<16x128xf32, #tpu.memory_space<vmem>>, vector<16x128xf32>
    %cst = arith.constant dense<0.000000e+00> : vector<16x128xf32>
    %6 = tpu.matmul %4, %5, %cst {dimension_numbers = #tpu.dot_dimension_numbers<[1], [0], [0], [1], [0, 0, 1, 1], [], []>} : vector<16x16xf32>, vector<16x128xf32>, vector<16x128xf32> -> vector<16x128xf32>
    %7 = vector.shape_cast %6 : vector<16x128xf32> to vector<2x8x128xf32>
    %c0_5 = arith.constant 0 : index
    %c0_6 = arith.constant 0 : index
    %8 = vector.load %arg11[%c0_5, %c0_6] : memref<2x128xf32, #tpu.memory_space<vmem>>, vector<2x128xf32>
    %c0_7 = arith.constant 0 : index
    %c0_8 = arith.constant 0 : index
    %9 = vector.load %arg12[%c0_7, %c0_8] : memref<2x128xf32, #tpu.memory_space<vmem>>, vector<2x128xf32>
    %c0_9 = arith.constant 0 : index
    %c0_10 = arith.constant 0 : index
    %c0_11 = arith.constant 0 : index
    %10 = vector.load %arg13[%c0_9, %c0_10, %c0_11] : memref<2x4x128xf32, #tpu.memory_space<vmem>>, vector<2x4x128xf32>
    %11 = vector.shape_cast %10 : vector<2x4x128xf32> to vector<8x128xf32>
    %c0_12 = arith.constant 0 : index
    %c0_13 = arith.constant 0 : index
    %12 = vector.load %arg4[%c0_12, %c0_13] : memref<128x128xf32, #tpu.memory_space<vmem>>, vector<128x128xf32>
    %cst_14 = arith.constant dense<0.000000e+00> : vector<8x128xf32>
    %13 = tpu.matmul %11, %12, %cst_14 {dimension_numbers = #tpu.dot_dimension_numbers<[1], [0], [0], [1], [0, 0, 1, 1], [], []>} : vector<8x128xf32>, vector<128x128xf32>, vector<8x128xf32> -> vector<8x128xf32>
    %14 = vector.shape_cast %13 : vector<8x128xf32> to vector<2x4x128xf32>
    %15 = vector.extract_strided_slice %7 {offsets = [0, 0, 0], sizes = [2, 4, 128], strides = [1, 1, 1]} : vector<2x8x128xf32> to vector<2x4x128xf32>
    %16 = arith.addf %15, %14 : vector<2x4x128xf32>
    %cst_15 = arith.constant 0.899999976 : f32
    %17 = vector.broadcast %cst_15 : f32 to vector<2x128xf32>
    %18 = arith.mulf %17, %8 : vector<2x128xf32>
    %19 = vector.extract_strided_slice %16 {offsets = [0, 0, 0], sizes = [2, 1, 128], strides = [1, 1, 1]} : vector<2x4x128xf32> to vector<2x1x128xf32>
    %20 = vector.shape_cast %19 : vector<2x1x128xf32> to vector<2x128xf32>
    %cst_16 = arith.constant 1.000000e-01 : f32
    %21 = vector.broadcast %cst_16 : f32 to vector<2x128xf32>
    %22 = arith.mulf %21, %20 : vector<2x128xf32>
    %23 = arith.addf %18, %22 : vector<2x128xf32>
    %c0_17 = arith.constant 0 : index
    %c0_18 = arith.constant 0 : index
    %c0_19 = arith.constant 0 : index
    %24 = vector.load %arg6[%c0_17, %c0_18, %c0_19] : memref<2x8x128xf32, #tpu.memory_space<vmem>>, vector<2x1x128xf32>
    %25 = vector.shape_cast %24 : vector<2x1x128xf32> to vector<2x128xf32>
    %26 = vector.shape_cast %23 : vector<2x128xf32> to vector<2x1x128xf32>
    tpu.vector_store %arg6[%c0_17, %c0_18, %c0_19], %26 {strides = array<i32>} : memref<2x8x128xf32, #tpu.memory_space<vmem>>, vector<2x1x128xf32>,
    %cst_20 = arith.constant 0.899999976 : f32
    %27 = vector.broadcast %cst_20 : f32 to vector<2x128xf32>
    %28 = arith.mulf %27, %23 : vector<2x128xf32>
    %29 = vector.extract_strided_slice %16 {offsets = [0, 1, 0], sizes = [2, 1, 128], strides = [1, 1, 1]} : vector<2x4x128xf32> to vector<2x1x128xf32>
    %30 = vector.shape_cast %29 : vector<2x1x128xf32> to vector<2x128xf32>
    %cst_21 = arith.constant 1.000000e-01 : f32
    %31 = vector.broadcast %cst_21 : f32 to vector<2x128xf32>
    %32 = arith.mulf %31, %30 : vector<2x128xf32>
    %33 = arith.addf %28, %32 : vector<2x128xf32>
    %c0_22 = arith.constant 0 : index
    %c1 = arith.constant 1 : index
    %c0_23 = arith.constant 0 : index
    %34 = vector.load %arg6[%c0_22, %c1, %c0_23] : memref<2x8x128xf32, #tpu.memory_space<vmem>>, vector<2x1x128xf32>
    %35 = vector.shape_cast %34 : vector<2x1x128xf32> to vector<2x128xf32>
    %36 = vector.shape_cast %33 : vector<2x128xf32> to vector<2x1x128xf32>
    tpu.vector_store %arg6[%c0_22, %c1, %c0_23], %36 {strides = array<i32>} : memref<2x8x128xf32, #tpu.memory_space<vmem>>, vector<2x1x128xf32>,
    %cst_24 = arith.constant 0.899999976 : f32
    %37 = vector.broadcast %cst_24 : f32 to vector<2x128xf32>
    %38 = arith.mulf %37, %33 : vector<2x128xf32>
    %39 = vector.extract_strided_slice %16 {offsets = [0, 2, 0], sizes = [2, 1, 128], strides = [1, 1, 1]} : vector<2x4x128xf32> to vector<2x1x128xf32>
    %40 = vector.shape_cast %39 : vector<2x1x128xf32> to vector<2x128xf32>
    %cst_25 = arith.constant 1.000000e-01 : f32
    %41 = vector.broadcast %cst_25 : f32 to vector<2x128xf32>
    %42 = arith.mulf %41, %40 : vector<2x128xf32>
    %43 = arith.addf %38, %42 : vector<2x128xf32>
    %c0_26 = arith.constant 0 : index
    %c2 = arith.constant 2 : index
    %c0_27 = arith.constant 0 : index
    %44 = vector.load %arg6[%c0_26, %c2, %c0_27] : memref<2x8x128xf32, #tpu.memory_space<vmem>>, vector<2x1x128xf32>
    %45 = vector.shape_cast %44 : vector<2x1x128xf32> to vector<2x128xf32>
    %46 = vector.shape_cast %43 : vector<2x128xf32> to vector<2x1x128xf32>
    tpu.vector_store %arg6[%c0_26, %c2, %c0_27], %46 {strides = array<i32>} : memref<2x8x128xf32, #tpu.memory_space<vmem>>, vector<2x1x128xf32>,
    %cst_28 = arith.constant 0.899999976 : f32
    %47 = vector.broadcast %cst_28 : f32 to vector<2x128xf32>
    %48 = arith.mulf %47, %43 : vector<2x128xf32>
    %49 = vector.extract_strided_slice %16 {offsets = [0, 3, 0], sizes = [2, 1, 128], strides = [1, 1, 1]} : vector<2x4x128xf32> to vector<2x1x128xf32>
    %50 = vector.shape_cast %49 : vector<2x1x128xf32> to vector<2x128xf32>
    %cst_29 = arith.constant 1.000000e-01 : f32
    %51 = vector.broadcast %cst_29 : f32 to vector<2x128xf32>
    %52 = arith.mulf %51, %50 : vector<2x128xf32>
    %53 = arith.addf %48, %52 : vector<2x128xf32>
    %c0_30 = arith.constant 0 : index
    %c3 = arith.constant 3 : index
    %c0_31 = arith.constant 0 : index
    %54 = vector.load %arg6[%c0_30, %c3, %c0_31] : memref<2x8x128xf32, #tpu.memory_space<vmem>>, vector<2x1x128xf32>
    %55 = vector.shape_cast %54 : vector<2x1x128xf32> to vector<2x128xf32>
    %56 = vector.shape_cast %53 : vector<2x128xf32> to vector<2x1x128xf32>
    tpu.vector_store %arg6[%c0_30, %c3, %c0_31], %56 {strides = array<i32>} : memref<2x8x128xf32, #tpu.memory_space<vmem>>, vector<2x1x128xf32>,
    %c0_32 = arith.constant 0 : index
    %c0_33 = arith.constant 0 : index
    %c0_34 = arith.constant 0 : index
    %57 = vector.load %arg6[%c0_32, %c0_33, %c0_34] : memref<2x8x128xf32, #tpu.memory_space<vmem>>, vector<2x4x128xf32>
    %c0_35 = arith.constant 0 : index
    %c0_36 = arith.constant 0 : index
    %c0_37 = arith.constant 0 : index
    %58 = vector.load %arg5[%c0_35, %c0_36, %c0_37] : memref<2x128x128xf32, #tpu.memory_space<vmem>>, vector<2x128x128xf32>
    "tpu.trace_start"() <{level = 10 : i32, message = "bdj,bij->bdi"}> : () -> ()
    %cst_38 = arith.constant dense<0.000000e+00> : vector<2x4x128xf32>
    %59 = tpu.matmul %57, %58, %cst_38 {dimension_numbers = #tpu.dot_dimension_numbers<[2], [2], [1], [1], [0, 0, 0, 1, 1, 1], [0], [0]>} : vector<2x4x128xf32>, vector<2x128x128xf32>, vector<2x4x128xf32> -> vector<2x4x128xf32>
    "tpu.trace_stop"() : () -> ()
    %cst_39 = arith.constant 0.899999976 : f32
    %60 = vector.broadcast %cst_39 : f32 to vector<2x128xf32>
    %61 = arith.mulf %60, %9 : vector<2x128xf32>
    %62 = vector.extract_strided_slice %59 {offsets = [0, 0, 0], sizes = [2, 1, 128], strides = [1, 1, 1]} : vector<2x4x128xf32> to vector<2x1x128xf32>
    %63 = vector.shape_cast %62 : vector<2x1x128xf32> to vector<2x128xf32>
    %cst_40 = arith.constant 1.000000e-01 : f32
    %64 = vector.broadcast %cst_40 : f32 to vector<2x128xf32>
    %65 = arith.mulf %64, %63 : vector<2x128xf32>
    %66 = arith.addf %61, %65 : vector<2x128xf32>
    %c0_41 = arith.constant 0 : index
    %c0_42 = arith.constant 0 : index
    %c0_43 = arith.constant 0 : index
    %67 = vector.load %arg7[%c0_41, %c0_42, %c0_43] : memref<2x8x128xf32, #tpu.memory_space<vmem>>, vector<2x1x128xf32>
    %68 = vector.shape_cast %67 : vector<2x1x128xf32> to vector<2x128xf32>
    %69 = vector.shape_cast %66 : vector<2x128xf32> to vector<2x1x128xf32>
    tpu.vector_store %arg7[%c0_41, %c0_42, %c0_43], %69 {strides = array<i32>} : memref<2x8x128xf32, #tpu.memory_space<vmem>>, vector<2x1x128xf32>,
    %cst_44 = arith.constant 0.899999976 : f32
    %70 = vector.broadcast %cst_44 : f32 to vector<2x128xf32>
    %71 = arith.mulf %70, %66 : vector<2x128xf32>
    %72 = vector.extract_strided_slice %59 {offsets = [0, 1, 0], sizes = [2, 1, 128], strides = [1, 1, 1]} : vector<2x4x128xf32> to vector<2x1x128xf32>
    %73 = vector.shape_cast %72 : vector<2x1x128xf32> to vector<2x128xf32>
    %cst_45 = arith.constant 1.000000e-01 : f32
    %74 = vector.broadcast %cst_45 : f32 to vector<2x128xf32>
    %75 = arith.mulf %74, %73 : vector<2x128xf32>
    %76 = arith.addf %71, %75 : vector<2x128xf32>
    %c0_46 = arith.constant 0 : index
    %c1_47 = arith.constant 1 : index
    %c0_48 = arith.constant 0 : index
    %77 = vector.load %arg7[%c0_46, %c1_47, %c0_48] : memref<2x8x128xf32, #tpu.memory_space<vmem>>, vector<2x1x128xf32>
    %78 = vector.shape_cast %77 : vector<2x1x128xf32> to vector<2x128xf32>
    %79 = vector.shape_cast %76 : vector<2x128xf32> to vector<2x1x128xf32>
    tpu.vector_store %arg7[%c0_46, %c1_47, %c0_48], %79 {strides = array<i32>} : memref<2x8x128xf32, #tpu.memory_space<vmem>>, vector<2x1x128xf32>,
    %cst_49 = arith.constant 0.899999976 : f32
    %80 = vector.broadcast %cst_49 : f32 to vector<2x128xf32>
    %81 = arith.mulf %80, %76 : vector<2x128xf32>
    %82 = vector.extract_strided_slice %59 {offsets = [0, 2, 0], sizes = [2, 1, 128], strides = [1, 1, 1]} : vector<2x4x128xf32> to vector<2x1x128xf32>
    %83 = vector.shape_cast %82 : vector<2x1x128xf32> to vector<2x128xf32>
    %cst_50 = arith.constant 1.000000e-01 : f32
    %84 = vector.broadcast %cst_50 : f32 to vector<2x128xf32>
    %85 = arith.mulf %84, %83 : vector<2x128xf32>
    %86 = arith.addf %81, %85 : vector<2x128xf32>
    %c0_51 = arith.constant 0 : index
    %c2_52 = arith.constant 2 : index
    %c0_53 = arith.constant 0 : index
    %87 = vector.load %arg7[%c0_51, %c2_52, %c0_53] : memref<2x8x128xf32, #tpu.memory_space<vmem>>, vector<2x1x128xf32>
    %88 = vector.shape_cast %87 : vector<2x1x128xf32> to vector<2x128xf32>
    %89 = vector.shape_cast %86 : vector<2x128xf32> to vector<2x1x128xf32>
    tpu.vector_store %arg7[%c0_51, %c2_52, %c0_53], %89 {strides = array<i32>} : memref<2x8x128xf32, #tpu.memory_space<vmem>>, vector<2x1x128xf32>,
    %cst_54 = arith.constant 0.899999976 : f32
    %90 = vector.broadcast %cst_54 : f32 to vector<2x128xf32>
    %91 = arith.mulf %90, %86 : vector<2x128xf32>
    %92 = vector.extract_strided_slice %59 {offsets = [0, 3, 0], sizes = [2, 1, 128], strides = [1, 1, 1]} : vector<2x4x128xf32> to vector<2x1x128xf32>
    %93 = vector.shape_cast %92 : vector<2x1x128xf32> to vector<2x128xf32>
    %cst_55 = arith.constant 1.000000e-01 : f32
    %94 = vector.broadcast %cst_55 : f32 to vector<2x128xf32>
    %95 = arith.mulf %94, %93 : vector<2x128xf32>
    %96 = arith.addf %91, %95 : vector<2x128xf32>
    %c0_56 = arith.constant 0 : index
    %c3_57 = arith.constant 3 : index
    %c0_58 = arith.constant 0 : index
    %97 = vector.load %arg7[%c0_56, %c3_57, %c0_58] : memref<2x8x128xf32, #tpu.memory_space<vmem>>, vector<2x1x128xf32>
    %98 = vector.shape_cast %97 : vector<2x1x128xf32> to vector<2x128xf32>
    %99 = vector.shape_cast %96 : vector<2x128xf32> to vector<2x1x128xf32>
    tpu.vector_store %arg7[%c0_56, %c3_57, %c0_58], %99 {strides = array<i32>} : memref<2x8x128xf32, #tpu.memory_space<vmem>>, vector<2x1x128xf32>,
    %c0_59 = arith.constant 0 : index
    %c0_60 = arith.constant 0 : index
    %c0_61 = arith.constant 0 : index
    %100 = vector.load %arg7[%c0_59, %c0_60, %c0_61] : memref<2x8x128xf32, #tpu.memory_space<vmem>>, vector<2x4x128xf32>
    %c0_62 = arith.constant 0 : index
    %c0_63 = arith.constant 0 : index
    %c0_64 = arith.constant 0 : index
    %101 = vector.load %arg13[%c0_62, %c0_63, %c0_64] : memref<2x4x128xf32, #tpu.memory_space<vmem>>, vector<2x4x128xf32>
    tpu.vector_store %arg13[%c0_62, %c0_63, %c0_64], %100 {strides = array<i32>} : memref<2x4x128xf32, #tpu.memory_space<vmem>>, vector<2x4x128xf32>,
    %c0_65 = arith.constant 0 : index
    %c0_66 = arith.constant 0 : index
    %c0_67 = arith.constant 0 : index
    %102 = vector.load %arg13[%c0_65, %c0_66, %c0_67] : memref<2x4x128xf32, #tpu.memory_space<vmem>>, vector<2x4x128xf32>
    %103 = vector.shape_cast %102 : vector<2x4x128xf32> to vector<8x128xf32>
    %c0_68 = arith.constant 0 : index
    %c0_69 = arith.constant 0 : index
    %104 = vector.load %arg4[%c0_68, %c0_69] : memref<128x128xf32, #tpu.memory_space<vmem>>, vector<128x128xf32>
    %cst_70 = arith.constant dense<0.000000e+00> : vector<8x128xf32>
    %105 = tpu.matmul %103, %104, %cst_70 {dimension_numbers = #tpu.dot_dimension_numbers<[1], [0], [0], [1], [0, 0, 1, 1], [], []>} : vector<8x128xf32>, vector<128x128xf32>, vector<8x128xf32> -> vector<8x128xf32>
    %106 = vector.shape_cast %105 : vector<8x128xf32> to vector<2x4x128xf32>
    %107 = vector.extract_strided_slice %7 {offsets = [0, 4, 0], sizes = [2, 4, 128], strides = [1, 1, 1]} : vector<2x8x128xf32> to vector<2x4x128xf32>
    %108 = arith.addf %107, %106 : vector<2x4x128xf32>
    %cst_71 = arith.constant 0.899999976 : f32
    %109 = vector.broadcast %cst_71 : f32 to vector<2x128xf32>
    %110 = arith.mulf %109, %53 : vector<2x128xf32>
    %111 = vector.extract_strided_slice %108 {offsets = [0, 0, 0], sizes = [2, 1, 128], strides = [1, 1, 1]} : vector<2x4x128xf32> to vector<2x1x128xf32>
    %112 = vector.shape_cast %111 : vector<2x1x128xf32> to vector<2x128xf32>
    %cst_72 = arith.constant 1.000000e-01 : f32
    %113 = vector.broadcast %cst_72 : f32 to vector<2x128xf32>
    %114 = arith.mulf %113, %112 : vector<2x128xf32>
    %115 = arith.addf %110, %114 : vector<2x128xf32>
    %c0_73 = arith.constant 0 : index
    %c4 = arith.constant 4 : index
    %c0_74 = arith.constant 0 : index
    %116 = vector.load %arg6[%c0_73, %c4, %c0_74] : memref<2x8x128xf32, #tpu.memory_space<vmem>>, vector<2x1x128xf32>
    %117 = vector.shape_cast %116 : vector<2x1x128xf32> to vector<2x128xf32>
    %118 = vector.shape_cast %115 : vector<2x128xf32> to vector<2x1x128xf32>
    tpu.vector_store %arg6[%c0_73, %c4, %c0_74], %118 {strides = array<i32>} : memref<2x8x128xf32, #tpu.memory_space<vmem>>, vector<2x1x128xf32>,
    %cst_75 = arith.constant 0.899999976 : f32
    %119 = vector.broadcast %cst_75 : f32 to vector<2x128xf32>
    %120 = arith.mulf %119, %115 : vector<2x128xf32>
    %121 = vector.extract_strided_slice %108 {offsets = [0, 1, 0], sizes = [2, 1, 128], strides = [1, 1, 1]} : vector<2x4x128xf32> to vector<2x1x128xf32>
    %122 = vector.shape_cast %121 : vector<2x1x128xf32> to vector<2x128xf32>
    %cst_76 = arith.constant 1.000000e-01 : f32
    %123 = vector.broadcast %cst_76 : f32 to vector<2x128xf32>
    %124 = arith.mulf %123, %122 : vector<2x128xf32>
    %125 = arith.addf %120, %124 : vector<2x128xf32>
    %c0_77 = arith.constant 0 : index
    %c5 = arith.constant 5 : index
    %c0_78 = arith.constant 0 : index
    %126 = vector.load %arg6[%c0_77, %c5, %c0_78] : memref<2x8x128xf32, #tpu.memory_space<vmem>>, vector<2x1x128xf32>
    %127 = vector.shape_cast %126 : vector<2x1x128xf32> to vector<2x128xf32>
    %128 = vector.shape_cast %125 : vector<2x128xf32> to vector<2x1x128xf32>
    tpu.vector_store %arg6[%c0_77, %c5, %c0_78], %128 {strides = array<i32>} : memref<2x8x128xf32, #tpu.memory_space<vmem>>, vector<2x1x128xf32>,
    %cst_79 = arith.constant 0.899999976 : f32
    %129 = vector.broadcast %cst_79 : f32 to vector<2x128xf32>
    %130 = arith.mulf %129, %125 : vector<2x128xf32>
    %131 = vector.extract_strided_slice %108 {offsets = [0, 2, 0], sizes = [2, 1, 128], strides = [1, 1, 1]} : vector<2x4x128xf32> to vector<2x1x128xf32>
    %132 = vector.shape_cast %131 : vector<2x1x128xf32> to vector<2x128xf32>
    %cst_80 = arith.constant 1.000000e-01 : f32
    %133 = vector.broadcast %cst_80 : f32 to vector<2x128xf32>
    %134 = arith.mulf %133, %132 : vector<2x128xf32>
    %135 = arith.addf %130, %134 : vector<2x128xf32>
    %c0_81 = arith.constant 0 : index
    %c6 = arith.constant 6 : index
    %c0_82 = arith.constant 0 : index
    %136 = vector.load %arg6[%c0_81, %c6, %c0_82] : memref<2x8x128xf32, #tpu.memory_space<vmem>>, vector<2x1x128xf32>
    %137 = vector.shape_cast %136 : vector<2x1x128xf32> to vector<2x128xf32>
    %138 = vector.shape_cast %135 : vector<2x128xf32> to vector<2x1x128xf32>
    tpu.vector_store %arg6[%c0_81, %c6, %c0_82], %138 {strides = array<i32>} : memref<2x8x128xf32, #tpu.memory_space<vmem>>, vector<2x1x128xf32>,
    %cst_83 = arith.constant 0.899999976 : f32
    %139 = vector.broadcast %cst_83 : f32 to vector<2x128xf32>
    %140 = arith.mulf %139, %135 : vector<2x128xf32>
    %141 = vector.extract_strided_slice %108 {offsets = [0, 3, 0], sizes = [2, 1, 128], strides = [1, 1, 1]} : vector<2x4x128xf32> to vector<2x1x128xf32>
    %142 = vector.shape_cast %141 : vector<2x1x128xf32> to vector<2x128xf32>
    %cst_84 = arith.constant 1.000000e-01 : f32
    %143 = vector.broadcast %cst_84 : f32 to vector<2x128xf32>
    %144 = arith.mulf %143, %142 : vector<2x128xf32>
    %145 = arith.addf %140, %144 : vector<2x128xf32>
    %c0_85 = arith.constant 0 : index
    %c7 = arith.constant 7 : index
    %c0_86 = arith.constant 0 : index
    %146 = vector.load %arg6[%c0_85, %c7, %c0_86] : memref<2x8x128xf32, #tpu.memory_space<vmem>>, vector<2x1x128xf32>
    %147 = vector.shape_cast %146 : vector<2x1x128xf32> to vector<2x128xf32>
    %148 = vector.shape_cast %145 : vector<2x128xf32> to vector<2x1x128xf32>
    tpu.vector_store %arg6[%c0_85, %c7, %c0_86], %148 {strides = array<i32>} : memref<2x8x128xf32, #tpu.memory_space<vmem>>, vector<2x1x128xf32>,
    %c0_87 = arith.constant 0 : index
    %c4_88 = arith.constant 4 : index
    %c0_89 = arith.constant 0 : index
    %149 = vector.load %arg6[%c0_87, %c4_88, %c0_89] : memref<2x8x128xf32, #tpu.memory_space<vmem>>, vector<2x4x128xf32>
    %c0_90 = arith.constant 0 : index
    %c0_91 = arith.constant 0 : index
    %c0_92 = arith.constant 0 : index
    %150 = vector.load %arg5[%c0_90, %c0_91, %c0_92] : memref<2x128x128xf32, #tpu.memory_space<vmem>>, vector<2x128x128xf32>
    "tpu.trace_start"() <{level = 10 : i32, message = "bdj,bij->bdi"}> : () -> ()
    %cst_93 = arith.constant dense<0.000000e+00> : vector<2x4x128xf32>
    %151 = tpu.matmul %149, %150, %cst_93 {dimension_numbers = #tpu.dot_dimension_numbers<[2], [2], [1], [1], [0, 0, 0, 1, 1, 1], [0], [0]>} : vector<2x4x128xf32>, vector<2x128x128xf32>, vector<2x4x128xf32> -> vector<2x4x128xf32>
    "tpu.trace_stop"() : () -> ()
    %cst_94 = arith.constant 0.899999976 : f32
    %152 = vector.broadcast %cst_94 : f32 to vector<2x128xf32>
    %153 = arith.mulf %152, %96 : vector<2x128xf32>
    %154 = vector.extract_strided_slice %151 {offsets = [0, 0, 0], sizes = [2, 1, 128], strides = [1, 1, 1]} : vector<2x4x128xf32> to vector<2x1x128xf32>
    %155 = vector.shape_cast %154 : vector<2x1x128xf32> to vector<2x128xf32>
    %cst_95 = arith.constant 1.000000e-01 : f32
    %156 = vector.broadcast %cst_95 : f32 to vector<2x128xf32>
    %157 = arith.mulf %156, %155 : vector<2x128xf32>
    %158 = arith.addf %153, %157 : vector<2x128xf32>
    %c0_96 = arith.constant 0 : index
    %c4_97 = arith.constant 4 : index
    %c0_98 = arith.constant 0 : index
    %159 = vector.load %arg7[%c0_96, %c4_97, %c0_98] : memref<2x8x128xf32, #tpu.memory_space<vmem>>, vector<2x1x128xf32>
    %160 = vector.shape_cast %159 : vector<2x1x128xf32> to vector<2x128xf32>
    %161 = vector.shape_cast %158 : vector<2x128xf32> to vector<2x1x128xf32>
    tpu.vector_store %arg7[%c0_96, %c4_97, %c0_98], %161 {strides = array<i32>} : memref<2x8x128xf32, #tpu.memory_space<vmem>>, vector<2x1x128xf32>,
    %cst_99 = arith.constant 0.899999976 : f32
    %162 = vector.broadcast %cst_99 : f32 to vector<2x128xf32>
    %163 = arith.mulf %162, %158 : vector<2x128xf32>
    %164 = vector.extract_strided_slice %151 {offsets = [0, 1, 0], sizes = [2, 1, 128], strides = [1, 1, 1]} : vector<2x4x128xf32> to vector<2x1x128xf32>
    %165 = vector.shape_cast %164 : vector<2x1x128xf32> to vector<2x128xf32>
    %cst_100 = arith.constant 1.000000e-01 : f32
    %166 = vector.broadcast %cst_100 : f32 to vector<2x128xf32>
    %167 = arith.mulf %166, %165 : vector<2x128xf32>
    %168 = arith.addf %163, %167 : vector<2x128xf32>
    %c0_101 = arith.constant 0 : index
    %c5_102 = arith.constant 5 : index
    %c0_103 = arith.constant 0 : index
    %169 = vector.load %arg7[%c0_101, %c5_102, %c0_103] : memref<2x8x128xf32, #tpu.memory_space<vmem>>, vector<2x1x128xf32>
    %170 = vector.shape_cast %169 : vector<2x1x128xf32> to vector<2x128xf32>
    %171 = vector.shape_cast %168 : vector<2x128xf32> to vector<2x1x128xf32>
    tpu.vector_store %arg7[%c0_101, %c5_102, %c0_103], %171 {strides = array<i32>} : memref<2x8x128xf32, #tpu.memory_space<vmem>>, vector<2x1x128xf32>,
    %cst_104 = arith.constant 0.899999976 : f32
    %172 = vector.broadcast %cst_104 : f32 to vector<2x128xf32>
    %173 = arith.mulf %172, %168 : vector<2x128xf32>
    %174 = vector.extract_strided_slice %151 {offsets = [0, 2, 0], sizes = [2, 1, 128], strides = [1, 1, 1]} : vector<2x4x128xf32> to vector<2x1x128xf32>
    %175 = vector.shape_cast %174 : vector<2x1x128xf32> to vector<2x128xf32>
    %cst_105 = arith.constant 1.000000e-01 : f32
    %176 = vector.broadcast %cst_105 : f32 to vector<2x128xf32>
    %177 = arith.mulf %176, %175 : vector<2x128xf32>
    %178 = arith.addf %173, %177 : vector<2x128xf32>
    %c0_106 = arith.constant 0 : index
    %c6_107 = arith.constant 6 : index
    %c0_108 = arith.constant 0 : index
    %179 = vector.load %arg7[%c0_106, %c6_107, %c0_108] : memref<2x8x128xf32, #tpu.memory_space<vmem>>, vector<2x1x128xf32>
    %180 = vector.shape_cast %179 : vector<2x1x128xf32> to vector<2x128xf32>
    %181 = vector.shape_cast %178 : vector<2x128xf32> to vector<2x1x128xf32>
    tpu.vector_store %arg7[%c0_106, %c6_107, %c0_108], %181 {strides = array<i32>} : memref<2x8x128xf32, #tpu.memory_space<vmem>>, vector<2x1x128xf32>,
    %cst_109 = arith.constant 0.899999976 : f32
    %182 = vector.broadcast %cst_109 : f32 to vector<2x128xf32>
    %183 = arith.mulf %182, %178 : vector<2x128xf32>
    %184 = vector.extract_strided_slice %151 {offsets = [0, 3, 0], sizes = [2, 1, 128], strides = [1, 1, 1]} : vector<2x4x128xf32> to vector<2x1x128xf32>
    %185 = vector.shape_cast %184 : vector<2x1x128xf32> to vector<2x128xf32>
    %cst_110 = arith.constant 1.000000e-01 : f32
    %186 = vector.broadcast %cst_110 : f32 to vector<2x128xf32>
    %187 = arith.mulf %186, %185 : vector<2x128xf32>
    %188 = arith.addf %183, %187 : vector<2x128xf32>
    %c0_111 = arith.constant 0 : index
    %c7_112 = arith.constant 7 : index
    %c0_113 = arith.constant 0 : index
    %189 = vector.load %arg7[%c0_111, %c7_112, %c0_113] : memref<2x8x128xf32, #tpu.memory_space<vmem>>, vector<2x1x128xf32>
    %190 = vector.shape_cast %189 : vector<2x1x128xf32> to vector<2x128xf32>
    %191 = vector.shape_cast %188 : vector<2x128xf32> to vector<2x1x128xf32>
    tpu.vector_store %arg7[%c0_111, %c7_112, %c0_113], %191 {strides = array<i32>} : memref<2x8x128xf32, #tpu.memory_space<vmem>>, vector<2x1x128xf32>,
    %c0_114 = arith.constant 0 : index
    %c4_115 = arith.constant 4 : index
    %c0_116 = arith.constant 0 : index
    %192 = vector.load %arg7[%c0_114, %c4_115, %c0_116] : memref<2x8x128xf32, #tpu.memory_space<vmem>>, vector<2x4x128xf32>
    %c0_117 = arith.constant 0 : index
    %c0_118 = arith.constant 0 : index
    %c0_119 = arith.constant 0 : index
    %193 = vector.load %arg13[%c0_117, %c0_118, %c0_119] : memref<2x4x128xf32, #tpu.memory_space<vmem>>, vector<2x4x128xf32>
    tpu.vector_store %arg13[%c0_117, %c0_118, %c0_119], %192 {strides = array<i32>} : memref<2x4x128xf32, #tpu.memory_space<vmem>>, vector<2x4x128xf32>,
    %c0_120 = arith.constant 0 : index
    %c0_121 = arith.constant 0 : index
    %194 = vector.load %arg11[%c0_120, %c0_121] : memref<2x128xf32, #tpu.memory_space<vmem>>, vector<2x128xf32>
    tpu.vector_store %arg11[%c0_120, %c0_121], %145 {strides = array<i32>} : memref<2x128xf32, #tpu.memory_space<vmem>>, vector<2x128xf32>,
    %c0_122 = arith.constant 0 : index
    %c0_123 = arith.constant 0 : index
    %195 = vector.load %arg12[%c0_122, %c0_123] : memref<2x128xf32, #tpu.memory_space<vmem>>, vector<2x128xf32>
    tpu.vector_store %arg12[%c0_122, %c0_123], %188 {strides = array<i32>} : memref<2x128xf32, #tpu.memory_space<vmem>>, vector<2x128xf32>,
    %c1_i32 = arith.constant 1 : i32
    %196 = arith.cmpi eq, %arg1, %c1_i32 : i32
    %197 = arith.extui %196 : i1 to i32
    %c0_i32_124 = arith.constant 0 : i32
    %198 = arith.cmpi ne, %197, %c0_i32_124 : i32
    scf.if %198 {
      %c0_125 = arith.constant 0 : index
      %c0_126 = arith.constant 0 : index
      %199 = vector.load %arg8[%c0_125, %c0_126] : memref<2x128xf32, #tpu.memory_space<vmem>>, vector<2x128xf32>
      tpu.vector_store %arg8[%c0_125, %c0_126], %145 {strides = array<i32>} : memref<2x128xf32, #tpu.memory_space<vmem>>, vector<2x128xf32>,
      %c0_127 = arith.constant 0 : index
      %c0_128 = arith.constant 0 : index
      %200 = vector.load %arg9[%c0_127, %c0_128] : memref<2x128xf32, #tpu.memory_space<vmem>>, vector<2x128xf32>
      tpu.vector_store %arg9[%c0_127, %c0_128], %188 {strides = array<i32>} : memref<2x128xf32, #tpu.memory_space<vmem>>, vector<2x128xf32>,
      %c0_129 = arith.constant 0 : index
      %c0_130 = arith.constant 0 : index
      %c0_131 = arith.constant 0 : index
      %201 = vector.load %arg13[%c0_129, %c0_130, %c0_131] : memref<2x4x128xf32, #tpu.memory_space<vmem>>, vector<2x4x128xf32>
      %c0_132 = arith.constant 0 : index
      %c0_133 = arith.constant 0 : index
      %c0_134 = arith.constant 0 : index
      %202 = vector.load %arg10[%c0_132, %c0_133, %c0_134] : memref<2x4x128xf32, #tpu.memory_space<vmem>>, vector<2x4x128xf32>
      tpu.vector_store %arg10[%c0_132, %c0_133, %c0_134], %201 {strides = array<i32>} : memref<2x4x128xf32, #tpu.memory_space<vmem>>, vector<2x4x128xf32>,
    } else {
    }
    return
  }
  func.func @transform_0(%arg0: i32, %arg1: i32) -> (i32, i32, i32) {
    %c0_i32 = arith.constant 0 : i32
    %c0_i32_0 = arith.constant 0 : i32
    return %arg0, %arg1, %c0_i32 : i32, i32, i32
  }
  func.func @transform_1(%arg0: i32, %arg1: i32) -> (i32, i32) {
    %c0_i32 = arith.constant 0 : i32
    %c0_i32_0 = arith.constant 0 : i32
    %c0_i32_1 = arith.constant 0 : i32
    return %c0_i32, %c0_i32_0 : i32, i32
  }
  func.func @transform_2(%arg0: i32, %arg1: i32) -> (i32, i32) {
    %c0_i32 = arith.constant 0 : i32
    %c0_i32_0 = arith.constant 0 : i32
    %c0_i32_1 = arith.constant 0 : i32
    return %c0_i32, %c0_i32_0 : i32, i32
  }
  func.func @transform_3(%arg0: i32, %arg1: i32) -> (i32, i32, i32) {
    %c0_i32 = arith.constant 0 : i32
    %c0_i32_0 = arith.constant 0 : i32
    %c0_i32_1 = arith.constant 0 : i32
    return %arg0, %c0_i32, %c0_i32_0 : i32, i32, i32
  }
  func.func @transform_4(%arg0: i32, %arg1: i32) -> (i32, i32, i32) {
    %c0_i32 = arith.constant 0 : i32
    %c0_i32_0 = arith.constant 0 : i32
    return %arg0, %arg1, %c0_i32 : i32, i32, i32
  }
  func.func @transform_5(%arg0: i32, %arg1: i32) -> (i32, i32, i32) {
    %c0_i32 = arith.constant 0 : i32
    %c0_i32_0 = arith.constant 0 : i32
    return %arg0, %arg1, %c0_i32 : i32, i32, i32
  }
  func.func @transform_6(%arg0: i32, %arg1: i32) -> (i32, i32) {
    %c0_i32 = arith.constant 0 : i32
    %c0_i32_0 = arith.constant 0 : i32
    return %arg0, %c0_i32 : i32, i32
  }
  func.func @transform_7(%arg0: i32, %arg1: i32) -> (i32, i32) {
    %c0_i32 = arith.constant 0 : i32
    %c0_i32_0 = arith.constant 0 : i32
    return %arg0, %c0_i32 : i32, i32
  }
  func.func @transform_8(%arg0: i32, %arg1: i32) -> (i32, i32, i32) {
    %c0_i32 = arith.constant 0 : i32
    %c0_i32_0 = arith.constant 0 : i32
    %c0_i32_1 = arith.constant 0 : i32
    return %arg0, %c0_i32, %c0_i32_0 : i32, i32, i32
  }
}

module attributes {stable_mosaic.version = 11 : i64} {
  func.func @_reading_kernel(%arg0: i32, %arg1: i32, %arg2: memref<2x8x16xf32, #tpu.memory_space<vmem>>, %arg3: memref<16x128xf32, #tpu.memory_space<vmem>>, %arg4: memref<128x128xf32, #tpu.memory_space<vmem>>, %arg5: memref<2x128x128xf32, #tpu.memory_space<vmem>>, %arg6: memref<2x8x128xf32, #tpu.memory_space<vmem>>, %arg7: memref<2x8x128xf32, #tpu.memory_space<vmem>>, %arg8: memref<2x128xf32, #tpu.memory_space<vmem>>, %arg9: memref<2x128xf32, #tpu.memory_space<vmem>>, %arg10: memref<2x4x128xf32, #tpu.memory_space<vmem>>, %arg11: memref<2x128xf32, #tpu.memory_space<vmem>>, %arg12: memref<2x128xf32, #tpu.memory_space<vmem>>, %arg13: memref<2x4x128xf32, #tpu.memory_space<vmem>>) attributes {dimension_semantics = [#tpu.dimension_semantics<parallel>, #tpu.dimension_semantics<arbitrary>], iteration_bounds = array<i64: 1, 2>, scalar_prefetch = 0 : i64, scratch_operands = 3 : i64, tpu.core_type = #tpu.core_type<tc>, window_params = [{transform_indices = @transform_0, window_bounds = array<i64: 2, 8, 16>}, {pipeline_mode = #tpu.pipeline_mode<synchronous>, transform_indices = @transform_1, window_bounds = array<i64: 16, 128>}, {pipeline_mode = #tpu.pipeline_mode<synchronous>, transform_indices = @transform_2, window_bounds = array<i64: 128, 128>}, {transform_indices = @transform_3, window_bounds = array<i64: 2, 128, 128>}, {transform_indices = @transform_4, window_bounds = array<i64: 2, 8, 128>}, {transform_indices = @transform_5, window_bounds = array<i64: 2, 8, 128>}, {transform_indices = @transform_6, window_bounds = array<i64: 2, 128>}, {transform_indices = @transform_7, window_bounds = array<i64: 2, 128>}, {transform_indices = @transform_8, window_bounds = array<i64: 2, 4, 128>}]} {
    %c0_i32 = arith.constant 0 : i32
    %0 = arith.cmpi eq, %arg1, %c0_i32 : i32
    %1 = arith.extui %0 : i1 to i32
    %c0_i32_0 = arith.constant 0 : i32
    %2 = arith.cmpi ne, %1, %c0_i32_0 : i32
    scf.if %2 {
      %cst_125 = arith.constant 0.000000e+00 : f32
      %199 = vector.broadcast %cst_125 : f32 to vector<2x128xf32>
      %c0_126 = arith.constant 0 : index
      %c0_127 = arith.constant 0 : index
      %200 = vector.load %arg11[%c0_126, %c0_127] : memref<2x128xf32, #tpu.memory_space<vmem>>, vector<2x128xf32>
      tpu.vector_store %arg11[%c0_126, %c0_127], %199 {strides = array<i32>} : memref<2x128xf32, #tpu.memory_space<vmem>>, vector<2x128xf32>,
      %cst_128 = arith.constant 0.000000e+00 : f32
      %201 = vector.broadcast %cst_128 : f32 to vector<2x128xf32>
      %c0_129 = arith.constant 0 : index
      %c0_130 = arith.constant 0 : index
      %202 = vector.load %arg12[%c0_129, %c0_130] : memref<2x128xf32, #tpu.memory_space<vmem>>, vector<2x128xf32>
      tpu.vector_store %arg12[%c0_129, %c0_130], %201 {strides = array<i32>} : memref<2x128xf32, #tpu.memory_space<vmem>>, vector<2x128xf32>,
      %cst_131 = arith.constant 0.000000e+00 : f32
      %203 = vector.broadcast %cst_131 : f32 to vector<2x4x128xf32>
      %c0_132 = arith.constant 0 : index
      %c0_133 = arith.constant 0 : index
      %c0_134 = arith.constant 0 : index
      %204 = vector.load %arg13[%c0_132, %c0_133, %c0_134] : memref<2x4x128xf32, #tpu.memory_space<vmem>>, vector<2x4x128xf32>
      tpu.vector_store %arg13[%c0_132, %c0_133, %c0_134], %203 {strides = array<i32>} : memref<2x4x128xf32, #tpu.memory_space<vmem>>, vector<2x4x128xf32>,
    } else {
    }
    %c0 = arith.constant 0 : index
    %c0_1 = arith.constant 0 : index
    %c0_2 = arith.constant 0 : index
    %3 = vector.load %arg2[%c0, %c0_1, %c0_2] : memref<2x8x16xf32, #tpu.memory_space<vmem>>, vector<2x8x16xf32>
    %4 = vector.shape_cast %3 : vector<2x8x16xf32> to vector<16x16xf32>
    %c0_3 = arith.constant 0 : index
    %c0_4 = arith.constant 0 : index
    %5 = vector.load %arg3[%c0_3, %c0_4] : memref<16x128xf32, #tpu.memory_space<vmem>>, vector<16x128xf32>
    %cst = arith.constant dense<0.000000e+00> : vector<16x128xf32>
    %6 = tpu.matmul %4, %5, %cst {dimension_numbers = #tpu.dot_dimension_numbers<[1], [0], [0], [1], [0, 0, 1, 1], [], []>} : vector<16x16xf32>, vector<16x128xf32>, vector<16x128xf32> -> vector<16x128xf32>
    %7 = vector.shape_cast %6 : vector<16x128xf32> to vector<2x8x128xf32>
    %c0_5 = arith.constant 0 : index
    %c0_6 = arith.constant 0 : index
    %8 = vector.load %arg11[%c0_5, %c0_6] : memref<2x128xf32, #tpu.memory_space<vmem>>, vector<2x128xf32>
    %c0_7 = arith.constant 0 : index
    %c0_8 = arith.constant 0 : index
    %9 = vector.load %arg12[%c0_7, %c0_8] : memref<2x128xf32, #tpu.memory_space<vmem>>, vector<2x128xf32>
    %c0_9 = arith.constant 0 : index
    %c0_10 = arith.constant 0 : index
    %c0_11 = arith.constant 0 : index
    %10 = vector.load %arg13[%c0_9, %c0_10, %c0_11] : memref<2x4x128xf32, #tpu.memory_space<vmem>>, vector<2x4x128xf32>
    %11 = vector.shape_cast %10 : vector<2x4x128xf32> to vector<8x128xf32>
    %c0_12 = arith.constant 0 : index
    %c0_13 = arith.constant 0 : index
    %12 = vector.load %arg4[%c0_12, %c0_13] : memref<128x128xf32, #tpu.memory_space<vmem>>, vector<128x128xf32>
    %cst_14 = arith.constant dense<0.000000e+00> : vector<8x128xf32>
    %13 = tpu.matmul %11, %12, %cst_14 {dimension_numbers = #tpu.dot_dimension_numbers<[1], [0], [0], [1], [0, 0, 1, 1], [], []>} : vector<8x128xf32>, vector<128x128xf32>, vector<8x128xf32> -> vector<8x128xf32>
    %14 = vector.shape_cast %13 : vector<8x128xf32> to vector<2x4x128xf32>
    %15 = vector.extract_strided_slice %7 {offsets = [0, 0, 0], sizes = [2, 4, 128], strides = [1, 1, 1]} : vector<2x8x128xf32> to vector<2x4x128xf32>
    %16 = arith.addf %15, %14 : vector<2x4x128xf32>
    %cst_15 = arith.constant 0.899999976 : f32
    %17 = vector.broadcast %cst_15 : f32 to vector<2x128xf32>
    %18 = arith.mulf %17, %8 : vector<2x128xf32>
    %19 = vector.extract_strided_slice %16 {offsets = [0, 0, 0], sizes = [2, 1, 128], strides = [1, 1, 1]} : vector<2x4x128xf32> to vector<2x1x128xf32>
    %20 = vector.shape_cast %19 : vector<2x1x128xf32> to vector<2x128xf32>
    %cst_16 = arith.constant 1.000000e-01 : f32
    %21 = vector.broadcast %cst_16 : f32 to vector<2x128xf32>
    %22 = arith.mulf %21, %20 : vector<2x128xf32>
    %23 = arith.addf %18, %22 : vector<2x128xf32>
    %c0_17 = arith.constant 0 : index
    %c0_18 = arith.constant 0 : index
    %c0_19 = arith.constant 0 : index
    %24 = vector.load %arg6[%c0_17, %c0_18, %c0_19] : memref<2x8x128xf32, #tpu.memory_space<vmem>>, vector<2x1x128xf32>
    %25 = vector.shape_cast %24 : vector<2x1x128xf32> to vector<2x128xf32>
    %26 = vector.shape_cast %23 : vector<2x128xf32> to vector<2x1x128xf32>
    tpu.vector_store %arg6[%c0_17, %c0_18, %c0_19], %26 {strides = array<i32>} : memref<2x8x128xf32, #tpu.memory_space<vmem>>, vector<2x1x128xf32>,
    %cst_20 = arith.constant 0.899999976 : f32
    %27 = vector.broadcast %cst_20 : f32 to vector<2x128xf32>
    %28 = arith.mulf %27, %23 : vector<2x128xf32>
    %29 = vector.extract_strided_slice %16 {offsets = [0, 1, 0], sizes = [2, 1, 128], strides = [1, 1, 1]} : vector<2x4x128xf32> to vector<2x1x128xf32>
    %30 = vector.shape_cast %29 : vector<2x1x128xf32> to vector<2x128xf32>
    %cst_21 = arith.constant 1.000000e-01 : f32
    %31 = vector.broadcast %cst_21 : f32 to vector<2x128xf32>
    %32 = arith.mulf %31, %30 : vector<2x128xf32>
    %33 = arith.addf %28, %32 : vector<2x128xf32>
    %c0_22 = arith.constant 0 : index
    %c1 = arith.constant 1 : index
    %c0_23 = arith.constant 0 : index
    %34 = vector.load %arg6[%c0_22, %c1, %c0_23] : memref<2x8x128xf32, #tpu.memory_space<vmem>>, vector<2x1x128xf32>
    %35 = vector.shape_cast %34 : vector<2x1x128xf32> to vector<2x128xf32>
    %36 = vector.shape_cast %33 : vector<2x128xf32> to vector<2x1x128xf32>
    tpu.vector_store %arg6[%c0_22, %c1, %c0_23], %36 {strides = array<i32>} : memref<2x8x128xf32, #tpu.memory_space<vmem>>, vector<2x1x128xf32>,
    %cst_24 = arith.constant 0.899999976 : f32
    %37 = vector.broadcast %cst_24 : f32 to vector<2x128xf32>
    %38 = arith.mulf %37, %33 : vector<2x128xf32>
    %39 = vector.extract_strided_slice %16 {offsets = [0, 2, 0], sizes = [2, 1, 128], strides = [1, 1, 1]} : vector<2x4x128xf32> to vector<2x1x128xf32>
    %40 = vector.shape_cast %39 : vector<2x1x128xf32> to vector<2x128xf32>
    %cst_25 = arith.constant 1.000000e-01 : f32
    %41 = vector.broadcast %cst_25 : f32 to vector<2x128xf32>
    %42 = arith.mulf %41, %40 : vector<2x128xf32>
    %43 = arith.addf %38, %42 : vector<2x128xf32>
    %c0_26 = arith.constant 0 : index
    %c2 = arith.constant 2 : index
    %c0_27 = arith.constant 0 : index
    %44 = vector.load %arg6[%c0_26, %c2, %c0_27] : memref<2x8x128xf32, #tpu.memory_space<vmem>>, vector<2x1x128xf32>
    %45 = vector.shape_cast %44 : vector<2x1x128xf32> to vector<2x128xf32>
    %46 = vector.shape_cast %43 : vector<2x128xf32> to vector<2x1x128xf32>
    tpu.vector_store %arg6[%c0_26, %c2, %c0_27], %46 {strides = array<i32>} : memref<2x8x128xf32, #tpu.memory_space<vmem>>, vector<2x1x128xf32>,
    %cst_28 = arith.constant 0.899999976 : f32
    %47 = vector.broadcast %cst_28 : f32 to vector<2x128xf32>
    %48 = arith.mulf %47, %43 : vector<2x128xf32>
    %49 = vector.extract_strided_slice %16 {offsets = [0, 3, 0], sizes = [2, 1, 128], strides = [1, 1, 1]} : vector<2x4x128xf32> to vector<2x1x128xf32>
    %50 = vector.shape_cast %49 : vector<2x1x128xf32> to vector<2x128xf32>
    %cst_29 = arith.constant 1.000000e-01 : f32
    %51 = vector.broadcast %cst_29 : f32 to vector<2x128xf32>
    %52 = arith.mulf %51, %50 : vector<2x128xf32>
    %53 = arith.addf %48, %52 : vector<2x128xf32>
    %c0_30 = arith.constant 0 : index
    %c3 = arith.constant 3 : index
    %c0_31 = arith.constant 0 : index
    %54 = vector.load %arg6[%c0_30, %c3, %c0_31] : memref<2x8x128xf32, #tpu.memory_space<vmem>>, vector<2x1x128xf32>
    %55 = vector.shape_cast %54 : vector<2x1x128xf32> to vector<2x128xf32>
    %56 = vector.shape_cast %53 : vector<2x128xf32> to vector<2x1x128xf32>
    tpu.vector_store %arg6[%c0_30, %c3, %c0_31], %56 {strides = array<i32>} : memref<2x8x128xf32, #tpu.memory_space<vmem>>, vector<2x1x128xf32>,
    %c0_32 = arith.constant 0 : index
    %c0_33 = arith.constant 0 : index
    %c0_34 = arith.constant 0 : index
    %57 = vector.load %arg6[%c0_32, %c0_33, %c0_34] : memref<2x8x128xf32, #tpu.memory_space<vmem>>, vector<2x4x128xf32>
    %c0_35 = arith.constant 0 : index
    %c0_36 = arith.constant 0 : index
    %c0_37 = arith.constant 0 : index
    %58 = vector.load %arg5[%c0_35, %c0_36, %c0_37] : memref<2x128x128xf32, #tpu.memory_space<vmem>>, vector<2x128x128xf32>
    "tpu.trace_start"() <{level = 10 : i32, message = "bdj,bij->bdi"}> : () -> ()
    %cst_38 = arith.constant dense<0.000000e+00> : vector<2x4x128xf32>
    %59 = tpu.matmul %57, %58, %cst_38 {dimension_numbers = #tpu.dot_dimension_numbers<[2], [2], [1], [1], [0, 0, 0, 1, 1, 1], [0], [0]>} : vector<2x4x128xf32>, vector<2x128x128xf32>, vector<2x4x128xf32> -> vector<2x4x128xf32>
    "tpu.trace_stop"() : () -> ()
    %cst_39 = arith.constant 0.899999976 : f32
    %60 = vector.broadcast %cst_39 : f32 to vector<2x128xf32>
    %61 = arith.mulf %60, %9 : vector<2x128xf32>
    %62 = vector.extract_strided_slice %59 {offsets = [0, 0, 0], sizes = [2, 1, 128], strides = [1, 1, 1]} : vector<2x4x128xf32> to vector<2x1x128xf32>
    %63 = vector.shape_cast %62 : vector<2x1x128xf32> to vector<2x128xf32>
    %cst_40 = arith.constant 1.000000e-01 : f32
    %64 = vector.broadcast %cst_40 : f32 to vector<2x128xf32>
    %65 = arith.mulf %64, %63 : vector<2x128xf32>
    %66 = arith.addf %61, %65 : vector<2x128xf32>
    %c0_41 = arith.constant 0 : index
    %c0_42 = arith.constant 0 : index
    %c0_43 = arith.constant 0 : index
    %67 = vector.load %arg7[%c0_41, %c0_42, %c0_43] : memref<2x8x128xf32, #tpu.memory_space<vmem>>, vector<2x1x128xf32>
    %68 = vector.shape_cast %67 : vector<2x1x128xf32> to vector<2x128xf32>
    %69 = vector.shape_cast %66 : vector<2x128xf32> to vector<2x1x128xf32>
    tpu.vector_store %arg7[%c0_41, %c0_42, %c0_43], %69 {strides = array<i32>} : memref<2x8x128xf32, #tpu.memory_space<vmem>>, vector<2x1x128xf32>,
    %cst_44 = arith.constant 0.899999976 : f32
    %70 = vector.broadcast %cst_44 : f32 to vector<2x128xf32>
    %71 = arith.mulf %70, %66 : vector<2x128xf32>
    %72 = vector.extract_strided_slice %59 {offsets = [0, 1, 0], sizes = [2, 1, 128], strides = [1, 1, 1]} : vector<2x4x128xf32> to vector<2x1x128xf32>
    %73 = vector.shape_cast %72 : vector<2x1x128xf32> to vector<2x128xf32>
    %cst_45 = arith.constant 1.000000e-01 : f32
    %74 = vector.broadcast %cst_45 : f32 to vector<2x128xf32>
    %75 = arith.mulf %74, %73 : vector<2x128xf32>
    %76 = arith.addf %71, %75 : vector<2x128xf32>
    %c0_46 = arith.constant 0 : index
    %c1_47 = arith.constant 1 : index
    %c0_48 = arith.constant 0 : index
    %77 = vector.load %arg7[%c0_46, %c1_47, %c0_48] : memref<2x8x128xf32, #tpu.memory_space<vmem>>, vector<2x1x128xf32>
    %78 = vector.shape_cast %77 : vector<2x1x128xf32> to vector<2x128xf32>
    %79 = vector.shape_cast %76 : vector<2x128xf32> to vector<2x1x128xf32>
    tpu.vector_store %arg7[%c0_46, %c1_47, %c0_48], %79 {strides = array<i32>} : memref<2x8x128xf32, #tpu.memory_space<vmem>>, vector<2x1x128xf32>,
    %cst_49 = arith.constant 0.899999976 : f32
    %80 = vector.broadcast %cst_49 : f32 to vector<2x128xf32>
    %81 = arith.mulf %80, %76 : vector<2x128xf32>
    %82 = vector.extract_strided_slice %59 {offsets = [0, 2, 0], sizes = [2, 1, 128], strides = [1, 1, 1]} : vector<2x4x128xf32> to vector<2x1x128xf32>
    %83 = vector.shape_cast %82 : vector<2x1x128xf32> to vector<2x128xf32>
    %cst_50 = arith.constant 1.000000e-01 : f32
    %84 = vector.broadcast %cst_50 : f32 to vector<2x128xf32>
    %85 = arith.mulf %84, %83 : vector<2x128xf32>
    %86 = arith.addf %81, %85 : vector<2x128xf32>
    %c0_51 = arith.constant 0 : index
    %c2_52 = arith.constant 2 : index
    %c0_53 = arith.constant 0 : index
    %87 = vector.load %arg7[%c0_51, %c2_52, %c0_53] : memref<2x8x128xf32, #tpu.memory_space<vmem>>, vector<2x1x128xf32>
    %88 = vector.shape_cast %87 : vector<2x1x128xf32> to vector<2x128xf32>
    %89 = vector.shape_cast %86 : vector<2x128xf32> to vector<2x1x128xf32>
    tpu.vector_store %arg7[%c0_51, %c2_52, %c0_53], %89 {strides = array<i32>} : memref<2x8x128xf32, #tpu.memory_space<vmem>>, vector<2x1x128xf32>,
    %cst_54 = arith.constant 0.899999976 : f32
    %90 = vector.broadcast %cst_54 : f32 to vector<2x128xf32>
    %91 = arith.mulf %90, %86 : vector<2x128xf32>
    %92 = vector.extract_strided_slice %59 {offsets = [0, 3, 0], sizes = [2, 1, 128], strides = [1, 1, 1]} : vector<2x4x128xf32> to vector<2x1x128xf32>
    %93 = vector.shape_cast %92 : vector<2x1x128xf32> to vector<2x128xf32>
    %cst_55 = arith.constant 1.000000e-01 : f32
    %94 = vector.broadcast %cst_55 : f32 to vector<2x128xf32>
    %95 = arith.mulf %94, %93 : vector<2x128xf32>
    %96 = arith.addf %91, %95 : vector<2x128xf32>
    %c0_56 = arith.constant 0 : index
    %c3_57 = arith.constant 3 : index
    %c0_58 = arith.constant 0 : index
    %97 = vector.load %arg7[%c0_56, %c3_57, %c0_58] : memref<2x8x128xf32, #tpu.memory_space<vmem>>, vector<2x1x128xf32>
    %98 = vector.shape_cast %97 : vector<2x1x128xf32> to vector<2x128xf32>
    %99 = vector.shape_cast %96 : vector<2x128xf32> to vector<2x1x128xf32>
    tpu.vector_store %arg7[%c0_56, %c3_57, %c0_58], %99 {strides = array<i32>} : memref<2x8x128xf32, #tpu.memory_space<vmem>>, vector<2x1x128xf32>,
    %c0_59 = arith.constant 0 : index
    %c0_60 = arith.constant 0 : index
    %c0_61 = arith.constant 0 : index
    %100 = vector.load %arg7[%c0_59, %c0_60, %c0_61] : memref<2x8x128xf32, #tpu.memory_space<vmem>>, vector<2x4x128xf32>
    %c0_62 = arith.constant 0 : index
    %c0_63 = arith.constant 0 : index
    %c0_64 = arith.constant 0 : index
    %101 = vector.load %arg13[%c0_62, %c0_63, %c0_64] : memref<2x4x128xf32, #tpu.memory_space<vmem>>, vector<2x4x128xf32>
    tpu.vector_store %arg13[%c0_62, %c0_63, %c0_64], %100 {strides = array<i32>} : memref<2x4x128xf32, #tpu.memory_space<vmem>>, vector<2x4x128xf32>,
    %c0_65 = arith.constant 0 : index
    %c0_66 = arith.constant 0 : index
    %c0_67 = arith.constant 0 : index
    %102 = vector.load %arg13[%c0_65, %c0_66, %c0_67] : memref<2x4x128xf32, #tpu.memory_space<vmem>>, vector<2x4x128xf32>
    %103 = vector.shape_cast %102 : vector<2x4x128xf32> to vector<8x128xf32>
    %c0_68 = arith.constant 0 : index
    %c0_69 = arith.constant 0 : index
    %104 = vector.load %arg4[%c0_68, %c0_69] : memref<128x128xf32, #tpu.memory_space<vmem>>, vector<128x128xf32>
    %cst_70 = arith.constant dense<0.000000e+00> : vector<8x128xf32>
    %105 = tpu.matmul %103, %104, %cst_70 {dimension_numbers = #tpu.dot_dimension_numbers<[1], [0], [0], [1], [0, 0, 1, 1], [], []>} : vector<8x128xf32>, vector<128x128xf32>, vector<8x128xf32> -> vector<8x128xf32>
    %106 = vector.shape_cast %105 : vector<8x128xf32> to vector<2x4x128xf32>
    %107 = vector.extract_strided_slice %7 {offsets = [0, 4, 0], sizes = [2, 4, 128], strides = [1, 1, 1]} : vector<2x8x128xf32> to vector<2x4x128xf32>
    %108 = arith.addf %107, %106 : vector<2x4x128xf32>
    %cst_71 = arith.constant 0.899999976 : f32
    %109 = vector.broadcast %cst_71 : f32 to vector<2x128xf32>
    %110 = arith.mulf %109, %53 : vector<2x128xf32>
    %111 = vector.extract_strided_slice %108 {offsets = [0, 0, 0], sizes = [2, 1, 128], strides = [1, 1, 1]} : vector<2x4x128xf32> to vector<2x1x128xf32>
    %112 = vector.shape_cast %111 : vector<2x1x128xf32> to vector<2x128xf32>
    %cst_72 = arith.constant 1.000000e-01 : f32
    %113 = vector.broadcast %cst_72 : f32 to vector<2x128xf32>
    %114 = arith.mulf %113, %112 : vector<2x128xf32>
    %115 = arith.addf %110, %114 : vector<2x128xf32>
    %c0_73 = arith.constant 0 : index
    %c4 = arith.constant 4 : index
    %c0_74 = arith.constant 0 : index
    %116 = vector.load %arg6[%c0_73, %c4, %c0_74] : memref<2x8x128xf32, #tpu.memory_space<vmem>>, vector<2x1x128xf32>
    %117 = vector.shape_cast %116 : vector<2x1x128xf32> to vector<2x128xf32>
    %118 = vector.shape_cast %115 : vector<2x128xf32> to vector<2x1x128xf32>
    tpu.vector_store %arg6[%c0_73, %c4, %c0_74], %118 {strides = array<i32>} : memref<2x8x128xf32, #tpu.memory_space<vmem>>, vector<2x1x128xf32>,
    %cst_75 = arith.constant 0.899999976 : f32
    %119 = vector.broadcast %cst_75 : f32 to vector<2x128xf32>
    %120 = arith.mulf %119, %115 : vector<2x128xf32>
    %121 = vector.extract_strided_slice %108 {offsets = [0, 1, 0], sizes = [2, 1, 128], strides = [1, 1, 1]} : vector<2x4x128xf32> to vector<2x1x128xf32>
    %122 = vector.shape_cast %121 : vector<2x1x128xf32> to vector<2x128xf32>
    %cst_76 = arith.constant 1.000000e-01 : f32
    %123 = vector.broadcast %cst_76 : f32 to vector<2x128xf32>
    %124 = arith.mulf %123, %122 : vector<2x128xf32>
    %125 = arith.addf %120, %124 : vector<2x128xf32>
    %c0_77 = arith.constant 0 : index
    %c5 = arith.constant 5 : index
    %c0_78 = arith.constant 0 : index
    %126 = vector.load %arg6[%c0_77, %c5, %c0_78] : memref<2x8x128xf32, #tpu.memory_space<vmem>>, vector<2x1x128xf32>
    %127 = vector.shape_cast %126 : vector<2x1x128xf32> to vector<2x128xf32>
    %128 = vector.shape_cast %125 : vector<2x128xf32> to vector<2x1x128xf32>
    tpu.vector_store %arg6[%c0_77, %c5, %c0_78], %128 {strides = array<i32>} : memref<2x8x128xf32, #tpu.memory_space<vmem>>, vector<2x1x128xf32>,
    %cst_79 = arith.constant 0.899999976 : f32
    %129 = vector.broadcast %cst_79 : f32 to vector<2x128xf32>
    %130 = arith.mulf %129, %125 : vector<2x128xf32>
    %131 = vector.extract_strided_slice %108 {offsets = [0, 2, 0], sizes = [2, 1, 128], strides = [1, 1, 1]} : vector<2x4x128xf32> to vector<2x1x128xf32>
    %132 = vector.shape_cast %131 : vector<2x1x128xf32> to vector<2x128xf32>
    %cst_80 = arith.constant 1.000000e-01 : f32
    %133 = vector.broadcast %cst_80 : f32 to vector<2x128xf32>
    %134 = arith.mulf %133, %132 : vector<2x128xf32>
    %135 = arith.addf %130, %134 : vector<2x128xf32>
    %c0_81 = arith.constant 0 : index
    %c6 = arith.constant 6 : index
    %c0_82 = arith.constant 0 : index
    %136 = vector.load %arg6[%c0_81, %c6, %c0_82] : memref<2x8x128xf32, #tpu.memory_space<vmem>>, vector<2x1x128xf32>
    %137 = vector.shape_cast %136 : vector<2x1x128xf32> to vector<2x128xf32>
    %138 = vector.shape_cast %135 : vector<2x128xf32> to vector<2x1x128xf32>
    tpu.vector_store %arg6[%c0_81, %c6, %c0_82], %138 {strides = array<i32>} : memref<2x8x128xf32, #tpu.memory_space<vmem>>, vector<2x1x128xf32>,
    %cst_83 = arith.constant 0.899999976 : f32
    %139 = vector.broadcast %cst_83 : f32 to vector<2x128xf32>
    %140 = arith.mulf %139, %135 : vector<2x128xf32>
    %141 = vector.extract_strided_slice %108 {offsets = [0, 3, 0], sizes = [2, 1, 128], strides = [1, 1, 1]} : vector<2x4x128xf32> to vector<2x1x128xf32>
    %142 = vector.shape_cast %141 : vector<2x1x128xf32> to vector<2x128xf32>
    %cst_84 = arith.constant 1.000000e-01 : f32
    %143 = vector.broadcast %cst_84 : f32 to vector<2x128xf32>
    %144 = arith.mulf %143, %142 : vector<2x128xf32>
    %145 = arith.addf %140, %144 : vector<2x128xf32>
    %c0_85 = arith.constant 0 : index
    %c7 = arith.constant 7 : index
    %c0_86 = arith.constant 0 : index
    %146 = vector.load %arg6[%c0_85, %c7, %c0_86] : memref<2x8x128xf32, #tpu.memory_space<vmem>>, vector<2x1x128xf32>
    %147 = vector.shape_cast %146 : vector<2x1x128xf32> to vector<2x128xf32>
    %148 = vector.shape_cast %145 : vector<2x128xf32> to vector<2x1x128xf32>
    tpu.vector_store %arg6[%c0_85, %c7, %c0_86], %148 {strides = array<i32>} : memref<2x8x128xf32, #tpu.memory_space<vmem>>, vector<2x1x128xf32>,
    %c0_87 = arith.constant 0 : index
    %c4_88 = arith.constant 4 : index
    %c0_89 = arith.constant 0 : index
    %149 = vector.load %arg6[%c0_87, %c4_88, %c0_89] : memref<2x8x128xf32, #tpu.memory_space<vmem>>, vector<2x4x128xf32>
    %c0_90 = arith.constant 0 : index
    %c0_91 = arith.constant 0 : index
    %c0_92 = arith.constant 0 : index
    %150 = vector.load %arg5[%c0_90, %c0_91, %c0_92] : memref<2x128x128xf32, #tpu.memory_space<vmem>>, vector<2x128x128xf32>
    "tpu.trace_start"() <{level = 10 : i32, message = "bdj,bij->bdi"}> : () -> ()
    %cst_93 = arith.constant dense<0.000000e+00> : vector<2x4x128xf32>
    %151 = tpu.matmul %149, %150, %cst_93 {dimension_numbers = #tpu.dot_dimension_numbers<[2], [2], [1], [1], [0, 0, 0, 1, 1, 1], [0], [0]>} : vector<2x4x128xf32>, vector<2x128x128xf32>, vector<2x4x128xf32> -> vector<2x4x128xf32>
    "tpu.trace_stop"() : () -> ()
    %cst_94 = arith.constant 0.899999976 : f32
    %152 = vector.broadcast %cst_94 : f32 to vector<2x128xf32>
    %153 = arith.mulf %152, %96 : vector<2x128xf32>
    %154 = vector.extract_strided_slice %151 {offsets = [0, 0, 0], sizes = [2, 1, 128], strides = [1, 1, 1]} : vector<2x4x128xf32> to vector<2x1x128xf32>
    %155 = vector.shape_cast %154 : vector<2x1x128xf32> to vector<2x128xf32>
    %cst_95 = arith.constant 1.000000e-01 : f32
    %156 = vector.broadcast %cst_95 : f32 to vector<2x128xf32>
    %157 = arith.mulf %156, %155 : vector<2x128xf32>
    %158 = arith.addf %153, %157 : vector<2x128xf32>
    %c0_96 = arith.constant 0 : index
    %c4_97 = arith.constant 4 : index
    %c0_98 = arith.constant 0 : index
    %159 = vector.load %arg7[%c0_96, %c4_97, %c0_98] : memref<2x8x128xf32, #tpu.memory_space<vmem>>, vector<2x1x128xf32>
    %160 = vector.shape_cast %159 : vector<2x1x128xf32> to vector<2x128xf32>
    %161 = vector.shape_cast %158 : vector<2x128xf32> to vector<2x1x128xf32>
    tpu.vector_store %arg7[%c0_96, %c4_97, %c0_98], %161 {strides = array<i32>} : memref<2x8x128xf32, #tpu.memory_space<vmem>>, vector<2x1x128xf32>,
    %cst_99 = arith.constant 0.899999976 : f32
    %162 = vector.broadcast %cst_99 : f32 to vector<2x128xf32>
    %163 = arith.mulf %162, %158 : vector<2x128xf32>
    %164 = vector.extract_strided_slice %151 {offsets = [0, 1, 0], sizes = [2, 1, 128], strides = [1, 1, 1]} : vector<2x4x128xf32> to vector<2x1x128xf32>
    %165 = vector.shape_cast %164 : vector<2x1x128xf32> to vector<2x128xf32>
    %cst_100 = arith.constant 1.000000e-01 : f32
    %166 = vector.broadcast %cst_100 : f32 to vector<2x128xf32>
    %167 = arith.mulf %166, %165 : vector<2x128xf32>
    %168 = arith.addf %163, %167 : vector<2x128xf32>
    %c0_101 = arith.constant 0 : index
    %c5_102 = arith.constant 5 : index
    %c0_103 = arith.constant 0 : index
    %169 = vector.load %arg7[%c0_101, %c5_102, %c0_103] : memref<2x8x128xf32, #tpu.memory_space<vmem>>, vector<2x1x128xf32>
    %170 = vector.shape_cast %169 : vector<2x1x128xf32> to vector<2x128xf32>
    %171 = vector.shape_cast %168 : vector<2x128xf32> to vector<2x1x128xf32>
    tpu.vector_store %arg7[%c0_101, %c5_102, %c0_103], %171 {strides = array<i32>} : memref<2x8x128xf32, #tpu.memory_space<vmem>>, vector<2x1x128xf32>,
    %cst_104 = arith.constant 0.899999976 : f32
    %172 = vector.broadcast %cst_104 : f32 to vector<2x128xf32>
    %173 = arith.mulf %172, %168 : vector<2x128xf32>
    %174 = vector.extract_strided_slice %151 {offsets = [0, 2, 0], sizes = [2, 1, 128], strides = [1, 1, 1]} : vector<2x4x128xf32> to vector<2x1x128xf32>
    %175 = vector.shape_cast %174 : vector<2x1x128xf32> to vector<2x128xf32>
    %cst_105 = arith.constant 1.000000e-01 : f32
    %176 = vector.broadcast %cst_105 : f32 to vector<2x128xf32>
    %177 = arith.mulf %176, %175 : vector<2x128xf32>
    %178 = arith.addf %173, %177 : vector<2x128xf32>
    %c0_106 = arith.constant 0 : index
    %c6_107 = arith.constant 6 : index
    %c0_108 = arith.constant 0 : index
    %179 = vector.load %arg7[%c0_106, %c6_107, %c0_108] : memref<2x8x128xf32, #tpu.memory_space<vmem>>, vector<2x1x128xf32>
    %180 = vector.shape_cast %179 : vector<2x1x128xf32> to vector<2x128xf32>
    %181 = vector.shape_cast %178 : vector<2x128xf32> to vector<2x1x128xf32>
    tpu.vector_store %arg7[%c0_106, %c6_107, %c0_108], %181 {strides = array<i32>} : memref<2x8x128xf32, #tpu.memory_space<vmem>>, vector<2x1x128xf32>,
    %cst_109 = arith.constant 0.899999976 : f32
    %182 = vector.broadcast %cst_109 : f32 to vector<2x128xf32>
    %183 = arith.mulf %182, %178 : vector<2x128xf32>
    %184 = vector.extract_strided_slice %151 {offsets = [0, 3, 0], sizes = [2, 1, 128], strides = [1, 1, 1]} : vector<2x4x128xf32> to vector<2x1x128xf32>
    %185 = vector.shape_cast %184 : vector<2x1x128xf32> to vector<2x128xf32>
    %cst_110 = arith.constant 1.000000e-01 : f32
    %186 = vector.broadcast %cst_110 : f32 to vector<2x128xf32>
    %187 = arith.mulf %186, %185 : vector<2x128xf32>
    %188 = arith.addf %183, %187 : vector<2x128xf32>
    %c0_111 = arith.constant 0 : index
    %c7_112 = arith.constant 7 : index
    %c0_113 = arith.constant 0 : index
    %189 = vector.load %arg7[%c0_111, %c7_112, %c0_113] : memref<2x8x128xf32, #tpu.memory_space<vmem>>, vector<2x1x128xf32>
    %190 = vector.shape_cast %189 : vector<2x1x128xf32> to vector<2x128xf32>
    %191 = vector.shape_cast %188 : vector<2x128xf32> to vector<2x1x128xf32>
    tpu.vector_store %arg7[%c0_111, %c7_112, %c0_113], %191 {strides = array<i32>} : memref<2x8x128xf32, #tpu.memory_space<vmem>>, vector<2x1x128xf32>,
    %c0_114 = arith.constant 0 : index
    %c4_115 = arith.constant 4 : index
    %c0_116 = arith.constant 0 : index
    %192 = vector.load %arg7[%c0_114, %c4_115, %c0_116] : memref<2x8x128xf32, #tpu.memory_space<vmem>>, vector<2x4x128xf32>
    %c0_117 = arith.constant 0 : index
    %c0_118 = arith.constant 0 : index
    %c0_119 = arith.constant 0 : index
    %193 = vector.load %arg13[%c0_117, %c0_118, %c0_119] : memref<2x4x128xf32, #tpu.memory_space<vmem>>, vector<2x4x128xf32>
    tpu.vector_store %arg13[%c0_117, %c0_118, %c0_119], %192 {strides = array<i32>} : memref<2x4x128xf32, #tpu.memory_space<vmem>>, vector<2x4x128xf32>,
    %c0_120 = arith.constant 0 : index
    %c0_121 = arith.constant 0 : index
    %194 = vector.load %arg11[%c0_120, %c0_121] : memref<2x128xf32, #tpu.memory_space<vmem>>, vector<2x128xf32>
    tpu.vector_store %arg11[%c0_120, %c0_121], %145 {strides = array<i32>} : memref<2x128xf32, #tpu.memory_space<vmem>>, vector<2x128xf32>,
    %c0_122 = arith.constant 0 : index
    %c0_123 = arith.constant 0 : index
    %195 = vector.load %arg12[%c0_122, %c0_123] : memref<2x128xf32, #tpu.memory_space<vmem>>, vector<2x128xf32>
    tpu.vector_store %arg12[%c0_122, %c0_123], %188 {strides = array<i32>} : memref<2x128xf32, #tpu.memory_space<vmem>>, vector<2x128xf32>,
    %c1_i32 = arith.constant 1 : i32
    %196 = arith.cmpi eq, %arg1, %c1_i32 : i32
    %197 = arith.extui %196 : i1 to i32
    %c0_i32_124 = arith.constant 0 : i32
    %198 = arith.cmpi ne, %197, %c0_i32_124 : i32
    scf.if %198 {
      %c0_125 = arith.constant 0 : index
      %c0_126 = arith.constant 0 : index
      %199 = vector.load %arg8[%c0_125, %c0_126] : memref<2x128xf32, #tpu.memory_space<vmem>>, vector<2x128xf32>
      tpu.vector_store %arg8[%c0_125, %c0_126], %145 {strides = array<i32>} : memref<2x128xf32, #tpu.memory_space<vmem>>, vector<2x128xf32>,
      %c0_127 = arith.constant 0 : index
      %c0_128 = arith.constant 0 : index
      %200 = vector.load %arg9[%c0_127, %c0_128] : memref<2x128xf32, #tpu.memory_space<vmem>>, vector<2x128xf32>
      tpu.vector_store %arg9[%c0_127, %c0_128], %188 {strides = array<i32>} : memref<2x128xf32, #tpu.memory_space<vmem>>, vector<2x128xf32>,
      %c0_129 = arith.constant 0 : index
      %c0_130 = arith.constant 0 : index
      %c0_131 = arith.constant 0 : index
      %201 = vector.load %arg13[%c0_129, %c0_130, %c0_131] : memref<2x4x128xf32, #tpu.memory_space<vmem>>, vector<2x4x128xf32>
      %c0_132 = arith.constant 0 : index
      %c0_133 = arith.constant 0 : index
      %c0_134 = arith.constant 0 : index
      %202 = vector.load %arg10[%c0_132, %c0_133, %c0_134] : memref<2x4x128xf32, #tpu.memory_space<vmem>>, vector<2x4x128xf32>
      tpu.vector_store %arg10[%c0_132, %c0_133, %c0_134], %201 {strides = array<i32>} : memref<2x4x128xf32, #tpu.memory_space<vmem>>, vector<2x4x128xf32>,
    } else {
    }
    return
  }
  func.func @transform_0(%arg0: i32, %arg1: i32) -> (i32, i32, i32) {
    %c0_i32 = arith.constant 0 : i32
    %c0_i32_0 = arith.constant 0 : i32
    return %arg0, %arg1, %c0_i32 : i32, i32, i32
  }
  func.func @transform_1(%arg0: i32, %arg1: i32) -> (i32, i32) {
    %c0_i32 = arith.constant 0 : i32
    %c0_i32_0 = arith.constant 0 : i32
    %c0_i32_1 = arith.constant 0 : i32
    return %c0_i32, %c0_i32_0 : i32, i32
  }
  func.func @transform_2(%arg0: i32, %arg1: i32) -> (i32, i32) {
    %c0_i32 = arith.constant 0 : i32
    %c0_i32_0 = arith.constant 0 : i32
    %c0_i32_1 = arith.constant 0 : i32
    return %c0_i32, %c0_i32_0 : i32, i32
  }
  func.func @transform_3(%arg0: i32, %arg1: i32) -> (i32, i32, i32) {
    %c0_i32 = arith.constant 0 : i32
    %c0_i32_0 = arith.constant 0 : i32
    %c0_i32_1 = arith.constant 0 : i32
    return %arg0, %c0_i32, %c0_i32_0 : i32, i32, i32
  }
  func.func @transform_4(%arg0: i32, %arg1: i32) -> (i32, i32, i32) {
    %c0_i32 = arith.constant 0 : i32
    %c0_i32_0 = arith.constant 0 : i32
    return %arg0, %arg1, %c0_i32 : i32, i32, i32
  }
  func.func @transform_5(%arg0: i32, %arg1: i32) -> (i32, i32, i32) {
    %c0_i32 = arith.constant 0 : i32
    %c0_i32_0 = arith.constant 0 : i32
    return %arg0, %arg1, %c0_i32 : i32, i32, i32
  }
  func.func @transform_6(%arg0: i32, %arg1: i32) -> (i32, i32) {
    %c0_i32 = arith.constant 0 : i32
    %c0_i32_0 = arith.constant 0 : i32
    return %arg0, %c0_i32 : i32, i32
  }
  func.func @transform_7(%arg0: i32, %arg1: i32) -> (i32, i32) {
    %c0_i32 = arith.constant 0 : i32
    %c0_i32_0 = arith.constant 0 : i32
    return %arg0, %c0_i32 : i32, i32
  }
  func.func @transform_8(%arg0: i32, %arg1: i32) -> (i32, i32, i32) {
    %c0_i32 = arith.constant 0 : i32
    %c0_i32_0 = arith.constant 0 : i32
    %c0_i32_1 = arith.constant 0 : i32
    return %arg0, %c0_i32, %c0_i32_0 : i32, i32, i32
  }
}

</mosaic_0001>

<bundles_post_ra>
// kernel: tpu_custom_call.1
= control target key start
LH: loop header
LB: loop body
LE: loop exit
PB: predicated region body
PF: predicated region fallthrough
CT: control target
= control target key end

     0   :  { %s3471_s0 = inlined_call_operand.hbm [shape: f32[2,16,16], index: 0, kind: input, shape index: {}]   ;;  %s3472_s1 = inlined_call_operand.hbm [shape: f32[16,128], index: 1, kind: input, shape index: {}]   ;;  %s3473_s2 = inlined_call_operand.hbm [shape: f32[128,128], index: 2, kind: input, shape index: {}]   ;;  %s3474_s3 = inlined_call_operand.hbm [shape: f32[2,128,128], index: 3, kind: input, shape index: {}]   ;;  %s3475_s4 = inlined_call_operand.hbm [shape: f32[2,16,128], index: 4, kind: output, shape index: {0}]   ;;  %s3476_s5 = inlined_call_operand.hbm [shape: f32[2,16,128], index: 5, kind: output, shape index: {1}]   ;;  %s3477_s6 = inlined_call_operand.hbm [shape: f32[2,128], index: 6, kind: output, shape index: {2}]   ;;  %s3478_s7 = inlined_call_operand.hbm [shape: f32[2,128], index: 7, kind: output, shape index: {3}]   ;;  %s3479_s8 = inlined_call_operand.hbm [shape: f32[2,4,128], index: 8, kind: output, shape index: {4}]  }
   0x1   :  { %3497 = sst [smem:[#allocation35_spill]] %s3472_s1 }
   0x2   :  { %3498 = sst [smem:[#allocation36_spill]] %s3473_s2 }
   0x3   :  { %3499 = sst [smem:[#allocation37_spill]] %s3474_s3 }
   0x4   :  { %14 = vsyncpa [#allocation6], 0 }
   0x5   :  { %16 = vsyncpa [#allocation6 + $0x1], 0 }
   0x6   :  { %17 = vsyncpa [#allocation9], 0 }
   0x7   :  { %18 = vsyncpa [#allocation12], 0 }
   0x8   :  { %19 = vsyncpa [#allocation7], 0 }
   0x9   :  { %21 = vsyncpa [#allocation7 + $0x1], 0 }
   0xa   :  { %22 = vsyncpa [#allocation15], 0 }
   0xb   :  { %24 = vsyncpa [#allocation15 + $0x1], 0 }
   0xc   :  { %25 = vsyncpa [#allocation18], 0  ;;  %s2781_s27 = smov 0   ;;  %s2783_s28 = smov 0  }
   0xd   :  { %s2785_s29 = smov 0   ;;  %s2787_s30 = smov 0  }
   0xe   :  { %s2789_s9 = smov 0   ;;  %s2791_s10 = smov 0  }
   0xf LB: > { %3500 = sst [smem:[#allocation27_spill]] %s2693_s27  ;;  %s2812_s11 = sadd.s32 4294967295, %s2713_s10   ;;  %s2713_s10 = sphi %s2791_s10, %s31_s10   ;;  %s2709_s9 = sphi %s2789_s9, %s3551_s9   ;;  %s2705_s30 = sphi %s2787_s30, %s3550_s30   ;;  %s2701_s29 = sphi %s2785_s29, %s3549_s29   ;;  %s2697_s28 = sphi %s2783_s28, %s3548_s28   ;;  %s2693_s27 = sphi %s2781_s27, %s3547_s27  }
  0x10   : > { %3501 = sst [smem:[#allocation28_spill]] %s2713_s10  ;;  %s3483_s12 = sadd.s32 4294967294, %s2713_s10  }
  0x11   : > { %p59_p0 = scmp.ne.s32.totalorder %s2701_s29, %s2697_s28  ;;  %p60_p1 = scmp.eq.s32.totalorder %s2713_s10, 0 }
  0x12   : > { %p65_p2 = scmp.ne.s32.totalorder %s2697_s28, %s2693_s27  ;;  %p3481_p3 = scmp.eq.s32.totalorder %s2812_s11, 0 }
  0x13   : > { %p2821_p4 = por %p60_p1, %p59_p0  ;;  %p3480_p5 = scmp.eq.s32.totalorder %s2812_s11, 1 }
  0x14   : > { %p2828_p6 = por %p3481_p3, %p65_p2  ;;  %p165_p7 = scmp.eq.s32.totalorder %s3483_s12, 1 }
  0x15   : > { %p2836_p8 = por %p3480_p5, %p59_p0  ;;  %p1890_p9 = scmp.ge.s32.totalorder %s2713_s10, 1 }
  0x16   : > { %p2841_p10 = por %p165_p7, %p65_p2  ;;  %p278_p11 = scmp.lt.s32.totalorder %s2713_s10, 3 }
  0x17   : > { %s3504_s15 = scalar_select %p2836_p8, 1, 0 }
  0x18   : > { %s3505_s16 = scalar_select %p2841_p10, 1, 0 }
  0x19   : > { %p2846_p12 = pnand %p1890_p9, %p278_p11  ;;  %s2715_s18 = smov [#allocation8]  }
  0x1a   : > { %3506 = sst [smem:[#allocation29_spill]] %s3505_s16  ;;  %s290_s19 = sshll.u32 %s2715_s18, 4  ;;  %s291_s19 = int_to_ptr.vmem [resolvable:$true] %s290_s19 }
  0x1b   : > { %p2306_p13 = pneg %p2846_p12  ;;  %p2330_p1 = scmp.lt.s32.totalorder %s2713_s10, 2 }
  0x1c   : > { %s2716_s22 = smov [#allocation10]   ;;  %s2420_s24 = scalar_lea.vmem %s291_s19, 256 }
  0x1d   : > { %p2856_p5 = pnand %p2306_p13, %p3481_p3  ;;  %p2862_p2 = pnand %p2330_p1, %p2821_p4 }
  0x1e   : > { %s303_s23 = sshll.u32 %s2716_s22, 4  ;;  %p2421_p9 = scmp.ne.s32.totalorder %s291_s19, %s2420_s24  ;;  %s304_s23 = int_to_ptr.vmem [resolvable:$true] %s303_s23 }
  0x1f   : > { %p2411_p7 = pneg %p2856_p5  ;;  %p2428_p0 = scmp.lt.s32.totalorder %s291_s19, %s291_s19 }
  0x20   : > { %p2429_p3 = scmp.lt.s32.totalorder %s2420_s24, %s2420_s24 }
  0x21   : > { %p2423_p11 = pnand %p2421_p9, %p2411_p7 }
  0x22   : > { %p2430_p10 = por %p2429_p3, %p2428_p0 }
  0x23   : > { %p2424_p13 = pneg %p2423_p11 }
  0x25   : > { %p2431_p8 = pnand %p2430_p10, %p2424_p13 }
  0x27   : > { %2434 = shalt.err (!%p2431_p8)
}
  0x28   : > { %s3487_s25 = smov 128   ;;  %s3488_s26 = smov 8  }
  0x29   : > { %s3510_s1 = sld [smem:[#allocation35_spill]]  ;;  %s2446_s22 = scalar_lea.vmem %s304_s23, 2048 }
  0x2a   : > { %p2447_p4 = scmp.ne.s32.totalorder %s304_s23, %s2446_s22  ;;  %p2454_p10 = scmp.lt.s32.totalorder %s304_s23, %s304_s23 }
  0x2b   : > { %p2455_p8 = scmp.lt.s32.totalorder %s2446_s22, %s2446_s22 }
  0x2c   : > { %p2449_p1 = pnand %p2447_p4, %p2411_p7 }
  0x2d   : > { %p2456_p0 = por %p2455_p8, %p2454_p10 }
  0x2e   : > { %p2450_p3 = pneg %p2449_p1 }
  0x2f   : > { %2309 = dma.hbm_to_vmem [thread:$0]  (!%p2856_p5), %s3510_s1, 256, %s291_s19, [#allocation9], %s3487_s25, %s3487_s25, %s3488_s26  }
  0x30   : > { %p2457_p9 = pnand %p2456_p0, %p2450_p3 }
  0x32   : > { %2460 = shalt.err (!%p2457_p9)
}
  0x33   : > { %s3511_s2 = sld [smem:[#allocation36_spill]]  ;;  %s2719_s19 = smov [#allocation11]  }
  0x34   : > { %s320_s13 = sshll.u32 %s2719_s19, 4  ;;  %s321_s13 = int_to_ptr.vmem [resolvable:$true] %s320_s13 }
  0x35   : > { %s2472_s18 = scalar_lea.vmem %s321_s13, 4096  ;;  %p2480_p1 = scmp.lt.s32.totalorder %s321_s13, %s321_s13 }
  0x36   : > { %p2473_p11 = scmp.ne.s32.totalorder %s321_s13, %s2472_s18  ;;  %p2481_p3 = scmp.lt.s32.totalorder %s2472_s18, %s2472_s18 }
  0x38   : > { %p2475_p13 = pnand %p2473_p11, %p2411_p7  ;;  %p2482_p10 = por %p2481_p3, %p2480_p1 }
  0x39   : > { %2312 = dma.hbm_to_vmem [thread:$0]  (!%p2856_p5), %s3511_s2, 2048, %s304_s23, [#allocation9], %s3487_s25, %s3487_s25, %s3488_s26  }
  0x3a   : > { %p2476_p4 = pneg %p2475_p13 }
  0x3c   : > { %p2483_p8 = pnand %p2482_p10, %p2476_p4 }
  0x3e   : > { %2486 = shalt.err (!%p2483_p8)
}
  0x3f   : > { %s3512_s3 = sld [smem:[#allocation37_spill]]  ;;  %s40_s22 = sadd.s32 1, %s2709_s9 }
  0x40   : > { %s52_s24 = sadd.s32 1, %s2701_s29  ;;  %p41_p7 = scmp.ge.s32.totalorder %s40_s22, 2 }
  0x41   : > { %s334_s19 = sand.u32 1, %s2701_s29   ;;  %s1896_s20 = sshll.u32 %s2709_s9, 7 }
  0x42   : > { %s1895_s18 = sshll.u32 %s334_s19, 4  ;;  %s3553_s22 = smov (%p41_p7, %s40_s22), 0 }
  0x43   : > { %3513 = sst [smem:[#allocation30_spill]] %s3553_s22  ;;  %s48_s1 = ssub.s32 %s2709_s9, %s3553_s22 }
  0x44   : > { %s346_s23 = scalar_lea.hbm %s3471_s0, %s1896_s20  ;;  %p50_p0 = scmp.eq.s32.totalorder %s48_s1, 0 }
  0x45   : > { %2315 = dma.hbm_to_vmem [thread:$0]  (!%p2856_p5), %s3512_s3, 4096, %s321_s13, [#allocation12], %s3487_s25, %s3487_s25, %s3488_s26  }
  0x46   : > { %s338_s10 = scalar_lea.vmem [#allocation5], %s1895_s18  ;;  %s335_s25 = scalar_lea.sflag [#allocation6], %s334_s19 }
  0x47   : > { %s347_s16 = sshll.u32 %s338_s10, 4  ;;  %p2489_p5 = pneg %p2862_p2  ;;  %s348_s16 = int_to_ptr.vmem [resolvable:$true] %s347_s16 }
  0x48   : > { %s2913_s13 = scalar_select %p50_p0, %s2701_s29, %s52_s24  }
  0x49   : > { %s2500_s26 = scalar_lea.vmem %s348_s16, 256  ;;  %s2720_s3 = smov [#allocation5]  }
  0x4a   : > { %p2501_p9 = scmp.ne.s32.totalorder %s348_s16, %s2500_s26  ;;  %s2505_s27 = sshll.u32 %s2720_s3, 4  ;;  %s2506_s27 = int_to_ptr.vmem [resolvable:$false] %s2505_s27 }
  0x4b   : > { %s2507_s22 = scalar_lea.vmem %s2506_s27, 512  ;;  %p2508_p4 = scmp.lt.s32.totalorder %s348_s16, %s2506_s27 }
  0x4c   : > { %p2503_p11 = pnand %p2501_p9, %p2489_p5  ;;  %p2509_p1 = scmp.lt.s32.totalorder %s2507_s22, %s2500_s26 }
  0x4e   : > { %p2504_p13 = pneg %p2503_p11  ;;  %p2510_p3 = por %p2509_p1, %p2508_p4 }
  0x50   : > { %p2511_p10 = pnand %p2510_p3, %p2504_p13 }
  0x52   : > { %2514 = shalt.err (!%p2511_p10)
}
  0x53   : > { %s2721_s1 = smov 256   ;;  %s3514_s2 = smov 8  }
  0x54   : > { %s3515_s10 = smov 128   ;;  %359 = sbr.rel (%p2846_p12) target bundleno = 1159 (0x487), region = 36 }
  0x55   : > { %2319 = dma.hbm_to_vmem [thread:$0]  (!%p2862_p2), %s346_s23, 256, %s348_s16, %s335_s25, %s2721_s1, %s3515_s10, %s3514_s2  }
  0x59   : > { %s2924_s24 = sand.u32 1, %s2697_s28  }
  0x5a   : > { %s2927_s3 = sshll.u32 %s2924_s24, 4  ;;  %s362_s27 = scalar_lea.sflag [#allocation6], %s2924_s24 }
  0x5b   : > { %s365_s26 = scalar_lea.vmem [#allocation5], %s2927_s3 }
  0x5c   : > { %2664 = dma.done.wait (%p2828_p6), %s362_s27, 256  }
  0x5d   : > { %2666 = vsyncadd (%p2828_p6), %s362_s27, 4294967040  ;;  %p3516_p2 = scmp.eq.s32.totalorder %s2812_s11, 0 }
  0x5f   : > { %2668 = dma.done.wait (%p3516_p2), [#allocation9], 2304   ;;  %p3517_p12 = pmov %p3516_p2 }
  0x60   : > { %p3518_p8 = pmov %p3516_p2 }
  0x61   : > { %2670 = vsyncadd (%p3517_p12), [#allocation9], 4294964992 }
  0x62   : > { %2672 = dma.done.wait (%p3518_p8), [#allocation12], 4096   ;;  %p3519_p7 = pmov %p3516_p2 }
  0x63   : > { %s2944_s16 = scalar_lea.vmem [#allocation13], %s2927_s3  ;;  %s2947_s17 = scalar_lea.vmem [#allocation14], %s2927_s3 }
  0x64   : > { %2674 = vsyncadd (%p3519_p7), [#allocation12], 4294963200  ;;  %p1904_p6 = scmp.ne.s32.totalorder %s2705_s30, 0 }
  0x66   : > { %423 = sbr.rel (%p1904_p6) target bundleno = 110 (0x6e), region = 56 }
  0x6b   : > { %v2722_v0 = vmov 0.0  }
  0x6c   : > { %424 = vst [vmem:[#allocation2] sm:$0x3] %v2722_v0  ;;  %425 = vst [vmem:[#allocation3] sm:$0x3] %v2722_v0 }
  0x6d   : > { %426 = vst [vmem:[#allocation4] sm:$0xf] %v2722_v0  ;;  %427 = vst [vmem:[#allocation4 + $0x4] sm:$0xf] %v2722_v0 }
  0x6e PF: > { %v2950_v1 = vld [vmem:[#allocation10 + $0x78] sm:$0xff]  ;;  %v3491_v2 = vmov 0.0   ;;  %v2953_v3 = vld [vmem:[#allocation10 + $0x70] sm:$0xff]  ;;  %vm2724_vm0 = vmmov 0   ;;  %v2959_v4 = vld [vmem:[#allocation10 + $0x68] sm:$0xff]  ;;  %vm432_vm1 = vcmask 130048   ;;  %v627_v60 = vlaneseq }
  0x6f   : > { %2066 = vmatprep.subr.mxu1 %v3491_v2  ;;  %2098 = vmatprep.mubr.msk.f32.mxu1 %vm2724_vm0, %v3491_v2  ;;  %v431_v5 = vld [vmem:[#allocation8 + $0x8] sm:$0xff]  ;;  %v2963_v6 = vld [vmem:[#allocation10 + $0x60] sm:$0xff]  ;;  %v430_v7 = vld [vmem:[#allocation8] sm:$0xff]  ;;  %v2725_v58 = vmov 1966171168   ;;  %vm619_vm2 = vcmask 1041409  }
  0x70   : > { %2067 = vmatpush3.msra.mxu1 %v2950_v1  ;;  %2059 = vmatprep.subr.mxu0 %v431_v5  ;;  %v428_v8 = vld [vmem:[%s365_s26] sm:$0xff]  ;;  %v2969_v9 = vld [vmem:[#allocation10 + $0x58] sm:$0xff]  ;;  %v2981_v13 = vld [vmem:[#allocation10 + $0x48] sm:$0xff]  ;;  %v625_v59 = vunpack.c.l.s4 %v2725_v58  ;;  %p1940_p0 = scmp.ne.s32.totalorder %s2705_s30, 1 }
  0x71   : > { %2068 = vmatprep.subr.mxu1 %v3491_v2  ;;  %2060 = vmatpush3.msra.mxu0 %v431_v5  ;;  %v429_v10 = vld [vmem:[%s365_s26 + $0x8] sm:$0xff]  ;;  %v2975_v11 = vld [vmem:[#allocation10 + $0x50] sm:$0xff]  ;;  %v2987_v14 = vld [vmem:[#allocation10 + $0x40] sm:$0xff] }
  0x72   : > { %2069 = vmatpush3.msra.mxu1 %v2953_v3  ;;  %2061 = vmatprep.subr.mxu0 %v430_v7  ;;  %v2977_v12 = vld [vmem:[#allocation11 + $0x78] sm:$0xff]  ;;  %v2990_v15 = vld [vmem:[#allocation11 + $0x70] sm:$0xff]  ;;  %v3004_v18 = vld [vmem:[#allocation11 + $0x68] sm:$0xff] }
  0x73   : > { %2070 = vmatprep.subr.mxu1 %v3491_v2  ;;  %2062 = vmatpush3.msra.mxu0 %v430_v7  ;;  %v2996_v16 = vld [vmem:[#allocation10 + $0x38] sm:$0xff]  ;;  %v3001_v17 = vld [vmem:[#allocation10 + $0x30] sm:$0xff]  ;;  %v3008_v19 = vld [vmem:[#allocation10 + $0x28] sm:$0xff]  ;;  %v626_v7 = vunpack.c.0.s8 %v625_v59 }
  0x74   : > { %2071 = vmatpush3.msra.mxu1 %v2959_v4  ;;  %2063 = vmatprep.mubr.msk.f32.mxu0 %vm432_vm1, %v428_v8  ;;  %v3013_v20 = vld [vmem:[#allocation10 + $0x20] sm:$0xff]  ;;  %v3020_v22 = vld [vmem:[#allocation10 + $0x18] sm:$0xff]  ;;  %v3025_v23 = vld [vmem:[#allocation10 + $0x10] sm:$0xff]  ;;  %v628_v8 = vshrl.u32 %v627_v60, 7 }
  0x75   : > { %2072 = vmatprep.subr.mxu1 %v3491_v2  ;;  %2064 = vmatmul.mubr.msk.f32.vlgmr.msra.gmra.mxu0 %vm432_vm1, %v429_v10  ;;  %v3016_v21 = vld [vmem:[#allocation11 + $0x60] sm:$0xff]  ;;  %v3028_v24 = vld [vmem:[#allocation11 + $0x58] sm:$0xff]  ;;  %v3032_v25 = vld [vmem:[#allocation10 + $0x8] sm:$0xff] }
  0x76   : > { %2073 = vmatpush3.msra.mxu1 %v2963_v6  ;;  %2101 = vmatprep.subr.mxu0 %v3491_v2  ;;  %v3037_v26 = vld [vmem:[#allocation10] sm:$0xff]  ;;  %v2407_v27 = vld [vmem:[#allocation4] sm:$0xff]   ;;  %v3040_v28 = vld [vmem:[#allocation11 + $0x50] sm:$0xff] }
  0x77   : > { %2074 = vmatprep.subr.mxu1 %v3491_v2  ;;  %2102 = vmatpush3.xpose.msra.mxu0 %v2977_v12  ;;  %v3044_v29 = vld [vmem:[#allocation11 + $0xf8] sm:$0xff]  ;;  %v3049_v30 = vld [vmem:[#allocation11 + $0x48] sm:$0xff]  ;;  %v3054_v31 = vld [vmem:[#allocation11 + $0xf0] sm:$0xff] }
  0x78   : > { %2075 = vmatpush3.msra.mxu1 %v2969_v9  ;;  %2103 = vmatprep.subr.mxu0 %v3491_v2  ;;  %v3062_v32 = vld [vmem:[#allocation11 + $0xe8] sm:$0xff]  ;;  %v3066_v33 = vld [vmem:[#allocation11 + $0xe0] sm:$0xff]  ;;  %v3070_v34 = vld [vmem:[#allocation11 + $0xd8] sm:$0xff] }
  0x79   : > { %2076 = vmatprep.subr.mxu1 %v3491_v2  ;;  %2133 = vmatprep.mubr.msk.f32.mxu0 %vm2724_vm0, %v3491_v2  ;;  %v3074_v35 = vld [vmem:[#allocation11 + $0xd0] sm:$0xff]  ;;  %v3078_v36 = vld [vmem:[#allocation11 + $0xc8] sm:$0xff]  ;;  %v3082_v37 = vld [vmem:[#allocation11 + $0x40] sm:$0xff] }
  0x7a   : > { %2077 = vmatpush3.msra.mxu1 %v2975_v11  ;;  %v3086_v38 = vld [vmem:[#allocation11 + $0xc0] sm:$0xff]  ;;  %v3089_v39 = vld [vmem:[#allocation11 + $0x38] sm:$0xff]  ;;  %v3097_v41 = vld [vmem:[#allocation11 + $0x30] sm:$0xff] }
  0x7b   : > { %2078 = vmatprep.subr.mxu1 %v3491_v2  ;;  %2104 = vmatpush3.xpose.msra.mxu0 %v2990_v15  ;;  %v3093_v40 = vld [vmem:[#allocation11 + $0xb8] sm:$0xff]  ;;  %v3101_v42 = vld [vmem:[#allocation11 + $0xb0] sm:$0xff]  ;;  %v3105_v43 = vld [vmem:[#allocation11 + $0x28] sm:$0xff] }
  0x7c   : > { %2079 = vmatpush3.msra.mxu1 %v2981_v13  ;;  %2105 = vmatprep.subr.mxu0 %v3491_v2  ;;  %v3109_v44 = vld [vmem:[#allocation11 + $0xa8] sm:$0xff]  ;;  %v3113_v45 = vld [vmem:[#allocation11 + $0x20] sm:$0xff]  ;;  %v3121_v47 = vld [vmem:[#allocation11 + $0x18] sm:$0xff] }
  0x7d   : > { %2080 = vmatprep.subr.mxu1 %v3491_v2  ;;  %v3117_v46 = vld [vmem:[#allocation11 + $0xa0] sm:$0xff]  ;;  %v3125_v48 = vld [vmem:[#allocation11 + $0x98] sm:$0xff]  ;;  %v3129_v49 = vld [vmem:[#allocation11 + $0x10] sm:$0xff] }
  0x7e   : > { %2081 = vmatpush3.msra.mxu1 %v2987_v14  ;;  %v3133_v50 = vld [vmem:[#allocation11 + $0x90] sm:$0xff]  ;;  %v3137_v51 = vld [vmem:[#allocation11 + $0x8] sm:$0xff]  ;;  %v3144_v53 = vld [vmem:[#allocation11] sm:$0xff] }
  0x7f   : > { %2082 = vmatprep.subr.mxu1 %v3491_v2  ;;  %2106 = vmatpush3.xpose.msra.mxu0 %v3004_v18  ;;  %3520 = vst [vmem:[#allocation31_spill] sm:$0xff] %v3133_v50  ;;  %v3141_v52 = vld [vmem:[#allocation11 + $0x88] sm:$0xff]  ;;  %v3148_v54 = vld [vmem:[#allocation11 + $0x80] sm:$0xff] }
  0x80   : > { %2083 = vmatpush3.msra.mxu1 %v2996_v16  ;;  %2107 = vmatprep.subr.mxu0 %v3491_v2  ;;  %3521 = vst [vmem:[#allocation32_spill] sm:$0xff] %v3141_v52  ;;  %3522 = vst [vmem:[#allocation33_spill] sm:$0xff] %v3148_v54  ;;  %v514_v0 = vld [vmem:[#allocation2] sm:$0x3] }
  0x81   : > { %2084 = vmatprep.subr.mxu1 %v3491_v2 }
  0x82   : > { %2085 = vmatpush3.msra.mxu1 %v3001_v17 }
  0x83   : > { %2086 = vmatprep.subr.mxu1 %v3491_v2  ;;  %2108 = vmatpush3.xpose.msra.mxu0 %v3016_v21 }
  0x84   : > { %2087 = vmatpush3.msra.mxu1 %v3008_v19  ;;  %2109 = vmatprep.subr.mxu0 %v3491_v2 }
  0x85   : > { %2088 = vmatprep.subr.mxu1 %v3491_v2 }
  0x86   : > { %2089 = vmatpush3.msra.mxu1 %v3013_v20 }
  0x87   : > { %2090 = vmatprep.subr.mxu1 %v3491_v2  ;;  %2110 = vmatpush3.xpose.msra.mxu0 %v3028_v24 }
  0x88   : > { %2091 = vmatpush3.msra.mxu1 %v3020_v22  ;;  %2111 = vmatprep.subr.mxu0 %v3491_v2 }
  0x89   : > { %2092 = vmatprep.subr.mxu1 %v3491_v2 }
  0x8a   : > { %2093 = vmatpush3.msra.mxu1 %v3025_v23 }
  0x8b   : > { %2094 = vmatprep.subr.mxu1 %v3491_v2  ;;  %2112 = vmatpush3.xpose.msra.mxu0 %v3040_v28 }
  0x8c   : > { %2095 = vmatpush3.msra.mxu1 %v3032_v25  ;;  %2113 = vmatprep.subr.mxu0 %v3491_v2 }
  0x8d   : > { %2096 = vmatprep.subr.mxu1 %v3491_v2 }
  0x8e   : > { %2097 = vmatpush3.msra.mxu1 %v3037_v26 }
  0x8f   : > { %2099 = vmatmul.mubr.f32.vlgmr.msra.gmra.mxu1 %v2407_v27  ;;  %2136 = vmatprep.subr.mxu1 %v3491_v2 }
  0x90   : > { %2137 = vmatpush3.xpose.msra.mxu1 %v3044_v29  ;;  %2168 = vmatprep.mubr.msk.f32.mxu1 %vm2724_vm0, %v3491_v2 }
  0x91   : > { %2138 = vmatprep.subr.mxu1 %v3491_v2  ;;  %2114 = vmatpush3.xpose.msra.mxu0 %v3049_v30 }
  0x92   : > { %2115 = vmatprep.subr.mxu0 %v3491_v2 }
  0x94   : > { %2139 = vmatpush3.xpose.msra.mxu1 %v3054_v31 }
  0x95   : > { %2140 = vmatprep.subr.mxu1 %v3491_v2  ;;  %2116 = vmatpush3.xpose.msra.mxu0 %v3082_v37 }
  0x96   : > { %2117 = vmatprep.subr.mxu0 %v3491_v2 }
  0x98   : > { %2141 = vmatpush3.xpose.msra.mxu1 %v3062_v32 }
  0x99   : > { %2142 = vmatprep.subr.mxu1 %v3491_v2  ;;  %2118 = vmatpush3.xpose.msra.mxu0 %v3089_v39 }
  0x9a   : > { %2119 = vmatprep.subr.mxu0 %v3491_v2 }
  0x9c   : > { %2143 = vmatpush3.xpose.msra.mxu1 %v3066_v33 }
  0x9d   : > { %2144 = vmatprep.subr.mxu1 %v3491_v2  ;;  %2120 = vmatpush3.xpose.msra.mxu0 %v3097_v41 }
  0x9e   : > { %2121 = vmatprep.subr.mxu0 %v3491_v2 }
  0xa0   : > { %2145 = vmatpush3.xpose.msra.mxu1 %v3070_v34 }
  0xa1   : > { %2146 = vmatprep.subr.mxu1 %v3491_v2  ;;  %2122 = vmatpush3.xpose.msra.mxu0 %v3105_v43 }
  0xa2   : > { %2123 = vmatprep.subr.mxu0 %v3491_v2 }
  0xa4   : > { %2147 = vmatpush3.xpose.msra.mxu1 %v3074_v35 }
  0xa5   : > { %2148 = vmatprep.subr.mxu1 %v3491_v2  ;;  %2124 = vmatpush3.xpose.msra.mxu0 %v3113_v45 }
  0xa6   : > { %2125 = vmatprep.subr.mxu0 %v3491_v2 }
  0xa8   : > { %2149 = vmatpush3.xpose.msra.mxu1 %v3078_v36 }
  0xa9   : > { %2150 = vmatprep.subr.mxu1 %v3491_v2  ;;  %2126 = vmatpush3.xpose.msra.mxu0 %v3121_v47 }
  0xaa   : > { %2127 = vmatprep.subr.mxu0 %v3491_v2 }
  0xac   : > { %2151 = vmatpush3.xpose.msra.mxu1 %v3086_v38 }
  0xad   : > { %2152 = vmatprep.subr.mxu1 %v3491_v2  ;;  %2128 = vmatpush3.xpose.msra.mxu0 %v3129_v49 }
  0xae   : > { %2129 = vmatprep.subr.mxu0 %v3491_v2 }
  0xb0   : > { %2153 = vmatpush3.xpose.msra.mxu1 %v3093_v40 }
  0xb1   : > { %2154 = vmatprep.subr.mxu1 %v3491_v2  ;;  %2130 = vmatpush3.xpose.msra.mxu0 %v3137_v51 }
  0xb2   : > { %2131 = vmatprep.subr.mxu0 %v3491_v2 }
  0xb4   : > { %2155 = vmatpush3.xpose.msra.mxu1 %v3101_v42 }
  0xb5   : > { %2156 = vmatprep.subr.mxu1 %v3491_v2  ;;  %2132 = vmatpush3.xpose.msra.mxu0 %v3144_v53 }
  0xb6   : > { %2171 = vmatprep.subr.mxu0 %v3491_v2 }
  0xb8   : > { %2157 = vmatpush3.xpose.msra.mxu1 %v3109_v44 }
  0xb9   : > { %2158 = vmatprep.subr.mxu1 %v3491_v2 }
  0xbc   : > { %2159 = vmatpush3.xpose.msra.mxu1 %v3117_v46 }
  0xbd   : > { %2160 = vmatprep.subr.mxu1 %v3491_v2 }
  0xc0   : > { %2161 = vmatpush3.xpose.msra.mxu1 %v3125_v48 }
  0xc1   : > { %2162 = vmatprep.subr.mxu1 %v3491_v2 }
  0xc4   : > { %2163 = vmatpush3.xpose.msra.mxu1 %v3133_v50 }
  0xc5   : > { %2164 = vmatprep.subr.mxu1 %v3491_v2 }
  0xc8   : > { %2165 = vmatpush3.xpose.msra.mxu1 %v3141_v52  ;;  %v3160_v52 = vsub.s32 %v626_v7, %v628_v8 }
  0xc9   : > { %2166 = vmatprep.subr.mxu1 %v3491_v2 }
  0xcc   : > { %2167 = vmatpush3.xpose.msra.mxu1 %v3148_v54 }
  0xcd   : > { %2206 = vmatprep.subr.mxu1 %v3491_v2  ;;  %v613_v2 = vmul.f32 0.9, %v514_v0 }
 0x135   : > { %v3154_v55 = vpop.f32.mrf.mxu0 }
 0x137   : > { %v3156_v56 = vpop.f32.mrf.mxu0 }
 0x138   : > { %3523 = vst [vmem:[#allocation34_spill] sm:$0xff] %v3156_v56 }
 0x14f   : > { %v604_v57 = vpop.f32.mrf.mxu1 }
 0x150   : > { %v609_v61 = vcombine.high %v604_v57, %v604_v57  ;;  %v611_v62 = vadd.f32 %v604_v57, %v3156_v56 }
 0x151   : > { %v2100_v63 = vpop.f32.mrf.mxu1 }
 0x152   : > { %v612_v5 = vadd.f32 %v3154_v55, %v609_v61  ;;  %v614_v10 = vmul.f32 0.1, %v611_v62 }
 0x154   : > { %v615_v27 = vmul.f32 0.1, %v612_v5  ;;  %v651_v50 = vrot.slane %v614_v10, 1  ;;  %v683_v0 = vrot.slane %v614_v10, 2 }
 0x156   : > { %v618_v54 = vrot.slane %v615_v27, 7  ;;  %v652_v59 = vsel %vm619_vm2, %v615_v27, %v651_v50  ;;  %v684_v60 = vrot.slane %v615_v27, 1 }
 0x158   : > { %v620_v58 = vsel %vm619_vm2, %v618_v54, %v614_v10  ;;  %v685_v7 = vsel %vm619_vm2, %v684_v60, %v683_v0  ;;  %v3524_v0 = vmov 0.0  }
 0x159   : > { %v622_v57 = vadd.f32 %v620_v58, %v613_v2  ;;  %v717_v2 = vrot.slane %v615_v27, 2  ;;  %v716_v58 = vrot.slane %v614_v10, 3 }
 0x15b   : > { %v630_v63 = vrot.slane %v622_v57, %v3160_v52  ;;  %v650_v56 = vmul.f32 0.9, %v622_v57 }
 0x15d   : > { %v631_v61 = vcombine.high %v630_v63, %v630_v63  ;;  %1907 = vst.sshfl [vmem:[%s2944_s16] sm:$0x1 pattern:$0x73625140] %v630_v63  ;;  %v654_v62 = vadd.f32 %v652_v59, %v650_v56  ;;  %v718_v63 = vsel %vm619_vm2, %v717_v2, %v716_v58 }
 0x15f   : > { %1908 = vst.sshfl [vmem:[%s2944_s16 + $0x8] sm:$0x1 pattern:$0x73625140] %v631_v61  ;;  %v662_v5 = vrot.slane %v654_v62, %v3160_v52  ;;  %v682_v54 = vmul.f32 0.9, %v654_v62 }
 0x161   : > { %v663_v8 = vcombine.high %v662_v5, %v662_v5  ;;  %1909 = vst.sshfl [vmem:[%s2944_s16 + $0x1] sm:$0x1 pattern:$0x73625140] %v662_v5  ;;  %v687_v50 = vadd.f32 %v685_v7, %v682_v54 }
 0x163   : > { %1910 = vst.sshfl [vmem:[%s2944_s16 + $0x9] sm:$0x1 pattern:$0x73625140] %v663_v8  ;;  %v695_v56 = vrot.slane %v687_v50, %v3160_v52  ;;  %v715_v57 = vmul.f32 0.9, %v687_v50 }
 0x165   : > { %v696_v59 = vcombine.high %v695_v56, %v695_v56  ;;  %1911 = vst.sshfl [vmem:[%s2944_s16 + $0x2] sm:$0x1 pattern:$0x73625140] %v695_v56  ;;  %v3174_v61 = vadd.f32 %v718_v63, %v715_v57 }
 0x167   : > { %1912 = vst.sshfl [vmem:[%s2944_s16 + $0xa] sm:$0x1 pattern:$0x73625140] %v696_v59  ;;  %v728_v27 = vrot.slane %v3174_v61, %v3160_v52  ;;  %v1160_v50 = vmul.f32 0.9, %v3174_v61 }
 0x169   : > { %v729_v60 = vcombine.high %v728_v27, %v728_v27  ;;  %1913 = vst.sshfl [vmem:[%s2944_s16 + $0x3] sm:$0x1 pattern:$0x73625140] %v728_v27 }
 0x16b   : > { %1914 = vst.sshfl [vmem:[%s2944_s16 + $0xb] sm:$0x1 pattern:$0x73625140] %v729_v60 }
 0x170   : > { %v748_v62 = vld [vmem:[%s2944_s16] sm:$0xf] }
 0x171   : > { %2134 = vmatmul.mubr.f32.vlgmr.msra.gmra.mxu0 %v748_v62 }
 0x172   : > { %v749_v10 = vld [vmem:[%s2944_s16 + $0x8] sm:$0xf]  ;;  %2172 = vmatpush3.msra.mxu0 %v2950_v1  ;;  %2203 = vmatprep.mubr.msk.f32.mxu0 %vm2724_vm0, %v3524_v0 }
 0x173   : > { %2169 = vmatmul.mubr.f32.vlgmr.msra.gmra.mxu1 %v749_v10  ;;  %2173 = vmatprep.subr.mxu0 %v3524_v0 }
 0x174   : > { %2174 = vmatpush3.msra.mxu0 %v2953_v3  ;;  %2207 = vmatpush3.xpose.msra.mxu1 %v2977_v12  ;;  %v515_v3 = vld [vmem:[#allocation3] sm:$0x3] }
 0x175   : > { %2175 = vmatprep.subr.mxu0 %v3524_v0  ;;  %2208 = vmatprep.subr.mxu1 %v3524_v0  ;;  %v922_v12 = vmul.f32 0.9, %v515_v3 }
 0x176   : > { %2176 = vmatpush3.msra.mxu0 %v2959_v4  ;;  %2238 = vmatprep.mubr.msk.f32.mxu1 %vm2724_vm0, %v3524_v0 }
 0x177   : > { %2177 = vmatprep.subr.mxu0 %v3524_v0 }
 0x178   : > { %2178 = vmatpush3.msra.mxu0 %v2963_v6  ;;  %2209 = vmatpush3.xpose.msra.mxu1 %v2990_v15 }
 0x179   : > { %2179 = vmatprep.subr.mxu0 %v3524_v0  ;;  %2210 = vmatprep.subr.mxu1 %v3524_v0 }
 0x17a   : > { %2180 = vmatpush3.msra.mxu0 %v2969_v9 }
 0x17b   : > { %2181 = vmatprep.subr.mxu0 %v3524_v0 }
 0x17c   : > { %2182 = vmatpush3.msra.mxu0 %v2975_v11  ;;  %2211 = vmatpush3.xpose.msra.mxu1 %v3004_v18 }
 0x17d   : > { %2183 = vmatprep.subr.mxu0 %v3524_v0  ;;  %2212 = vmatprep.subr.mxu1 %v3524_v0 }
 0x17e   : > { %2184 = vmatpush3.msra.mxu0 %v2981_v13 }
 0x17f   : > { %2185 = vmatprep.subr.mxu0 %v3524_v0 }
 0x180   : > { %2186 = vmatpush3.msra.mxu0 %v2987_v14  ;;  %2213 = vmatpush3.xpose.msra.mxu1 %v3016_v21 }
 0x181   : > { %2187 = vmatprep.subr.mxu0 %v3524_v0  ;;  %2214 = vmatprep.subr.mxu1 %v3524_v0 }
 0x182   : > { %2188 = vmatpush3.msra.mxu0 %v2996_v16 }
 0x183   : > { %2189 = vmatprep.subr.mxu0 %v3524_v0 }
 0x184   : > { %2190 = vmatpush3.msra.mxu0 %v3001_v17  ;;  %2215 = vmatpush3.xpose.msra.mxu1 %v3028_v24 }
 0x185   : > { %2191 = vmatprep.subr.mxu0 %v3524_v0  ;;  %2216 = vmatprep.subr.mxu1 %v3524_v0 }
 0x186   : > { %2192 = vmatpush3.msra.mxu0 %v3008_v19 }
 0x187   : > { %2193 = vmatprep.subr.mxu0 %v3524_v0 }
 0x188   : > { %2194 = vmatpush3.msra.mxu0 %v3013_v20  ;;  %2217 = vmatpush3.xpose.msra.mxu1 %v3040_v28 }
 0x189   : > { %2195 = vmatprep.subr.mxu0 %v3524_v0  ;;  %2218 = vmatprep.subr.mxu1 %v3524_v0 }
 0x18a   : > { %2196 = vmatpush3.msra.mxu0 %v3020_v22 }
 0x18b   : > { %2197 = vmatprep.subr.mxu0 %v3524_v0 }
 0x18c   : > { %2198 = vmatpush3.msra.mxu0 %v3025_v23  ;;  %2219 = vmatpush3.xpose.msra.mxu1 %v3049_v30 }
 0x18d   : > { %2199 = vmatprep.subr.mxu0 %v3524_v0  ;;  %2220 = vmatprep.subr.mxu1 %v3524_v0 }
 0x18e   : > { %2200 = vmatpush3.msra.mxu0 %v3032_v25 }
 0x18f   : > { %2201 = vmatprep.subr.mxu0 %v3524_v0 }
 0x190   : > { %2202 = vmatpush3.msra.mxu0 %v3037_v26  ;;  %2221 = vmatpush3.xpose.msra.mxu1 %v3082_v37 }
 0x191   : > { %2241 = vmatprep.subr.mxu0 %v3524_v0  ;;  %2222 = vmatprep.subr.mxu1 %v3524_v0 }
 0x194   : > { %2223 = vmatpush3.xpose.msra.mxu1 %v3089_v39 }
 0x195   : > { %2224 = vmatprep.subr.mxu1 %v3524_v0 }
 0x198   : > { %2225 = vmatpush3.xpose.msra.mxu1 %v3097_v41 }
 0x199   : > { %2226 = vmatprep.subr.mxu1 %v3524_v0 }
 0x19c   : > { %2227 = vmatpush3.xpose.msra.mxu1 %v3105_v43 }
 0x19d   : > { %2228 = vmatprep.subr.mxu1 %v3524_v0 }
 0x1a0   : > { %2229 = vmatpush3.xpose.msra.mxu1 %v3113_v45 }
 0x1a1   : > { %2230 = vmatprep.subr.mxu1 %v3524_v0 }
 0x1a4   : > { %2231 = vmatpush3.xpose.msra.mxu1 %v3121_v47 }
 0x1a5   : > { %2232 = vmatprep.subr.mxu1 %v3524_v0 }
 0x1a8   : > { %2233 = vmatpush3.xpose.msra.mxu1 %v3129_v49 }
 0x1a9   : > { %2234 = vmatprep.subr.mxu1 %v3524_v0 }
 0x1ac   : > { %2235 = vmatpush3.xpose.msra.mxu1 %v3137_v51 }
 0x1ad   : > { %2236 = vmatprep.subr.mxu1 %v3524_v0 }
 0x1b0   : > { %2237 = vmatpush3.xpose.msra.mxu1 %v3144_v53 }
 0x231   : > { %v848_v1 = vpop.f32.mrf.mxu0 }
 0x232   : > { %v923_v9 = vmul.f32 0.1, %v848_v1 }
 0x233   : > { %v2135_v4 = vpop.f32.mrf.mxu0  ;;  %v918_v6 = vpop.f32.mrf.mxu1 }
 0x234   : > { %v924_v11 = vmul.f32 0.1, %v918_v6  ;;  %v959_v15 = vrot.slane %v923_v9, 1  ;;  %v991_v24 = vrot.slane %v923_v9, 2  ;;  %v1024_v41 = vrot.slane %v923_v9, 3 }
 0x235   : > { %v2170_v13 = vpop.f32.mrf.mxu1 }
 0x236   : > { %v927_v14 = vrot.slane %v924_v11, 7  ;;  %v960_v20 = vsel %vm619_vm2, %v924_v11, %v959_v15  ;;  %v992_v21 = vrot.slane %v924_v11, 1  ;;  %v1025_v30 = vrot.slane %v924_v11, 2 }
 0x238   : > { %v928_v16 = vsel %vm619_vm2, %v927_v14, %v923_v9  ;;  %v993_v28 = vsel %vm619_vm2, %v992_v21, %v991_v24  ;;  %v1026_v47 = vsel %vm619_vm2, %v1025_v30, %v1024_v41 }
 0x239   : > { %v930_v17 = vadd.f32 %v928_v16, %v922_v12 }
 0x23b   : > { %v938_v18 = vrot.slane %v930_v17, %v3160_v52  ;;  %v958_v19 = vmul.f32 0.9, %v930_v17 }
 0x23d   : > { %v939_v22 = vcombine.high %v938_v18, %v938_v18  ;;  %1915 = vst.sshfl [vmem:[%s2947_s17] sm:$0x1 pattern:$0x73625140] %v938_v18  ;;  %v962_v23 = vadd.f32 %v960_v20, %v958_v19 }
 0x23f   : > { %1916 = vst.sshfl [vmem:[%s2947_s17 + $0x8] sm:$0x1 pattern:$0x73625140] %v939_v22  ;;  %v970_v25 = vrot.slane %v962_v23, %v3160_v52  ;;  %v990_v26 = vmul.f32 0.9, %v962_v23 }
 0x241   : > { %v971_v37 = vcombine.high %v970_v25, %v970_v25  ;;  %1917 = vst.sshfl [vmem:[%s2947_s17 + $0x1] sm:$0x1 pattern:$0x73625140] %v970_v25  ;;  %v995_v39 = vadd.f32 %v993_v28, %v990_v26 }
 0x243   : > { %1918 = vst.sshfl [vmem:[%s2947_s17 + $0x9] sm:$0x1 pattern:$0x73625140] %v971_v37  ;;  %v1003_v43 = vrot.slane %v995_v39, %v3160_v52  ;;  %v1023_v45 = vmul.f32 0.9, %v995_v39 }
 0x245   : > { %v1004_v49 = vcombine.high %v1003_v43, %v1003_v43  ;;  %1919 = vst.sshfl [vmem:[%s2947_s17 + $0x2] sm:$0x1 pattern:$0x73625140] %v1003_v43  ;;  %v3262_v51 = vadd.f32 %v1026_v47, %v1023_v45 }
 0x247   : > { %1920 = vst.sshfl [vmem:[%s2947_s17 + $0xa] sm:$0x1 pattern:$0x73625140] %v1004_v49  ;;  %v1036_v53 = vrot.slane %v3262_v51, %v3160_v52  ;;  %v1470_v30 = vmul.f32 0.9, %v3262_v51 }
 0x249   : > { %v1037_v5 = vcombine.high %v1036_v53, %v1036_v53  ;;  %1921 = vst.sshfl [vmem:[%s2947_s17 + $0x3] sm:$0x1 pattern:$0x73625140] %v1036_v53 }
 0x24b   : > { %1922 = vst.sshfl [vmem:[%s2947_s17 + $0xb] sm:$0x1 pattern:$0x73625140] %v1037_v5 }
 0x250   : > { %v1056_v54 = vld [vmem:[%s2947_s17] sm:$0xf] }
 0x251   : > { %1058 = vst [vmem:[#allocation4] sm:$0xf] %v1056_v54 }
 0x252   : > { %v1057_v7 = vld [vmem:[%s2947_s17 + $0x8] sm:$0xf] }
 0x253   : > { %1059 = vst [vmem:[#allocation4 + $0x4] sm:$0xf] %v1057_v7 }
 0x25a   : > { %v2408_v2 = vld [vmem:[#allocation4] sm:$0xff]  }
 0x25b   : > { %2204 = vmatmul.mubr.f32.vlgmr.msra.gmra.mxu0 %v2408_v2 }
 0x25c   : > { %2242 = vmatpush3.xpose.msra.mxu0 %v3044_v29  ;;  %2273 = vmatprep.mubr.msk.f32.mxu0 %vm2724_vm0, %v3524_v0  ;;  %v3525_v29 = vld [vmem:[#allocation31_spill] sm:$0xff] }
 0x25d   : > { %2243 = vmatprep.subr.mxu0 %v3524_v0 }
 0x260   : > { %2244 = vmatpush3.xpose.msra.mxu0 %v3054_v31  ;;  %v3526_v31 = vld [vmem:[#allocation32_spill] sm:$0xff] }
 0x261   : > { %2245 = vmatprep.subr.mxu0 %v3524_v0 }
 0x264   : > { %2246 = vmatpush3.xpose.msra.mxu0 %v3062_v32  ;;  %v3527_v32 = vld [vmem:[#allocation33_spill] sm:$0xff] }
 0x265   : > { %2247 = vmatprep.subr.mxu0 %v3524_v0 }
 0x268   : > { %2248 = vmatpush3.xpose.msra.mxu0 %v3066_v33 }
 0x269   : > { %2249 = vmatprep.subr.mxu0 %v3524_v0 }
 0x26c   : > { %2250 = vmatpush3.xpose.msra.mxu0 %v3070_v34 }
 0x26d   : > { %2251 = vmatprep.subr.mxu0 %v3524_v0 }
 0x270   : > { %2252 = vmatpush3.xpose.msra.mxu0 %v3074_v35 }
 0x271   : > { %2253 = vmatprep.subr.mxu0 %v3524_v0 }
 0x274   : > { %2254 = vmatpush3.xpose.msra.mxu0 %v3078_v36 }
 0x275   : > { %2255 = vmatprep.subr.mxu0 %v3524_v0 }
 0x278   : > { %2256 = vmatpush3.xpose.msra.mxu0 %v3086_v38  ;;  %v3528_v38 = vld [vmem:[#allocation34_spill] sm:$0xff] }
 0x279   : > { %2257 = vmatprep.subr.mxu0 %v3524_v0 }
 0x27c   : > { %2258 = vmatpush3.xpose.msra.mxu0 %v3093_v40 }
 0x27d   : > { %2259 = vmatprep.subr.mxu0 %v3524_v0 }
 0x280   : > { %2260 = vmatpush3.xpose.msra.mxu0 %v3101_v42 }
 0x281   : > { %2261 = vmatprep.subr.mxu0 %v3524_v0 }
 0x284   : > { %2262 = vmatpush3.xpose.msra.mxu0 %v3109_v44 }
 0x285   : > { %2263 = vmatprep.subr.mxu0 %v3524_v0 }
 0x288   : > { %2264 = vmatpush3.xpose.msra.mxu0 %v3117_v46 }
 0x289   : > { %2265 = vmatprep.subr.mxu0 %v3524_v0 }
 0x28c   : > { %2266 = vmatpush3.xpose.msra.mxu0 %v3125_v48 }
 0x28d   : > { %2267 = vmatprep.subr.mxu0 %v3524_v0 }
 0x290   : > { %2268 = vmatpush3.xpose.msra.mxu0 %v3525_v29 }
 0x291   : > { %2269 = vmatprep.subr.mxu0 %v3524_v0 }
 0x294   : > { %2270 = vmatpush3.xpose.msra.mxu0 %v3526_v31 }
 0x295   : > { %2271 = vmatprep.subr.mxu0 %v3524_v0 }
 0x298   : > { %2272 = vmatpush3.xpose.msra.mxu0 %v3527_v32 }
 0x31b   : > { %v1148_v33 = vpop.f32.mrf.mxu0 }
 0x31c   : > { %v1154_v34 = vcombine.low %v1148_v33, %v1148_v33  ;;  %v1923_v35 = vcombine.high %v1148_v33, %v1148_v33 }
 0x31d   : > { %v2205_v36 = vpop.f32.mrf.mxu0 }
 0x31e   : > { %v1158_v40 = vadd.f32 %v1154_v34, %v3528_v38  ;;  %v1159_v42 = vadd.f32 %v3154_v55, %v1923_v35 }
 0x320   : > { %v1161_v44 = vmul.f32 0.1, %v1158_v40  ;;  %v1162_v46 = vmul.f32 0.1, %v1159_v42 }
 0x322   : > { %v1165_v48 = vrot.slane %v1161_v44, 4  ;;  %v1166_v8 = vrot.slane %v1162_v46, 3  ;;  %v1198_v56 = vrot.slane %v1161_v44, 5  ;;  %v1199_v57 = vrot.slane %v1162_v46, 4 }
 0x323   : > { %v1231_v60 = vrot.slane %v1161_v44, 6  ;;  %v1232_v62 = vrot.slane %v1162_v46, 5  ;;  %v1264_v4 = vrot.slane %v1161_v44, 7  ;;  %v1265_v6 = vrot.slane %v1162_v46, 6 }
 0x324   : > { %v1167_v58 = vsel %vm619_vm2, %v1166_v8, %v1165_v48  ;;  %v1200_v55 = vsel %vm619_vm2, %v1199_v57, %v1198_v56 }
 0x325   : > { %v1169_v63 = vadd.f32 %v1167_v58, %v1160_v50  ;;  %v1233_v3 = vsel %vm619_vm2, %v1232_v62, %v1231_v60  ;;  %v1266_v14 = vsel %vm619_vm2, %v1265_v6, %v1264_v4 }
 0x327   : > { %v1177_v59 = vrot.slane %v1169_v63, %v3160_v52  ;;  %v1197_v27 = vmul.f32 0.9, %v1169_v63 }
 0x329   : > { %v1178_v10 = vcombine.high %v1177_v59, %v1177_v59  ;;  %1924 = vst.sshfl [vmem:[%s2944_s16 + $0x4] sm:$0x1 pattern:$0x73625140] %v1177_v59  ;;  %v1202_v0 = vadd.f32 %v1200_v55, %v1197_v27 }
 0x32b   : > { %1925 = vst.sshfl [vmem:[%s2944_s16 + $0xc] sm:$0x1 pattern:$0x73625140] %v1178_v10  ;;  %v1210_v61 = vrot.slane %v1202_v0, %v3160_v52  ;;  %v1230_v1 = vmul.f32 0.9, %v1202_v0 }
 0x32d   : > { %v1211_v9 = vcombine.high %v1210_v61, %v1210_v61  ;;  %1926 = vst.sshfl [vmem:[%s2944_s16 + $0x5] sm:$0x1 pattern:$0x73625140] %v1210_v61  ;;  %v1235_v11 = vadd.f32 %v1233_v3, %v1230_v1 }
 0x32f   : > { %1927 = vst.sshfl [vmem:[%s2944_s16 + $0xd] sm:$0x1 pattern:$0x73625140] %v1211_v9  ;;  %v1243_v12 = vrot.slane %v1235_v11, %v3160_v52  ;;  %v1263_v13 = vmul.f32 0.9, %v1235_v11 }
 0x331   : > { %v1244_v15 = vcombine.high %v1243_v12, %v1243_v12  ;;  %1928 = vst.sshfl [vmem:[%s2944_s16 + $0x6] sm:$0x1 pattern:$0x73625140] %v1243_v12  ;;  %v1268_v16 = vadd.f32 %v1266_v14, %v1263_v13 }
 0x333   : > { %1929 = vst.sshfl [vmem:[%s2944_s16 + $0xe] sm:$0x1 pattern:$0x73625140] %v1244_v15  ;;  %v1276_v17 = vrot.slane %v1268_v16, %v3160_v52  ;;  %1608 = vst [vmem:[#allocation2] sm:$0x3] %v1268_v16 }
 0x335   : > { %v1277_v18 = vcombine.high %v1276_v17, %v1276_v17  ;;  %1930 = vst.sshfl [vmem:[%s2944_s16 + $0x7] sm:$0x1 pattern:$0x73625140] %v1276_v17 }
 0x337   : > { %1931 = vst.sshfl [vmem:[%s2944_s16 + $0xf] sm:$0x1 pattern:$0x73625140] %v1277_v18 }
 0x33c   : > { %v1296_v19 = vld [vmem:[%s2944_s16 + $0x4] sm:$0xf] }
 0x33d   : > { %2239 = vmatmul.mubr.f32.vlgmr.msra.gmra.mxu1 %v1296_v19 }
 0x33e   : > { %v1297_v20 = vld [vmem:[%s2944_s16 + $0xc] sm:$0xf] }
 0x33f   : > { %2274 = vmatmul.mubr.f32.vlgmr.msra.gmra.mxu0 %v1297_v20 }
 0x3fd   : > { %v1396_v21 = vpop.f32.mrf.mxu1 }
 0x3fe   : > { %v1471_v24 = vmul.f32 0.1, %v1396_v21 }
 0x3ff   : > { %v2240_v22 = vpop.f32.mrf.mxu1  ;;  %v1466_v23 = vpop.f32.mrf.mxu0 }
 0x400   : > { %v1472_v25 = vmul.f32 0.1, %v1466_v23  ;;  %v1507_v37 = vrot.slane %v1471_v24, 1  ;;  %v1539_v54 = vrot.slane %v1471_v24, 2  ;;  %v1572_v33 = vrot.slane %v1471_v24, 3 }
 0x401   : > { %v2275_v26 = vpop.f32.mrf.mxu0 }
 0x402   : > { %v1475_v28 = vrot.slane %v1472_v25, 7  ;;  %v1508_v47 = vsel %vm619_vm2, %v1472_v25, %v1507_v37  ;;  %v1540_v49 = vrot.slane %v1472_v25, 1  ;;  %v1573_v29 = vrot.slane %v1472_v25, 2 }
 0x404   : > { %v1476_v39 = vsel %vm619_vm2, %v1475_v28, %v1471_v24  ;;  %v1541_v2 = vsel %vm619_vm2, %v1540_v49, %v1539_v54  ;;  %v1574_v36 = vsel %vm619_vm2, %v1573_v29, %v1572_v33 }
 0x405   : > { %v1478_v41 = vadd.f32 %v1476_v39, %v1470_v30 }
 0x407   : > { %v1486_v43 = vrot.slane %v1478_v41, %v3160_v52  ;;  %v1506_v45 = vmul.f32 0.9, %v1478_v41 }
 0x409   : > { %v1487_v53 = vcombine.high %v1486_v43, %v1486_v43  ;;  %1932 = vst.sshfl [vmem:[%s2947_s17 + $0x4] sm:$0x1 pattern:$0x73625140] %v1486_v43  ;;  %v1510_v5 = vadd.f32 %v1508_v47, %v1506_v45 }
 0x40b   : > { %1933 = vst.sshfl [vmem:[%s2947_s17 + $0xc] sm:$0x1 pattern:$0x73625140] %v1487_v53  ;;  %v1518_v51 = vrot.slane %v1510_v5, %v3160_v52  ;;  %v1538_v7 = vmul.f32 0.9, %v1510_v5 }
 0x40d   : > { %v1519_v31 = vcombine.high %v1518_v51, %v1518_v51  ;;  %1934 = vst.sshfl [vmem:[%s2947_s17 + $0x5] sm:$0x1 pattern:$0x73625140] %v1518_v51  ;;  %v1543_v32 = vadd.f32 %v1541_v2, %v1538_v7 }
 0x40f   : > { %1935 = vst.sshfl [vmem:[%s2947_s17 + $0xd] sm:$0x1 pattern:$0x73625140] %v1519_v31  ;;  %v1551_v34 = vrot.slane %v1543_v32, %v3160_v52  ;;  %v1571_v35 = vmul.f32 0.9, %v1543_v32 }
 0x411   : > { %v1552_v38 = vcombine.high %v1551_v34, %v1551_v34  ;;  %1936 = vst.sshfl [vmem:[%s2947_s17 + $0x6] sm:$0x1 pattern:$0x73625140] %v1551_v34  ;;  %v1576_v40 = vadd.f32 %v1574_v36, %v1571_v35 }
 0x413   : > { %1937 = vst.sshfl [vmem:[%s2947_s17 + $0xe] sm:$0x1 pattern:$0x73625140] %v1552_v38  ;;  %v1584_v42 = vrot.slane %v1576_v40, %v3160_v52  ;;  %1609 = vst [vmem:[#allocation3] sm:$0x3] %v1576_v40 }
 0x415   : > { %v1585_v44 = vcombine.high %v1584_v42, %v1584_v42  ;;  %1938 = vst.sshfl [vmem:[%s2947_s17 + $0x7] sm:$0x1 pattern:$0x73625140] %v1584_v42 }
 0x417   : > { %1939 = vst.sshfl [vmem:[%s2947_s17 + $0xf] sm:$0x1 pattern:$0x73625140] %v1585_v44 }
 0x41b   : > { %1613 = sbr.rel (%p1940_p0) target bundleno = 1064 (0x428), region = 60 }
 0x41c   : > { %v1604_v46 = vld [vmem:[%s2947_s17 + $0x4] sm:$0xf] }
 0x41d   : > { %1606 = vst [vmem:[#allocation4] sm:$0xf] %v1604_v46 }
 0x41e   : > { %v1605_v48 = vld [vmem:[%s2947_s17 + $0xc] sm:$0xf] }
 0x41f   : > { %1607 = vst [vmem:[#allocation4 + $0x4] sm:$0xf] %v1605_v48 }
 0x420   : > { %1614 = vst [vmem:[#allocation16] sm:$0x3] %v1268_v16  ;;  %1615 = vst [vmem:[#allocation17] sm:$0x3] %v1576_v40 }
 0x426   : > { %v1616_v8 = vld [vmem:[#allocation4] sm:$0xff]  }
 0x427   : > { %1618 = vst [vmem:[#allocation19] sm:$0xff] %v1616_v8  }
 0x428 PF: > { %s1625_s14 = sand.u32 1, %s2812_s11   ;;  %s1943_s21 = sshll.u32 %s2705_s30, 7 }
 0x429   : > { %s3352_s19 = scalar_lea.hbm %s3476_s5, %s1943_s21  ;;  %s1659_s18 = sshll.u32 %s2947_s17, 4  ;;  %s3355_s18 = int_to_ptr.vmem [resolvable:$true] %s1659_s18 }
 0x42a   : > { %s3357_s20 = scalar_lea.sflag [#allocation15], %s1625_s14  ;;  %s2515_s12 = scalar_lea.vmem %s3355_s18, 256 }
 0x42b   : > { %p2516_p5 = scmp.ne.s32.totalorder %s3355_s18, %s2515_s12  ;;  %p3529_p9 = scmp.ne.s32.totalorder %s3504_s15, 0 }
 0x42c   : > { %s2726_s23 = smov [#allocation14]  }
 0x42d   : > { %p2517_p11 = pnand %p2516_p5, %p3529_p9  ;;  %s2519_s1 = sshll.u32 %s2726_s23, 4  ;;  %s2520_s1 = int_to_ptr.vmem [resolvable:$false] %s2519_s1 }
 0x42e   : > { %s2521_s2 = scalar_lea.vmem %s2520_s1, 512  ;;  %p2522_p4 = scmp.lt.s32.totalorder %s3355_s18, %s2520_s1 }
 0x42f   : > { %p2518_p13 = pneg %p2517_p11  ;;  %p2523_p1 = scmp.lt.s32.totalorder %s2521_s2, %s2515_s12 }
 0x431   : > { %p2524_p3 = por %p2523_p1, %p2522_p4 }
 0x433   : > { %p2525_p10 = pnand %p2524_p3, %p2518_p13 }
 0x435   : > { %2528 = shalt.err (!%p2525_p10)
}
 0x436   : > { %s2529_s10 = scalar_lea.hbm %s3352_s19, 256  ;;  %s2533_s26 = scalar_lea.hbm %s3476_s5, 512 }
 0x437   : > { %p2530_p2 = scmp.ne.s32.totalorder %s3352_s19, %s2529_s10  ;;  %p2534_p7 = scmp.lt.s32.totalorder %s3352_s19, %s3476_s5 }
 0x438   : > { %p2535_p6 = scmp.lt.s32.totalorder %s2533_s26, %s2529_s10 }
 0x439   : > { %p2531_p12 = pnand %p2530_p2, %p3529_p9 }
 0x43a   : > { %p2536_p0 = por %p2535_p6, %p2534_p7 }
 0x43b   : > { %p2532_p8 = pneg %p2531_p12 }
 0x43d   : > { %p2537_p5 = pnand %p2536_p0, %p2532_p8 }
 0x43f   : > { %2540 = shalt.err (!%p2537_p5)
}
 0x440   : > { %s2727_s25 = smov 128   ;;  %s2728_s22 = smov 256  }
 0x441   : > { %s2729_s12 = smov 8   ;;  %s2730_s23 = smov [#allocation17]  }
 0x442   : > { %2291 = dma.vmem_to_hbm [thread:$0]  (%p3529_p9), %s3355_s18, 256, %s3352_s19, %s3357_s20, %s2727_s25, %s2728_s22, %s2729_s12  }
 0x443   : > { %s1688_s1 = sshll.u32 %s2730_s23, 4  ;;  %s3388_s3 = scalar_lea.hbm %s3475_s4, %s1943_s21  ;;  %s1689_s1 = int_to_ptr.vmem [resolvable:$true] %s1688_s1 }
 0x444   : > { %s2541_s27 = scalar_lea.vmem %s1689_s1, 32  ;;  %p3530_p13 = scmp.eq.s32.totalorder %s2812_s11, 1 }
 0x445   : > { %p2542_p11 = scmp.ne.s32.totalorder %s1689_s1, %s2541_s27  ;;  %p2548_p3 = scmp.lt.s32.totalorder %s1689_s1, %s1689_s1 }
 0x446   : > { %p2549_p10 = scmp.lt.s32.totalorder %s2541_s27, %s2541_s27 }
 0x447   : > { %p2543_p4 = pnand %p2542_p11, %p3530_p13 }
 0x448   : > { %p2550_p2 = por %p2549_p10, %p2548_p3 }
 0x449   : > { %p2544_p1 = pneg %p2543_p4 }
 0x44b   : > { %p2551_p12 = pnand %p2550_p2, %p2544_p1 }
 0x44d   : > { %2554 = shalt.err (!%p2551_p12)
}
 0x44e   : > { %p3531_p8 = pmov %p3530_p13  ;;  %s1641_s30 = sshll.u32 %s2944_s16, 4  ;;  %s3398_s30 = int_to_ptr.vmem [resolvable:$true] %s1641_s30 }
 0x44f   : > { %s1621_s21 = scalar_lea.sflag [#allocation7], %s2924_s24  ;;  %s2565_s20 = scalar_lea.vmem %s3398_s30, 256 }
 0x450   : > { %2295 = dma.vmem_to_hbm [thread:$0]  (%p3531_p8), %s1689_s1, 32, %s3478_s7, [#allocation18]  }
 0x451   : > { %p2566_p7 = scmp.ne.s32.totalorder %s3398_s30, %s2565_s20  ;;  %s2731_s26 = smov [#allocation13]  }
 0x452   : > { %s2569_s17 = sshll.u32 %s2731_s26, 4  ;;  %s2570_s17 = int_to_ptr.vmem [resolvable:$false] %s2569_s17 }
 0x453   : > { %p2567_p6 = pnand %p2566_p7, %p3529_p9  ;;  %s2571_s14 = scalar_lea.vmem %s2570_s17, 512 }
 0x454   : > { %p2572_p5 = scmp.lt.s32.totalorder %s3398_s30, %s2570_s17  ;;  %p2573_p11 = scmp.lt.s32.totalorder %s2571_s14, %s2565_s20 }
 0x455   : > { %p2568_p0 = pneg %p2567_p6 }
 0x456   : > { %p2574_p13 = por %p2573_p11, %p2572_p5 }
 0x458   : > { %p2575_p4 = pnand %p2574_p13, %p2568_p0 }
 0x45a   : > { %2578 = shalt.err (!%p2575_p4)
}
 0x45b   : > { %s2579_s16 = scalar_lea.hbm %s3388_s3, 256  ;;  %s2583_s1 = scalar_lea.hbm %s3475_s4, 512 }
 0x45c   : > { %p2580_p1 = scmp.ne.s32.totalorder %s3388_s3, %s2579_s16  ;;  %p2584_p2 = scmp.lt.s32.totalorder %s3388_s3, %s3475_s4 }
 0x45d   : > { %p2585_p12 = scmp.lt.s32.totalorder %s2583_s1, %s2579_s16 }
 0x45e   : > { %p2581_p3 = pnand %p2580_p1, %p3529_p9 }
 0x45f   : > { %p2586_p8 = por %p2585_p12, %p2584_p2 }
 0x460   : > { %p2582_p10 = pneg %p2581_p3 }
 0x462   : > { %p2587_p7 = pnand %p2586_p8, %p2582_p10 }
 0x464   : > { %2590 = shalt.err (!%p2587_p7)
}
 0x465   : > { %2290 = dma.vmem_to_hbm [thread:$0]  (%p3529_p9), %s3398_s30, 256, %s3388_s3, %s1621_s21, %s2727_s25, %s2728_s22, %s2729_s12  }
 0x466   : > { %s2732_s27 = smov [#allocation16]   ;;  %s2733_s18 = smov [#allocation19]  }
 0x467   : > { %s1675_s19 = sshll.u32 %s2732_s27, 4  ;;  %s1701_s20 = sshll.u32 %s2733_s18, 4  ;;  %s1676_s19 = int_to_ptr.vmem [resolvable:$true] %s1675_s19  ;;  %s1702_s20 = int_to_ptr.vmem [resolvable:$true] %s1701_s20 }
 0x468   : > { %s2591_s26 = scalar_lea.vmem %s1676_s19, 32  ;;  %p3532_p0 = scmp.eq.s32.totalorder %s2812_s11, 1 }
 0x469   : > { %p2592_p6 = scmp.ne.s32.totalorder %s1676_s19, %s2591_s26  ;;  %p2598_p13 = scmp.lt.s32.totalorder %s1676_s19, %s1676_s19 }
 0x46a   : > { %p2599_p4 = scmp.lt.s32.totalorder %s2591_s26, %s2591_s26 }
 0x46b   : > { %p2593_p5 = pnand %p2592_p6, %p3532_p0 }
 0x46c   : > { %p2600_p1 = por %p2599_p4, %p2598_p13 }
 0x46d   : > { %p2594_p11 = pneg %p2593_p5 }
 0x46f   : > { %p2601_p3 = pnand %p2600_p1, %p2594_p11 }
 0x471   : > { %2604 = shalt.err (!%p2601_p3)
}
 0x472   : > { %p3533_p10 = pmov %p3532_p0  ;;  %s2615_s25 = scalar_lea.vmem %s1702_s20, 128 }
 0x473   : > { %p2616_p9 = scmp.ne.s32.totalorder %s1702_s20, %s2615_s25  ;;  %p3534_p2 = pmov %p3532_p0 }
 0x474   : > { %2293 = dma.vmem_to_hbm [thread:$0]  (%p3533_p10), %s1676_s19, 32, %s3477_s6, [#allocation15]  }
 0x475   : > { %p2617_p12 = pnand %p2616_p9, %p3534_p2  ;;  %p2622_p7 = scmp.lt.s32.totalorder %s1702_s20, %s1702_s20 }
 0x476   : > { %p2623_p6 = scmp.lt.s32.totalorder %s2615_s25, %s2615_s25 }
 0x477   : > { %p2618_p8 = pneg %p2617_p12 }
 0x478   : > { %p2624_p0 = por %p2623_p6, %p2622_p7 }
 0x47a   : > { %p2625_p5 = pnand %p2624_p0, %p2618_p8 }
 0x47c   : > { %2628 = shalt.err (!%p2625_p5)
}
 0x47d   : > { %s2734_s22 = smov 64   ;;  %s2735_s12 = smov 4  }
 0x47e   : > { %p3535_p11 = pmov %p3534_p2  ;;  %p3536_p13 = pmov %p3534_p2 }
 0x480   : > { %2297 = dma.vmem_to_hbm [thread:$0]  (%p3535_p11), %s1702_s20, 128, %s3479_s8, [#allocation18], %s2734_s22, %s2734_s22, %s2735_s12  }
 0x481   : > { %2676 = dma.done.wait (%p3536_p13), [#allocation15], 32   ;;  %p3537_p4 = pmov %p3534_p2 }
 0x482   : > { %p3538_p1 = pmov %p3534_p2 }
 0x483   : > { %2678 = vsyncadd (%p3537_p4), [#allocation15], 4294967264 }
 0x484   : > { %2680 = dma.done.wait (%p3538_p1), [#allocation18], 160   ;;  %p3539_p3 = pmov %p3538_p1 }
 0x486   : > { %2682 = vsyncadd (%p3539_p3), [#allocation18], 4294967136 }
 0x487 PF: > { %s3540_s21 = sld [smem:[#allocation27_spill]] }
 0x488   : > { %s3541_s14 = sld [smem:[#allocation29_spill]] }
 0x489   : > { %s3542_s16 = sld [smem:[#allocation28_spill]] }
 0x48d   : > { %s1728_s24 = sand.u32 1, %s3540_s21  }
 0x48e   : > { %p3543_p10 = scmp.ne.s32.totalorder %s3541_s14, 0  ;;  %s1729_s23 = scalar_lea.sflag [#allocation7], %s1728_s24 }
 0x48f   : > { %p3544_p9 = scmp.ge.s32.totalorder %s3542_s16, 2 }
 0x491   : > { %p2321_p2 = pnand %p3544_p9, %p3543_p10 }
 0x493   : > { %p2322_p12 = pneg %p2321_p2 }
 0x495   : > { %2684 = dma.done.wait (%p2322_p12), %s1729_s23, 256  }
 0x496   : > { %2686 = vsyncadd (%p2322_p12), %s1729_s23, 4294967040  ;;  %s3545_s1 = sadd.s32 4294967294, %s3542_s16  }
 0x497   : > { %s1737_s2 = sand.u32 1, %s3545_s1  }
 0x498   : > { %s1738_s10 = scalar_lea.sflag [#allocation15], %s1737_s2 }
 0x499   : > { %2688 = dma.done.wait (%p2322_p12), %s1738_s10, 256  }
 0x49a   : > { %2690 = vsyncadd (%p2322_p12), %s1738_s10, 4294967040  ;;  %s31_s10 = sadd.s32 1, %s3542_s16   ;;  %s3546_s11 = sld [smem:[#allocation30_spill]] }
 0x49b   : > { %p28_p8 = scmp.ge.s32.totalorder %s31_s10, 4   ;;  %s3547_s27 = smov %s2697_s28 }
 0x49c   : > { %s3548_s28 = smov %s2701_s29  ;;  %s3549_s29 = smov %s2913_s13 }
 0x49d   : > { %s3550_s30 = smov %s2709_s9  ;;  %30 = sbr.rel (!%p28_p8) target bundleno = 15 (0xf), region = 146 }
 0x4a0   : > { %s3551_s9 = smov %s3546_s11 }
 0x4a2   :  { %1743 = vsyncpa [#allocation6], 1 }
 0x4a3   :  { %1745 = vsyncpa [#allocation6 + $0x1], 1 }
 0x4a4   :  { %1746 = vsyncpa [#allocation9], 1 }
 0x4a5   :  { %1747 = vsyncpa [#allocation12], 1 }
 0x4a6   :  { %1748 = vsyncpa [#allocation7], 1 }
 0x4a7   :  { %1750 = vsyncpa [#allocation7 + $0x1], 1 }
 0x4a8   :  { %1751 = vsyncpa [#allocation15], 1 }
 0x4a9   :  { %1753 = vsyncpa [#allocation15 + $0x1], 1 }
 0x4aa   :  { %1754 = vsyncpa [#allocation18], 1 }

// kernel: tpu_custom_call.1
= control target key start
LH: loop header
LB: loop body
LE: loop exit
PB: predicated region body
PF: predicated region fallthrough
CT: control target
= control target key end

     0   :  { %s3471_s0 = inlined_call_operand.hbm [shape: f32[2,16,16], index: 0, kind: input, shape index: {}]   ;;  %s3472_s1 = inlined_call_operand.hbm [shape: f32[16,128], index: 1, kind: input, shape index: {}]   ;;  %s3473_s2 = inlined_call_operand.hbm [shape: f32[128,128], index: 2, kind: input, shape index: {}]   ;;  %s3474_s3 = inlined_call_operand.hbm [shape: f32[2,128,128], index: 3, kind: input, shape index: {}]   ;;  %s3475_s4 = inlined_call_operand.hbm [shape: f32[2,16,128], index: 4, kind: output, shape index: {0}]   ;;  %s3476_s5 = inlined_call_operand.hbm [shape: f32[2,16,128], index: 5, kind: output, shape index: {1}]   ;;  %s3477_s6 = inlined_call_operand.hbm [shape: f32[2,128], index: 6, kind: output, shape index: {2}]   ;;  %s3478_s7 = inlined_call_operand.hbm [shape: f32[2,128], index: 7, kind: output, shape index: {3}]   ;;  %s3479_s8 = inlined_call_operand.hbm [shape: f32[2,4,128], index: 8, kind: output, shape index: {4}]  }
   0x1   :  { %3497 = sst [smem:[#allocation35_spill]] %s3472_s1 }
   0x2   :  { %3498 = sst [smem:[#allocation36_spill]] %s3473_s2 }
   0x3   :  { %3499 = sst [smem:[#allocation37_spill]] %s3474_s3 }
   0x4   :  { %14 = vsyncpa [#allocation6], 0 }
   0x5   :  { %16 = vsyncpa [#allocation6 + $0x1], 0 }
   0x6   :  { %17 = vsyncpa [#allocation9], 0 }
   0x7   :  { %18 = vsyncpa [#allocation12], 0 }
   0x8   :  { %19 = vsyncpa [#allocation7], 0 }
   0x9   :  { %21 = vsyncpa [#allocation7 + $0x1], 0 }
   0xa   :  { %22 = vsyncpa [#allocation15], 0 }
   0xb   :  { %24 = vsyncpa [#allocation15 + $0x1], 0 }
   0xc   :  { %25 = vsyncpa [#allocation18], 0  ;;  %s2781_s27 = smov 0   ;;  %s2783_s28 = smov 0  }
   0xd   :  { %s2785_s29 = smov 0   ;;  %s2787_s30 = smov 0  }
   0xe   :  { %s2789_s9 = smov 0   ;;  %s2791_s10 = smov 0  }
   0xf LB: > { %3500 = sst [smem:[#allocation27_spill]] %s2693_s27  ;;  %s2812_s11 = sadd.s32 4294967295, %s2713_s10   ;;  %s2713_s10 = sphi %s2791_s10, %s31_s10   ;;  %s2709_s9 = sphi %s2789_s9, %s3551_s9   ;;  %s2705_s30 = sphi %s2787_s30, %s3550_s30   ;;  %s2701_s29 = sphi %s2785_s29, %s3549_s29   ;;  %s2697_s28 = sphi %s2783_s28, %s3548_s28   ;;  %s2693_s27 = sphi %s2781_s27, %s3547_s27  }
  0x10   : > { %3501 = sst [smem:[#allocation28_spill]] %s2713_s10  ;;  %s3483_s12 = sadd.s32 4294967294, %s2713_s10  }
  0x11   : > { %p59_p0 = scmp.ne.s32.totalorder %s2701_s29, %s2697_s28  ;;  %p60_p1 = scmp.eq.s32.totalorder %s2713_s10, 0 }
  0x12   : > { %p65_p2 = scmp.ne.s32.totalorder %s2697_s28, %s2693_s27  ;;  %p3481_p3 = scmp.eq.s32.totalorder %s2812_s11, 0 }
  0x13   : > { %p2821_p4 = por %p60_p1, %p59_p0  ;;  %p3480_p5 = scmp.eq.s32.totalorder %s2812_s11, 1 }
  0x14   : > { %p2828_p6 = por %p3481_p3, %p65_p2  ;;  %p165_p7 = scmp.eq.s32.totalorder %s3483_s12, 1 }
  0x15   : > { %p2836_p8 = por %p3480_p5, %p59_p0  ;;  %p1890_p9 = scmp.ge.s32.totalorder %s2713_s10, 1 }
  0x16   : > { %p2841_p10 = por %p165_p7, %p65_p2  ;;  %p278_p11 = scmp.lt.s32.totalorder %s2713_s10, 3 }
  0x17   : > { %s3504_s15 = scalar_select %p2836_p8, 1, 0 }
  0x18   : > { %s3505_s16 = scalar_select %p2841_p10, 1, 0 }
  0x19   : > { %p2846_p12 = pnand %p1890_p9, %p278_p11  ;;  %s2715_s18 = smov [#allocation8]  }
  0x1a   : > { %3506 = sst [smem:[#allocation29_spill]] %s3505_s16  ;;  %s290_s19 = sshll.u32 %s2715_s18, 4  ;;  %s291_s19 = int_to_ptr.vmem [resolvable:$true] %s290_s19 }
  0x1b   : > { %p2306_p13 = pneg %p2846_p12  ;;  %p2330_p1 = scmp.lt.s32.totalorder %s2713_s10, 2 }
  0x1c   : > { %s2716_s22 = smov [#allocation10]   ;;  %s2420_s24 = scalar_lea.vmem %s291_s19, 256 }
  0x1d   : > { %p2856_p5 = pnand %p2306_p13, %p3481_p3  ;;  %p2862_p2 = pnand %p2330_p1, %p2821_p4 }
  0x1e   : > { %s303_s23 = sshll.u32 %s2716_s22, 4  ;;  %p2421_p9 = scmp.ne.s32.totalorder %s291_s19, %s2420_s24  ;;  %s304_s23 = int_to_ptr.vmem [resolvable:$true] %s303_s23 }
  0x1f   : > { %p2411_p7 = pneg %p2856_p5  ;;  %p2428_p0 = scmp.lt.s32.totalorder %s291_s19, %s291_s19 }
  0x20   : > { %p2429_p3 = scmp.lt.s32.totalorder %s2420_s24, %s2420_s24 }
  0x21   : > { %p2423_p11 = pnand %p2421_p9, %p2411_p7 }
  0x22   : > { %p2430_p10 = por %p2429_p3, %p2428_p0 }
  0x23   : > { %p2424_p13 = pneg %p2423_p11 }
  0x25   : > { %p2431_p8 = pnand %p2430_p10, %p2424_p13 }
  0x27   : > { %2434 = shalt.err (!%p2431_p8)
}
  0x28   : > { %s3487_s25 = smov 128   ;;  %s3488_s26 = smov 8  }
  0x29   : > { %s3510_s1 = sld [smem:[#allocation35_spill]]  ;;  %s2446_s22 = scalar_lea.vmem %s304_s23, 2048 }
  0x2a   : > { %p2447_p4 = scmp.ne.s32.totalorder %s304_s23, %s2446_s22  ;;  %p2454_p10 = scmp.lt.s32.totalorder %s304_s23, %s304_s23 }
  0x2b   : > { %p2455_p8 = scmp.lt.s32.totalorder %s2446_s22, %s2446_s22 }
  0x2c   : > { %p2449_p1 = pnand %p2447_p4, %p2411_p7 }
  0x2d   : > { %p2456_p0 = por %p2455_p8, %p2454_p10 }
  0x2e   : > { %p2450_p3 = pneg %p2449_p1 }
  0x2f   : > { %2309 = dma.hbm_to_vmem [thread:$0]  (!%p2856_p5), %s3510_s1, 256, %s291_s19, [#allocation9], %s3487_s25, %s3487_s25, %s3488_s26  }
  0x30   : > { %p2457_p9 = pnand %p2456_p0, %p2450_p3 }
  0x32   : > { %2460 = shalt.err (!%p2457_p9)
}
  0x33   : > { %s3511_s2 = sld [smem:[#allocation36_spill]]  ;;  %s2719_s19 = smov [#allocation11]  }
  0x34   : > { %s320_s13 = sshll.u32 %s2719_s19, 4  ;;  %s321_s13 = int_to_ptr.vmem [resolvable:$true] %s320_s13 }
  0x35   : > { %s2472_s18 = scalar_lea.vmem %s321_s13, 4096  ;;  %p2480_p1 = scmp.lt.s32.totalorder %s321_s13, %s321_s13 }
  0x36   : > { %p2473_p11 = scmp.ne.s32.totalorder %s321_s13, %s2472_s18  ;;  %p2481_p3 = scmp.lt.s32.totalorder %s2472_s18, %s2472_s18 }
  0x38   : > { %p2475_p13 = pnand %p2473_p11, %p2411_p7  ;;  %p2482_p10 = por %p2481_p3, %p2480_p1 }
  0x39   : > { %2312 = dma.hbm_to_vmem [thread:$0]  (!%p2856_p5), %s3511_s2, 2048, %s304_s23, [#allocation9], %s3487_s25, %s3487_s25, %s3488_s26  }
  0x3a   : > { %p2476_p4 = pneg %p2475_p13 }
  0x3c   : > { %p2483_p8 = pnand %p2482_p10, %p2476_p4 }
  0x3e   : > { %2486 = shalt.err (!%p2483_p8)
}
  0x3f   : > { %s3512_s3 = sld [smem:[#allocation37_spill]]  ;;  %s40_s22 = sadd.s32 1, %s2709_s9 }
  0x40   : > { %s52_s24 = sadd.s32 1, %s2701_s29  ;;  %p41_p7 = scmp.ge.s32.totalorder %s40_s22, 2 }
  0x41   : > { %s334_s19 = sand.u32 1, %s2701_s29   ;;  %s1896_s20 = sshll.u32 %s2709_s9, 7 }
  0x42   : > { %s1895_s18 = sshll.u32 %s334_s19, 4  ;;  %s3553_s22 = smov (%p41_p7, %s40_s22), 0 }
  0x43   : > { %3513 = sst [smem:[#allocation30_spill]] %s3553_s22  ;;  %s48_s1 = ssub.s32 %s2709_s9, %s3553_s22 }
  0x44   : > { %s346_s23 = scalar_lea.hbm %s3471_s0, %s1896_s20  ;;  %p50_p0 = scmp.eq.s32.totalorder %s48_s1, 0 }
  0x45   : > { %2315 = dma.hbm_to_vmem [thread:$0]  (!%p2856_p5), %s3512_s3, 4096, %s321_s13, [#allocation12], %s3487_s25, %s3487_s25, %s3488_s26  }
  0x46   : > { %s338_s10 = scalar_lea.vmem [#allocation5], %s1895_s18  ;;  %s335_s25 = scalar_lea.sflag [#allocation6], %s334_s19 }
  0x47   : > { %s347_s16 = sshll.u32 %s338_s10, 4  ;;  %p2489_p5 = pneg %p2862_p2  ;;  %s348_s16 = int_to_ptr.vmem [resolvable:$true] %s347_s16 }
  0x48   : > { %s2913_s13 = scalar_select %p50_p0, %s2701_s29, %s52_s24  }
  0x49   : > { %s2500_s26 = scalar_lea.vmem %s348_s16, 256  ;;  %s2720_s3 = smov [#allocation5]  }
  0x4a   : > { %p2501_p9 = scmp.ne.s32.totalorder %s348_s16, %s2500_s26  ;;  %s2505_s27 = sshll.u32 %s2720_s3, 4  ;;  %s2506_s27 = int_to_ptr.vmem [resolvable:$false] %s2505_s27 }
  0x4b   : > { %s2507_s22 = scalar_lea.vmem %s2506_s27, 512  ;;  %p2508_p4 = scmp.lt.s32.totalorder %s348_s16, %s2506_s27 }
  0x4c   : > { %p2503_p11 = pnand %p2501_p9, %p2489_p5  ;;  %p2509_p1 = scmp.lt.s32.totalorder %s2507_s22, %s2500_s26 }
  0x4e   : > { %p2504_p13 = pneg %p2503_p11  ;;  %p2510_p3 = por %p2509_p1, %p2508_p4 }
  0x50   : > { %p2511_p10 = pnand %p2510_p3, %p2504_p13 }
  0x52   : > { %2514 = shalt.err (!%p2511_p10)
}
  0x53   : > { %s2721_s1 = smov 256   ;;  %s3514_s2 = smov 8  }
  0x54   : > { %s3515_s10 = smov 128   ;;  %359 = sbr.rel (%p2846_p12) target bundleno = 1159 (0x487), region = 36 }
  0x55   : > { %2319 = dma.hbm_to_vmem [thread:$0]  (!%p2862_p2), %s346_s23, 256, %s348_s16, %s335_s25, %s2721_s1, %s3515_s10, %s3514_s2  }
  0x59   : > { %s2924_s24 = sand.u32 1, %s2697_s28  }
  0x5a   : > { %s2927_s3 = sshll.u32 %s2924_s24, 4  ;;  %s362_s27 = scalar_lea.sflag [#allocation6], %s2924_s24 }
  0x5b   : > { %s365_s26 = scalar_lea.vmem [#allocation5], %s2927_s3 }
  0x5c   : > { %2664 = dma.done.wait (%p2828_p6), %s362_s27, 256  }
  0x5d   : > { %2666 = vsyncadd (%p2828_p6), %s362_s27, 4294967040  ;;  %p3516_p2 = scmp.eq.s32.totalorder %s2812_s11, 0 }
  0x5f   : > { %2668 = dma.done.wait (%p3516_p2), [#allocation9], 2304   ;;  %p3517_p12 = pmov %p3516_p2 }
  0x60   : > { %p3518_p8 = pmov %p3516_p2 }
  0x61   : > { %2670 = vsyncadd (%p3517_p12), [#allocation9], 4294964992 }
  0x62   : > { %2672 = dma.done.wait (%p3518_p8), [#allocation12], 4096   ;;  %p3519_p7 = pmov %p3516_p2 }
  0x63   : > { %s2944_s16 = scalar_lea.vmem [#allocation13], %s2927_s3  ;;  %s2947_s17 = scalar_lea.vmem [#allocation14], %s2927_s3 }
  0x64   : > { %2674 = vsyncadd (%p3519_p7), [#allocation12], 4294963200  ;;  %p1904_p6 = scmp.ne.s32.totalorder %s2705_s30, 0 }
  0x66   : > { %423 = sbr.rel (%p1904_p6) target bundleno = 110 (0x6e), region = 56 }
  0x6b   : > { %v2722_v0 = vmov 0.0  }
  0x6c   : > { %424 = vst [vmem:[#allocation2] sm:$0x3] %v2722_v0  ;;  %425 = vst [vmem:[#allocation3] sm:$0x3] %v2722_v0 }
  0x6d   : > { %426 = vst [vmem:[#allocation4] sm:$0xf] %v2722_v0  ;;  %427 = vst [vmem:[#allocation4 + $0x4] sm:$0xf] %v2722_v0 }
  0x6e PF: > { %v2950_v1 = vld [vmem:[#allocation10 + $0x78] sm:$0xff]  ;;  %v3491_v2 = vmov 0.0   ;;  %v2953_v3 = vld [vmem:[#allocation10 + $0x70] sm:$0xff]  ;;  %vm2724_vm0 = vmmov 0   ;;  %v2959_v4 = vld [vmem:[#allocation10 + $0x68] sm:$0xff]  ;;  %vm432_vm1 = vcmask 130048   ;;  %v627_v60 = vlaneseq }
  0x6f   : > { %2066 = vmatprep.subr.mxu1 %v3491_v2  ;;  %2098 = vmatprep.mubr.msk.f32.mxu1 %vm2724_vm0, %v3491_v2  ;;  %v431_v5 = vld [vmem:[#allocation8 + $0x8] sm:$0xff]  ;;  %v2963_v6 = vld [vmem:[#allocation10 + $0x60] sm:$0xff]  ;;  %v430_v7 = vld [vmem:[#allocation8] sm:$0xff]  ;;  %v2725_v58 = vmov 1966171168   ;;  %vm619_vm2 = vcmask 1041409  }
  0x70   : > { %2067 = vmatpush3.msra.mxu1 %v2950_v1  ;;  %2059 = vmatprep.subr.mxu0 %v431_v5  ;;  %v428_v8 = vld [vmem:[%s365_s26] sm:$0xff]  ;;  %v2969_v9 = vld [vmem:[#allocation10 + $0x58] sm:$0xff]  ;;  %v2981_v13 = vld [vmem:[#allocation10 + $0x48] sm:$0xff]  ;;  %v625_v59 = vunpack.c.l.s4 %v2725_v58  ;;  %p1940_p0 = scmp.ne.s32.totalorder %s2705_s30, 1 }
  0x71   : > { %2068 = vmatprep.subr.mxu1 %v3491_v2  ;;  %2060 = vmatpush3.msra.mxu0 %v431_v5  ;;  %v429_v10 = vld [vmem:[%s365_s26 + $0x8] sm:$0xff]  ;;  %v2975_v11 = vld [vmem:[#allocation10 + $0x50] sm:$0xff]  ;;  %v2987_v14 = vld [vmem:[#allocation10 + $0x40] sm:$0xff] }
  0x72   : > { %2069 = vmatpush3.msra.mxu1 %v2953_v3  ;;  %2061 = vmatprep.subr.mxu0 %v430_v7  ;;  %v2977_v12 = vld [vmem:[#allocation11 + $0x78] sm:$0xff]  ;;  %v2990_v15 = vld [vmem:[#allocation11 + $0x70] sm:$0xff]  ;;  %v3004_v18 = vld [vmem:[#allocation11 + $0x68] sm:$0xff] }
  0x73   : > { %2070 = vmatprep.subr.mxu1 %v3491_v2  ;;  %2062 = vmatpush3.msra.mxu0 %v430_v7  ;;  %v2996_v16 = vld [vmem:[#allocation10 + $0x38] sm:$0xff]  ;;  %v3001_v17 = vld [vmem:[#allocation10 + $0x30] sm:$0xff]  ;;  %v3008_v19 = vld [vmem:[#allocation10 + $0x28] sm:$0xff]  ;;  %v626_v7 = vunpack.c.0.s8 %v625_v59 }
  0x74   : > { %2071 = vmatpush3.msra.mxu1 %v2959_v4  ;;  %2063 = vmatprep.mubr.msk.f32.mxu0 %vm432_vm1, %v428_v8  ;;  %v3013_v20 = vld [vmem:[#allocation10 + $0x20] sm:$0xff]  ;;  %v3020_v22 = vld [vmem:[#allocation10 + $0x18] sm:$0xff]  ;;  %v3025_v23 = vld [vmem:[#allocation10 + $0x10] sm:$0xff]  ;;  %v628_v8 = vshrl.u32 %v627_v60, 7 }
  0x75   : > { %2072 = vmatprep.subr.mxu1 %v3491_v2  ;;  %2064 = vmatmul.mubr.msk.f32.vlgmr.msra.gmra.mxu0 %vm432_vm1, %v429_v10  ;;  %v3016_v21 = vld [vmem:[#allocation11 + $0x60] sm:$0xff]  ;;  %v3028_v24 = vld [vmem:[#allocation11 + $0x58] sm:$0xff]  ;;  %v3032_v25 = vld [vmem:[#allocation10 + $0x8] sm:$0xff] }
  0x76   : > { %2073 = vmatpush3.msra.mxu1 %v2963_v6  ;;  %2101 = vmatprep.subr.mxu0 %v3491_v2  ;;  %v3037_v26 = vld [vmem:[#allocation10] sm:$0xff]  ;;  %v2407_v27 = vld [vmem:[#allocation4] sm:$0xff]   ;;  %v3040_v28 = vld [vmem:[#allocation11 + $0x50] sm:$0xff] }
  0x77   : > { %2074 = vmatprep.subr.mxu1 %v3491_v2  ;;  %2102 = vmatpush3.xpose.msra.mxu0 %v2977_v12  ;;  %v3044_v29 = vld [vmem:[#allocation11 + $0xf8] sm:$0xff]  ;;  %v3049_v30 = vld [vmem:[#allocation11 + $0x48] sm:$0xff]  ;;  %v3054_v31 = vld [vmem:[#allocation11 + $0xf0] sm:$0xff] }
  0x78   : > { %2075 = vmatpush3.msra.mxu1 %v2969_v9  ;;  %2103 = vmatprep.subr.mxu0 %v3491_v2  ;;  %v3062_v32 = vld [vmem:[#allocation11 + $0xe8] sm:$0xff]  ;;  %v3066_v33 = vld [vmem:[#allocation11 + $0xe0] sm:$0xff]  ;;  %v3070_v34 = vld [vmem:[#allocation11 + $0xd8] sm:$0xff] }
  0x79   : > { %2076 = vmatprep.subr.mxu1 %v3491_v2  ;;  %2133 = vmatprep.mubr.msk.f32.mxu0 %vm2724_vm0, %v3491_v2  ;;  %v3074_v35 = vld [vmem:[#allocation11 + $0xd0] sm:$0xff]  ;;  %v3078_v36 = vld [vmem:[#allocation11 + $0xc8] sm:$0xff]  ;;  %v3082_v37 = vld [vmem:[#allocation11 + $0x40] sm:$0xff] }
  0x7a   : > { %2077 = vmatpush3.msra.mxu1 %v2975_v11  ;;  %v3086_v38 = vld [vmem:[#allocation11 + $0xc0] sm:$0xff]  ;;  %v3089_v39 = vld [vmem:[#allocation11 + $0x38] sm:$0xff]  ;;  %v3097_v41 = vld [vmem:[#allocation11 + $0x30] sm:$0xff] }
  0x7b   : > { %2078 = vmatprep.subr.mxu1 %v3491_v2  ;;  %2104 = vmatpush3.xpose.msra.mxu0 %v2990_v15  ;;  %v3093_v40 = vld [vmem:[#allocation11 + $0xb8] sm:$0xff]  ;;  %v3101_v42 = vld [vmem:[#allocation11 + $0xb0] sm:$0xff]  ;;  %v3105_v43 = vld [vmem:[#allocation11 + $0x28] sm:$0xff] }
  0x7c   : > { %2079 = vmatpush3.msra.mxu1 %v2981_v13  ;;  %2105 = vmatprep.subr.mxu0 %v3491_v2  ;;  %v3109_v44 = vld [vmem:[#allocation11 + $0xa8] sm:$0xff]  ;;  %v3113_v45 = vld [vmem:[#allocation11 + $0x20] sm:$0xff]  ;;  %v3121_v47 = vld [vmem:[#allocation11 + $0x18] sm:$0xff] }
  0x7d   : > { %2080 = vmatprep.subr.mxu1 %v3491_v2  ;;  %v3117_v46 = vld [vmem:[#allocation11 + $0xa0] sm:$0xff]  ;;  %v3125_v48 = vld [vmem:[#allocation11 + $0x98] sm:$0xff]  ;;  %v3129_v49 = vld [vmem:[#allocation11 + $0x10] sm:$0xff] }
  0x7e   : > { %2081 = vmatpush3.msra.mxu1 %v2987_v14  ;;  %v3133_v50 = vld [vmem:[#allocation11 + $0x90] sm:$0xff]  ;;  %v3137_v51 = vld [vmem:[#allocation11 + $0x8] sm:$0xff]  ;;  %v3144_v53 = vld [vmem:[#allocation11] sm:$0xff] }
  0x7f   : > { %2082 = vmatprep.subr.mxu1 %v3491_v2  ;;  %2106 = vmatpush3.xpose.msra.mxu0 %v3004_v18  ;;  %3520 = vst [vmem:[#allocation31_spill] sm:$0xff] %v3133_v50  ;;  %v3141_v52 = vld [vmem:[#allocation11 + $0x88] sm:$0xff]  ;;  %v3148_v54 = vld [vmem:[#allocation11 + $0x80] sm:$0xff] }
  0x80   : > { %2083 = vmatpush3.msra.mxu1 %v2996_v16  ;;  %2107 = vmatprep.subr.mxu0 %v3491_v2  ;;  %3521 = vst [vmem:[#allocation32_spill] sm:$0xff] %v3141_v52  ;;  %3522 = vst [vmem:[#allocation33_spill] sm:$0xff] %v3148_v54  ;;  %v514_v0 = vld [vmem:[#allocation2] sm:$0x3] }
  0x81   : > { %2084 = vmatprep.subr.mxu1 %v3491_v2 }
  0x82   : > { %2085 = vmatpush3.msra.mxu1 %v3001_v17 }
  0x83   : > { %2086 = vmatprep.subr.mxu1 %v3491_v2  ;;  %2108 = vmatpush3.xpose.msra.mxu0 %v3016_v21 }
  0x84   : > { %2087 = vmatpush3.msra.mxu1 %v3008_v19  ;;  %2109 = vmatprep.subr.mxu0 %v3491_v2 }
  0x85   : > { %2088 = vmatprep.subr.mxu1 %v3491_v2 }
  0x86   : > { %2089 = vmatpush3.msra.mxu1 %v3013_v20 }
  0x87   : > { %2090 = vmatprep.subr.mxu1 %v3491_v2  ;;  %2110 = vmatpush3.xpose.msra.mxu0 %v3028_v24 }
  0x88   : > { %2091 = vmatpush3.msra.mxu1 %v3020_v22  ;;  %2111 = vmatprep.subr.mxu0 %v3491_v2 }
  0x89   : > { %2092 = vmatprep.subr.mxu1 %v3491_v2 }
  0x8a   : > { %2093 = vmatpush3.msra.mxu1 %v3025_v23 }
  0x8b   : > { %2094 = vmatprep.subr.mxu1 %v3491_v2  ;;  %2112 = vmatpush3.xpose.msra.mxu0 %v3040_v28 }
  0x8c   : > { %2095 = vmatpush3.msra.mxu1 %v3032_v25  ;;  %2113 = vmatprep.subr.mxu0 %v3491_v2 }
  0x8d   : > { %2096 = vmatprep.subr.mxu1 %v3491_v2 }
  0x8e   : > { %2097 = vmatpush3.msra.mxu1 %v3037_v26 }
  0x8f   : > { %2099 = vmatmul.mubr.f32.vlgmr.msra.gmra.mxu1 %v2407_v27  ;;  %2136 = vmatprep.subr.mxu1 %v3491_v2 }
  0x90   : > { %2137 = vmatpush3.xpose.msra.mxu1 %v3044_v29  ;;  %2168 = vmatprep.mubr.msk.f32.mxu1 %vm2724_vm0, %v3491_v2 }
  0x91   : > { %2138 = vmatprep.subr.mxu1 %v3491_v2  ;;  %2114 = vmatpush3.xpose.msra.mxu0 %v3049_v30 }
  0x92   : > { %2115 = vmatprep.subr.mxu0 %v3491_v2 }
  0x94   : > { %2139 = vmatpush3.xpose.msra.mxu1 %v3054_v31 }
  0x95   : > { %2140 = vmatprep.subr.mxu1 %v3491_v2  ;;  %2116 = vmatpush3.xpose.msra.mxu0 %v3082_v37 }
  0x96   : > { %2117 = vmatprep.subr.mxu0 %v3491_v2 }
  0x98   : > { %2141 = vmatpush3.xpose.msra.mxu1 %v3062_v32 }
  0x99   : > { %2142 = vmatprep.subr.mxu1 %v3491_v2  ;;  %2118 = vmatpush3.xpose.msra.mxu0 %v3089_v39 }
  0x9a   : > { %2119 = vmatprep.subr.mxu0 %v3491_v2 }
  0x9c   : > { %2143 = vmatpush3.xpose.msra.mxu1 %v3066_v33 }
  0x9d   : > { %2144 = vmatprep.subr.mxu1 %v3491_v2  ;;  %2120 = vmatpush3.xpose.msra.mxu0 %v3097_v41 }
  0x9e   : > { %2121 = vmatprep.subr.mxu0 %v3491_v2 }
  0xa0   : > { %2145 = vmatpush3.xpose.msra.mxu1 %v3070_v34 }
  0xa1   : > { %2146 = vmatprep.subr.mxu1 %v3491_v2  ;;  %2122 = vmatpush3.xpose.msra.mxu0 %v3105_v43 }
  0xa2   : > { %2123 = vmatprep.subr.mxu0 %v3491_v2 }
  0xa4   : > { %2147 = vmatpush3.xpose.msra.mxu1 %v3074_v35 }
  0xa5   : > { %2148 = vmatprep.subr.mxu1 %v3491_v2  ;;  %2124 = vmatpush3.xpose.msra.mxu0 %v3113_v45 }
  0xa6   : > { %2125 = vmatprep.subr.mxu0 %v3491_v2 }
  0xa8   : > { %2149 = vmatpush3.xpose.msra.mxu1 %v3078_v36 }
  0xa9   : > { %2150 = vmatprep.subr.mxu1 %v3491_v2  ;;  %2126 = vmatpush3.xpose.msra.mxu0 %v3121_v47 }
  0xaa   : > { %2127 = vmatprep.subr.mxu0 %v3491_v2 }
  0xac   : > { %2151 = vmatpush3.xpose.msra.mxu1 %v3086_v38 }
  0xad   : > { %2152 = vmatprep.subr.mxu1 %v3491_v2  ;;  %2128 = vmatpush3.xpose.msra.mxu0 %v3129_v49 }
  0xae   : > { %2129 = vmatprep.subr.mxu0 %v3491_v2 }
  0xb0   : > { %2153 = vmatpush3.xpose.msra.mxu1 %v3093_v40 }
  0xb1   : > { %2154 = vmatprep.subr.mxu1 %v3491_v2  ;;  %2130 = vmatpush3.xpose.msra.mxu0 %v3137_v51 }
  0xb2   : > { %2131 = vmatprep.subr.mxu0 %v3491_v2 }
  0xb4   : > { %2155 = vmatpush3.xpose.msra.mxu1 %v3101_v42 }
  0xb5   : > { %2156 = vmatprep.subr.mxu1 %v3491_v2  ;;  %2132 = vmatpush3.xpose.msra.mxu0 %v3144_v53 }
  0xb6   : > { %2171 = vmatprep.subr.mxu0 %v3491_v2 }
  0xb8   : > { %2157 = vmatpush3.xpose.msra.mxu1 %v3109_v44 }
  0xb9   : > { %2158 = vmatprep.subr.mxu1 %v3491_v2 }
  0xbc   : > { %2159 = vmatpush3.xpose.msra.mxu1 %v3117_v46 }
  0xbd   : > { %2160 = vmatprep.subr.mxu1 %v3491_v2 }
  0xc0   : > { %2161 = vmatpush3.xpose.msra.mxu1 %v3125_v48 }
  0xc1   : > { %2162 = vmatprep.subr.mxu1 %v3491_v2 }
  0xc4   : > { %2163 = vmatpush3.xpose.msra.mxu1 %v3133_v50 }
  0xc5   : > { %2164 = vmatprep.subr.mxu1 %v3491_v2 }
  0xc8   : > { %2165 = vmatpush3.xpose.msra.mxu1 %v3141_v52  ;;  %v3160_v52 = vsub.s32 %v626_v7, %v628_v8 }
  0xc9   : > { %2166 = vmatprep.subr.mxu1 %v3491_v2 }
  0xcc   : > { %2167 = vmatpush3.xpose.msra.mxu1 %v3148_v54 }
  0xcd   : > { %2206 = vmatprep.subr.mxu1 %v3491_v2  ;;  %v613_v2 = vmul.f32 0.9, %v514_v0 }
 0x135   : > { %v3154_v55 = vpop.f32.mrf.mxu0 }
 0x137   : > { %v3156_v56 = vpop.f32.mrf.mxu0 }
 0x138   : > { %3523 = vst [vmem:[#allocation34_spill] sm:$0xff] %v3156_v56 }
 0x14f   : > { %v604_v57 = vpop.f32.mrf.mxu1 }
 0x150   : > { %v609_v61 = vcombine.high %v604_v57, %v604_v57  ;;  %v611_v62 = vadd.f32 %v604_v57, %v3156_v56 }
 0x151   : > { %v2100_v63 = vpop.f32.mrf.mxu1 }
 0x152   : > { %v612_v5 = vadd.f32 %v3154_v55, %v609_v61  ;;  %v614_v10 = vmul.f32 0.1, %v611_v62 }
 0x154   : > { %v615_v27 = vmul.f32 0.1, %v612_v5  ;;  %v651_v50 = vrot.slane %v614_v10, 1  ;;  %v683_v0 = vrot.slane %v614_v10, 2 }
 0x156   : > { %v618_v54 = vrot.slane %v615_v27, 7  ;;  %v652_v59 = vsel %vm619_vm2, %v615_v27, %v651_v50  ;;  %v684_v60 = vrot.slane %v615_v27, 1 }
 0x158   : > { %v620_v58 = vsel %vm619_vm2, %v618_v54, %v614_v10  ;;  %v685_v7 = vsel %vm619_vm2, %v684_v60, %v683_v0  ;;  %v3524_v0 = vmov 0.0  }
 0x159   : > { %v622_v57 = vadd.f32 %v620_v58, %v613_v2  ;;  %v717_v2 = vrot.slane %v615_v27, 2  ;;  %v716_v58 = vrot.slane %v614_v10, 3 }
 0x15b   : > { %v630_v63 = vrot.slane %v622_v57, %v3160_v52  ;;  %v650_v56 = vmul.f32 0.9, %v622_v57 }
 0x15d   : > { %v631_v61 = vcombine.high %v630_v63, %v630_v63  ;;  %1907 = vst.sshfl [vmem:[%s2944_s16] sm:$0x1 pattern:$0x73625140] %v630_v63  ;;  %v654_v62 = vadd.f32 %v652_v59, %v650_v56  ;;  %v718_v63 = vsel %vm619_vm2, %v717_v2, %v716_v58 }
 0x15f   : > { %1908 = vst.sshfl [vmem:[%s2944_s16 + $0x8] sm:$0x1 pattern:$0x73625140] %v631_v61  ;;  %v662_v5 = vrot.slane %v654_v62, %v3160_v52  ;;  %v682_v54 = vmul.f32 0.9, %v654_v62 }
 0x161   : > { %v663_v8 = vcombine.high %v662_v5, %v662_v5  ;;  %1909 = vst.sshfl [vmem:[%s2944_s16 + $0x1] sm:$0x1 pattern:$0x73625140] %v662_v5  ;;  %v687_v50 = vadd.f32 %v685_v7, %v682_v54 }
 0x163   : > { %1910 = vst.sshfl [vmem:[%s2944_s16 + $0x9] sm:$0x1 pattern:$0x73625140] %v663_v8  ;;  %v695_v56 = vrot.slane %v687_v50, %v3160_v52  ;;  %v715_v57 = vmul.f32 0.9, %v687_v50 }
 0x165   : > { %v696_v59 = vcombine.high %v695_v56, %v695_v56  ;;  %1911 = vst.sshfl [vmem:[%s2944_s16 + $0x2] sm:$0x1 pattern:$0x73625140] %v695_v56  ;;  %v3174_v61 = vadd.f32 %v718_v63, %v715_v57 }
 0x167   : > { %1912 = vst.sshfl [vmem:[%s2944_s16 + $0xa] sm:$0x1 pattern:$0x73625140] %v696_v59  ;;  %v728_v27 = vrot.slane %v3174_v61, %v3160_v52  ;;  %v1160_v50 = vmul.f32 0.9, %v3174_v61 }
 0x169   : > { %v729_v60 = vcombine.high %v728_v27, %v728_v27  ;;  %1913 = vst.sshfl [vmem:[%s2944_s16 + $0x3] sm:$0x1 pattern:$0x73625140] %v728_v27 }
 0x16b   : > { %1914 = vst.sshfl [vmem:[%s2944_s16 + $0xb] sm:$0x1 pattern:$0x73625140] %v729_v60 }
 0x170   : > { %v748_v62 = vld [vmem:[%s2944_s16] sm:$0xf] }
 0x171   : > { %2134 = vmatmul.mubr.f32.vlgmr.msra.gmra.mxu0 %v748_v62 }
 0x172   : > { %v749_v10 = vld [vmem:[%s2944_s16 + $0x8] sm:$0xf]  ;;  %2172 = vmatpush3.msra.mxu0 %v2950_v1  ;;  %2203 = vmatprep.mubr.msk.f32.mxu0 %vm2724_vm0, %v3524_v0 }
 0x173   : > { %2169 = vmatmul.mubr.f32.vlgmr.msra.gmra.mxu1 %v749_v10  ;;  %2173 = vmatprep.subr.mxu0 %v3524_v0 }
 0x174   : > { %2174 = vmatpush3.msra.mxu0 %v2953_v3  ;;  %2207 = vmatpush3.xpose.msra.mxu1 %v2977_v12  ;;  %v515_v3 = vld [vmem:[#allocation3] sm:$0x3] }
 0x175   : > { %2175 = vmatprep.subr.mxu0 %v3524_v0  ;;  %2208 = vmatprep.subr.mxu1 %v3524_v0  ;;  %v922_v12 = vmul.f32 0.9, %v515_v3 }
 0x176   : > { %2176 = vmatpush3.msra.mxu0 %v2959_v4  ;;  %2238 = vmatprep.mubr.msk.f32.mxu1 %vm2724_vm0, %v3524_v0 }
 0x177   : > { %2177 = vmatprep.subr.mxu0 %v3524_v0 }
 0x178   : > { %2178 = vmatpush3.msra.mxu0 %v2963_v6  ;;  %2209 = vmatpush3.xpose.msra.mxu1 %v2990_v15 }
 0x179   : > { %2179 = vmatprep.subr.mxu0 %v3524_v0  ;;  %2210 = vmatprep.subr.mxu1 %v3524_v0 }
 0x17a   : > { %2180 = vmatpush3.msra.mxu0 %v2969_v9 }
 0x17b   : > { %2181 = vmatprep.subr.mxu0 %v3524_v0 }
 0x17c   : > { %2182 = vmatpush3.msra.mxu0 %v2975_v11  ;;  %2211 = vmatpush3.xpose.msra.mxu1 %v3004_v18 }
 0x17d   : > { %2183 = vmatprep.subr.mxu0 %v3524_v0  ;;  %2212 = vmatprep.subr.mxu1 %v3524_v0 }
 0x17e   : > { %2184 = vmatpush3.msra.mxu0 %v2981_v13 }
 0x17f   : > { %2185 = vmatprep.subr.mxu0 %v3524_v0 }
 0x180   : > { %2186 = vmatpush3.msra.mxu0 %v2987_v14  ;;  %2213 = vmatpush3.xpose.msra.mxu1 %v3016_v21 }
 0x181   : > { %2187 = vmatprep.subr.mxu0 %v3524_v0  ;;  %2214 = vmatprep.subr.mxu1 %v3524_v0 }
 0x182   : > { %2188 = vmatpush3.msra.mxu0 %v2996_v16 }
 0x183   : > { %2189 = vmatprep.subr.mxu0 %v3524_v0 }
 0x184   : > { %2190 = vmatpush3.msra.mxu0 %v3001_v17  ;;  %2215 = vmatpush3.xpose.msra.mxu1 %v3028_v24 }
 0x185   : > { %2191 = vmatprep.subr.mxu0 %v3524_v0  ;;  %2216 = vmatprep.subr.mxu1 %v3524_v0 }
 0x186   : > { %2192 = vmatpush3.msra.mxu0 %v3008_v19 }
 0x187   : > { %2193 = vmatprep.subr.mxu0 %v3524_v0 }
 0x188   : > { %2194 = vmatpush3.msra.mxu0 %v3013_v20  ;;  %2217 = vmatpush3.xpose.msra.mxu1 %v3040_v28 }
 0x189   : > { %2195 = vmatprep.subr.mxu0 %v3524_v0  ;;  %2218 = vmatprep.subr.mxu1 %v3524_v0 }
 0x18a   : > { %2196 = vmatpush3.msra.mxu0 %v3020_v22 }
 0x18b   : > { %2197 = vmatprep.subr.mxu0 %v3524_v0 }
 0x18c   : > { %2198 = vmatpush3.msra.mxu0 %v3025_v23  ;;  %2219 = vmatpush3.xpose.msra.mxu1 %v3049_v30 }
 0x18d   : > { %2199 = vmatprep.subr.mxu0 %v3524_v0  ;;  %2220 = vmatprep.subr.mxu1 %v3524_v0 }
 0x18e   : > { %2200 = vmatpush3.msra.mxu0 %v3032_v25 }
 0x18f   : > { %2201 = vmatprep.subr.mxu0 %v3524_v0 }
 0x190   : > { %2202 = vmatpush3.msra.mxu0 %v3037_v26  ;;  %2221 = vmatpush3.xpose.msra.mxu1 %v3082_v37 }
 0x191   : > { %2241 = vmatprep.subr.mxu0 %v3524_v0  ;;  %2222 = vmatprep.subr.mxu1 %v3524_v0 }
 0x194   : > { %2223 = vmatpush3.xpose.msra.mxu1 %v3089_v39 }
 0x195   : > { %2224 = vmatprep.subr.mxu1 %v3524_v0 }
 0x198   : > { %2225 = vmatpush3.xpose.msra.mxu1 %v3097_v41 }
 0x199   : > { %2226 = vmatprep.subr.mxu1 %v3524_v0 }
 0x19c   : > { %2227 = vmatpush3.xpose.msra.mxu1 %v3105_v43 }
 0x19d   : > { %2228 = vmatprep.subr.mxu1 %v3524_v0 }
 0x1a0   : > { %2229 = vmatpush3.xpose.msra.mxu1 %v3113_v45 }
 0x1a1   : > { %2230 = vmatprep.subr.mxu1 %v3524_v0 }
 0x1a4   : > { %2231 = vmatpush3.xpose.msra.mxu1 %v3121_v47 }
 0x1a5   : > { %2232 = vmatprep.subr.mxu1 %v3524_v0 }
 0x1a8   : > { %2233 = vmatpush3.xpose.msra.mxu1 %v3129_v49 }
 0x1a9   : > { %2234 = vmatprep.subr.mxu1 %v3524_v0 }
 0x1ac   : > { %2235 = vmatpush3.xpose.msra.mxu1 %v3137_v51 }
 0x1ad   : > { %2236 = vmatprep.subr.mxu1 %v3524_v0 }
 0x1b0   : > { %2237 = vmatpush3.xpose.msra.mxu1 %v3144_v53 }
 0x231   : > { %v848_v1 = vpop.f32.mrf.mxu0 }
 0x232   : > { %v923_v9 = vmul.f32 0.1, %v848_v1 }
 0x233   : > { %v2135_v4 = vpop.f32.mrf.mxu0  ;;  %v918_v6 = vpop.f32.mrf.mxu1 }
 0x234   : > { %v924_v11 = vmul.f32 0.1, %v918_v6  ;;  %v959_v15 = vrot.slane %v923_v9, 1  ;;  %v991_v24 = vrot.slane %v923_v9, 2  ;;  %v1024_v41 = vrot.slane %v923_v9, 3 }
 0x235   : > { %v2170_v13 = vpop.f32.mrf.mxu1 }
 0x236   : > { %v927_v14 = vrot.slane %v924_v11, 7  ;;  %v960_v20 = vsel %vm619_vm2, %v924_v11, %v959_v15  ;;  %v992_v21 = vrot.slane %v924_v11, 1  ;;  %v1025_v30 = vrot.slane %v924_v11, 2 }
 0x238   : > { %v928_v16 = vsel %vm619_vm2, %v927_v14, %v923_v9  ;;  %v993_v28 = vsel %vm619_vm2, %v992_v21, %v991_v24  ;;  %v1026_v47 = vsel %vm619_vm2, %v1025_v30, %v1024_v41 }
 0x239   : > { %v930_v17 = vadd.f32 %v928_v16, %v922_v12 }
 0x23b   : > { %v938_v18 = vrot.slane %v930_v17, %v3160_v52  ;;  %v958_v19 = vmul.f32 0.9, %v930_v17 }
 0x23d   : > { %v939_v22 = vcombine.high %v938_v18, %v938_v18  ;;  %1915 = vst.sshfl [vmem:[%s2947_s17] sm:$0x1 pattern:$0x73625140] %v938_v18  ;;  %v962_v23 = vadd.f32 %v960_v20, %v958_v19 }
 0x23f   : > { %1916 = vst.sshfl [vmem:[%s2947_s17 + $0x8] sm:$0x1 pattern:$0x73625140] %v939_v22  ;;  %v970_v25 = vrot.slane %v962_v23, %v3160_v52  ;;  %v990_v26 = vmul.f32 0.9, %v962_v23 }
 0x241   : > { %v971_v37 = vcombine.high %v970_v25, %v970_v25  ;;  %1917 = vst.sshfl [vmem:[%s2947_s17 + $0x1] sm:$0x1 pattern:$0x73625140] %v970_v25  ;;  %v995_v39 = vadd.f32 %v993_v28, %v990_v26 }
 0x243   : > { %1918 = vst.sshfl [vmem:[%s2947_s17 + $0x9] sm:$0x1 pattern:$0x73625140] %v971_v37  ;;  %v1003_v43 = vrot.slane %v995_v39, %v3160_v52  ;;  %v1023_v45 = vmul.f32 0.9, %v995_v39 }
 0x245   : > { %v1004_v49 = vcombine.high %v1003_v43, %v1003_v43  ;;  %1919 = vst.sshfl [vmem:[%s2947_s17 + $0x2] sm:$0x1 pattern:$0x73625140] %v1003_v43  ;;  %v3262_v51 = vadd.f32 %v1026_v47, %v1023_v45 }
 0x247   : > { %1920 = vst.sshfl [vmem:[%s2947_s17 + $0xa] sm:$0x1 pattern:$0x73625140] %v1004_v49  ;;  %v1036_v53 = vrot.slane %v3262_v51, %v3160_v52  ;;  %v1470_v30 = vmul.f32 0.9, %v3262_v51 }
 0x249   : > { %v1037_v5 = vcombine.high %v1036_v53, %v1036_v53  ;;  %1921 = vst.sshfl [vmem:[%s2947_s17 + $0x3] sm:$0x1 pattern:$0x73625140] %v1036_v53 }
 0x24b   : > { %1922 = vst.sshfl [vmem:[%s2947_s17 + $0xb] sm:$0x1 pattern:$0x73625140] %v1037_v5 }
 0x250   : > { %v1056_v54 = vld [vmem:[%s2947_s17] sm:$0xf] }
 0x251   : > { %1058 = vst [vmem:[#allocation4] sm:$0xf] %v1056_v54 }
 0x252   : > { %v1057_v7 = vld [vmem:[%s2947_s17 + $0x8] sm:$0xf] }
 0x253   : > { %1059 = vst [vmem:[#allocation4 + $0x4] sm:$0xf] %v1057_v7 }
 0x25a   : > { %v2408_v2 = vld [vmem:[#allocation4] sm:$0xff]  }
 0x25b   : > { %2204 = vmatmul.mubr.f32.vlgmr.msra.gmra.mxu0 %v2408_v2 }
 0x25c   : > { %2242 = vmatpush3.xpose.msra.mxu0 %v3044_v29  ;;  %2273 = vmatprep.mubr.msk.f32.mxu0 %vm2724_vm0, %v3524_v0  ;;  %v3525_v29 = vld [vmem:[#allocation31_spill] sm:$0xff] }
 0x25d   : > { %2243 = vmatprep.subr.mxu0 %v3524_v0 }
 0x260   : > { %2244 = vmatpush3.xpose.msra.mxu0 %v3054_v31  ;;  %v3526_v31 = vld [vmem:[#allocation32_spill] sm:$0xff] }
 0x261   : > { %2245 = vmatprep.subr.mxu0 %v3524_v0 }
 0x264   : > { %2246 = vmatpush3.xpose.msra.mxu0 %v3062_v32  ;;  %v3527_v32 = vld [vmem:[#allocation33_spill] sm:$0xff] }
 0x265   : > { %2247 = vmatprep.subr.mxu0 %v3524_v0 }
 0x268   : > { %2248 = vmatpush3.xpose.msra.mxu0 %v3066_v33 }
 0x269   : > { %2249 = vmatprep.subr.mxu0 %v3524_v0 }
 0x26c   : > { %2250 = vmatpush3.xpose.msra.mxu0 %v3070_v34 }
 0x26d   : > { %2251 = vmatprep.subr.mxu0 %v3524_v0 }
 0x270   : > { %2252 = vmatpush3.xpose.msra.mxu0 %v3074_v35 }
 0x271   : > { %2253 = vmatprep.subr.mxu0 %v3524_v0 }
 0x274   : > { %2254 = vmatpush3.xpose.msra.mxu0 %v3078_v36 }
 0x275   : > { %2255 = vmatprep.subr.mxu0 %v3524_v0 }
 0x278   : > { %2256 = vmatpush3.xpose.msra.mxu0 %v3086_v38  ;;  %v3528_v38 = vld [vmem:[#allocation34_spill] sm:$0xff] }
 0x279   : > { %2257 = vmatprep.subr.mxu0 %v3524_v0 }
 0x27c   : > { %2258 = vmatpush3.xpose.msra.mxu0 %v3093_v40 }
 0x27d   : > { %2259 = vmatprep.subr.mxu0 %v3524_v0 }
 0x280   : > { %2260 = vmatpush3.xpose.msra.mxu0 %v3101_v42 }
 0x281   : > { %2261 = vmatprep.subr.mxu0 %v3524_v0 }
 0x284   : > { %2262 = vmatpush3.xpose.msra.mxu0 %v3109_v44 }
 0x285   : > { %2263 = vmatprep.subr.mxu0 %v3524_v0 }
 0x288   : > { %2264 = vmatpush3.xpose.msra.mxu0 %v3117_v46 }
 0x289   : > { %2265 = vmatprep.subr.mxu0 %v3524_v0 }
 0x28c   : > { %2266 = vmatpush3.xpose.msra.mxu0 %v3125_v48 }
 0x28d   : > { %2267 = vmatprep.subr.mxu0 %v3524_v0 }
 0x290   : > { %2268 = vmatpush3.xpose.msra.mxu0 %v3525_v29 }
 0x291   : > { %2269 = vmatprep.subr.mxu0 %v3524_v0 }
 0x294   : > { %2270 = vmatpush3.xpose.msra.mxu0 %v3526_v31 }
 0x295   : > { %2271 = vmatprep.subr.mxu0 %v3524_v0 }
 0x298   : > { %2272 = vmatpush3.xpose.msra.mxu0 %v3527_v32 }
 0x31b   : > { %v1148_v33 = vpop.f32.mrf.mxu0 }
 0x31c   : > { %v1154_v34 = vcombine.low %v1148_v33, %v1148_v33  ;;  %v1923_v35 = vcombine.high %v1148_v33, %v1148_v33 }
 0x31d   : > { %v2205_v36 = vpop.f32.mrf.mxu0 }
 0x31e   : > { %v1158_v40 = vadd.f32 %v1154_v34, %v3528_v38  ;;  %v1159_v42 = vadd.f32 %v3154_v55, %v1923_v35 }
 0x320   : > { %v1161_v44 = vmul.f32 0.1, %v1158_v40  ;;  %v1162_v46 = vmul.f32 0.1, %v1159_v42 }
 0x322   : > { %v1165_v48 = vrot.slane %v1161_v44, 4  ;;  %v1166_v8 = vrot.slane %v1162_v46, 3  ;;  %v1198_v56 = vrot.slane %v1161_v44, 5  ;;  %v1199_v57 = vrot.slane %v1162_v46, 4 }
 0x323   : > { %v1231_v60 = vrot.slane %v1161_v44, 6  ;;  %v1232_v62 = vrot.slane %v1162_v46, 5  ;;  %v1264_v4 = vrot.slane %v1161_v44, 7  ;;  %v1265_v6 = vrot.slane %v1162_v46, 6 }
 0x324   : > { %v1167_v58 = vsel %vm619_vm2, %v1166_v8, %v1165_v48  ;;  %v1200_v55 = vsel %vm619_vm2, %v1199_v57, %v1198_v56 }
 0x325   : > { %v1169_v63 = vadd.f32 %v1167_v58, %v1160_v50  ;;  %v1233_v3 = vsel %vm619_vm2, %v1232_v62, %v1231_v60  ;;  %v1266_v14 = vsel %vm619_vm2, %v1265_v6, %v1264_v4 }
 0x327   : > { %v1177_v59 = vrot.slane %v1169_v63, %v3160_v52  ;;  %v1197_v27 = vmul.f32 0.9, %v1169_v63 }
 0x329   : > { %v1178_v10 = vcombine.high %v1177_v59, %v1177_v59  ;;  %1924 = vst.sshfl [vmem:[%s2944_s16 + $0x4] sm:$0x1 pattern:$0x73625140] %v1177_v59  ;;  %v1202_v0 = vadd.f32 %v1200_v55, %v1197_v27 }
 0x32b   : > { %1925 = vst.sshfl [vmem:[%s2944_s16 + $0xc] sm:$0x1 pattern:$0x73625140] %v1178_v10  ;;  %v1210_v61 = vrot.slane %v1202_v0, %v3160_v52  ;;  %v1230_v1 = vmul.f32 0.9, %v1202_v0 }
 0x32d   : > { %v1211_v9 = vcombine.high %v1210_v61, %v1210_v61  ;;  %1926 = vst.sshfl [vmem:[%s2944_s16 + $0x5] sm:$0x1 pattern:$0x73625140] %v1210_v61  ;;  %v1235_v11 = vadd.f32 %v1233_v3, %v1230_v1 }
 0x32f   : > { %1927 = vst.sshfl [vmem:[%s2944_s16 + $0xd] sm:$0x1 pattern:$0x73625140] %v1211_v9  ;;  %v1243_v12 = vrot.slane %v1235_v11, %v3160_v52  ;;  %v1263_v13 = vmul.f32 0.9, %v1235_v11 }
 0x331   : > { %v1244_v15 = vcombine.high %v1243_v12, %v1243_v12  ;;  %1928 = vst.sshfl [vmem:[%s2944_s16 + $0x6] sm:$0x1 pattern:$0x73625140] %v1243_v12  ;;  %v1268_v16 = vadd.f32 %v1266_v14, %v1263_v13 }
 0x333   : > { %1929 = vst.sshfl [vmem:[%s2944_s16 + $0xe] sm:$0x1 pattern:$0x73625140] %v1244_v15  ;;  %v1276_v17 = vrot.slane %v1268_v16, %v3160_v52  ;;  %1608 = vst [vmem:[#allocation2] sm:$0x3] %v1268_v16 }
 0x335   : > { %v1277_v18 = vcombine.high %v1276_v17, %v1276_v17  ;;  %1930 = vst.sshfl [vmem:[%s2944_s16 + $0x7] sm:$0x1 pattern:$0x73625140] %v1276_v17 }
 0x337   : > { %1931 = vst.sshfl [vmem:[%s2944_s16 + $0xf] sm:$0x1 pattern:$0x73625140] %v1277_v18 }
 0x33c   : > { %v1296_v19 = vld [vmem:[%s2944_s16 + $0x4] sm:$0xf] }
 0x33d   : > { %2239 = vmatmul.mubr.f32.vlgmr.msra.gmra.mxu1 %v1296_v19 }
 0x33e   : > { %v1297_v20 = vld [vmem:[%s2944_s16 + $0xc] sm:$0xf] }
 0x33f   : > { %2274 = vmatmul.mubr.f32.vlgmr.msra.gmra.mxu0 %v1297_v20 }
 0x3fd   : > { %v1396_v21 = vpop.f32.mrf.mxu1 }
 0x3fe   : > { %v1471_v24 = vmul.f32 0.1, %v1396_v21 }
 0x3ff   : > { %v2240_v22 = vpop.f32.mrf.mxu1  ;;  %v1466_v23 = vpop.f32.mrf.mxu0 }
 0x400   : > { %v1472_v25 = vmul.f32 0.1, %v1466_v23  ;;  %v1507_v37 = vrot.slane %v1471_v24, 1  ;;  %v1539_v54 = vrot.slane %v1471_v24, 2  ;;  %v1572_v33 = vrot.slane %v1471_v24, 3 }
 0x401   : > { %v2275_v26 = vpop.f32.mrf.mxu0 }
 0x402   : > { %v1475_v28 = vrot.slane %v1472_v25, 7  ;;  %v1508_v47 = vsel %vm619_vm2, %v1472_v25, %v1507_v37  ;;  %v1540_v49 = vrot.slane %v1472_v25, 1  ;;  %v1573_v29 = vrot.slane %v1472_v25, 2 }
 0x404   : > { %v1476_v39 = vsel %vm619_vm2, %v1475_v28, %v1471_v24  ;;  %v1541_v2 = vsel %vm619_vm2, %v1540_v49, %v1539_v54  ;;  %v1574_v36 = vsel %vm619_vm2, %v1573_v29, %v1572_v33 }
 0x405   : > { %v1478_v41 = vadd.f32 %v1476_v39, %v1470_v30 }
 0x407   : > { %v1486_v43 = vrot.slane %v1478_v41, %v3160_v52  ;;  %v1506_v45 = vmul.f32 0.9, %v1478_v41 }
 0x409   : > { %v1487_v53 = vcombine.high %v1486_v43, %v1486_v43  ;;  %1932 = vst.sshfl [vmem:[%s2947_s17 + $0x4] sm:$0x1 pattern:$0x73625140] %v1486_v43  ;;  %v1510_v5 = vadd.f32 %v1508_v47, %v1506_v45 }
 0x40b   : > { %1933 = vst.sshfl [vmem:[%s2947_s17 + $0xc] sm:$0x1 pattern:$0x73625140] %v1487_v53  ;;  %v1518_v51 = vrot.slane %v1510_v5, %v3160_v52  ;;  %v1538_v7 = vmul.f32 0.9, %v1510_v5 }
 0x40d   : > { %v1519_v31 = vcombine.high %v1518_v51, %v1518_v51  ;;  %1934 = vst.sshfl [vmem:[%s2947_s17 + $0x5] sm:$0x1 pattern:$0x73625140] %v1518_v51  ;;  %v1543_v32 = vadd.f32 %v1541_v2, %v1538_v7 }
 0x40f   : > { %1935 = vst.sshfl [vmem:[%s2947_s17 + $0xd] sm:$0x1 pattern:$0x73625140] %v1519_v31  ;;  %v1551_v34 = vrot.slane %v1543_v32, %v3160_v52  ;;  %v1571_v35 = vmul.f32 0.9, %v1543_v32 }
 0x411   : > { %v1552_v38 = vcombine.high %v1551_v34, %v1551_v34  ;;  %1936 = vst.sshfl [vmem:[%s2947_s17 + $0x6] sm:$0x1 pattern:$0x73625140] %v1551_v34  ;;  %v1576_v40 = vadd.f32 %v1574_v36, %v1571_v35 }
 0x413   : > { %1937 = vst.sshfl [vmem:[%s2947_s17 + $0xe] sm:$0x1 pattern:$0x73625140] %v1552_v38  ;;  %v1584_v42 = vrot.slane %v1576_v40, %v3160_v52  ;;  %1609 = vst [vmem:[#allocation3] sm:$0x3] %v1576_v40 }
 0x415   : > { %v1585_v44 = vcombine.high %v1584_v42, %v1584_v42  ;;  %1938 = vst.sshfl [vmem:[%s2947_s17 + $0x7] sm:$0x1 pattern:$0x73625140] %v1584_v42 }
 0x417   : > { %1939 = vst.sshfl [vmem:[%s2947_s17 + $0xf] sm:$0x1 pattern:$0x73625140] %v1585_v44 }
 0x41b   : > { %1613 = sbr.rel (%p1940_p0) target bundleno = 1064 (0x428), region = 60 }
 0x41c   : > { %v1604_v46 = vld [vmem:[%s2947_s17 + $0x4] sm:$0xf] }
 0x41d   : > { %1606 = vst [vmem:[#allocation4] sm:$0xf] %v1604_v46 }
 0x41e   : > { %v1605_v48 = vld [vmem:[%s2947_s17 + $0xc] sm:$0xf] }
 0x41f   : > { %1607 = vst [vmem:[#allocation4 + $0x4] sm:$0xf] %v1605_v48 }
 0x420   : > { %1614 = vst [vmem:[#allocation16] sm:$0x3] %v1268_v16  ;;  %1615 = vst [vmem:[#allocation17] sm:$0x3] %v1576_v40 }
 0x426   : > { %v1616_v8 = vld [vmem:[#allocation4] sm:$0xff]  }
 0x427   : > { %1618 = vst [vmem:[#allocation19] sm:$0xff] %v1616_v8  }
 0x428 PF: > { %s1625_s14 = sand.u32 1, %s2812_s11   ;;  %s1943_s21 = sshll.u32 %s2705_s30, 7 }
 0x429   : > { %s3352_s19 = scalar_lea.hbm %s3476_s5, %s1943_s21  ;;  %s1659_s18 = sshll.u32 %s2947_s17, 4  ;;  %s3355_s18 = int_to_ptr.vmem [resolvable:$true] %s1659_s18 }
 0x42a   : > { %s3357_s20 = scalar_lea.sflag [#allocation15], %s1625_s14  ;;  %s2515_s12 = scalar_lea.vmem %s3355_s18, 256 }
 0x42b   : > { %p2516_p5 = scmp.ne.s32.totalorder %s3355_s18, %s2515_s12  ;;  %p3529_p9 = scmp.ne.s32.totalorder %s3504_s15, 0 }
 0x42c   : > { %s2726_s23 = smov [#allocation14]  }
 0x42d   : > { %p2517_p11 = pnand %p2516_p5, %p3529_p9  ;;  %s2519_s1 = sshll.u32 %s2726_s23, 4  ;;  %s2520_s1 = int_to_ptr.vmem [resolvable:$false] %s2519_s1 }
 0x42e   : > { %s2521_s2 = scalar_lea.vmem %s2520_s1, 512  ;;  %p2522_p4 = scmp.lt.s32.totalorder %s3355_s18, %s2520_s1 }
 0x42f   : > { %p2518_p13 = pneg %p2517_p11  ;;  %p2523_p1 = scmp.lt.s32.totalorder %s2521_s2, %s2515_s12 }
 0x431   : > { %p2524_p3 = por %p2523_p1, %p2522_p4 }
 0x433   : > { %p2525_p10 = pnand %p2524_p3, %p2518_p13 }
 0x435   : > { %2528 = shalt.err (!%p2525_p10)
}
 0x436   : > { %s2529_s10 = scalar_lea.hbm %s3352_s19, 256  ;;  %s2533_s26 = scalar_lea.hbm %s3476_s5, 512 }
 0x437   : > { %p2530_p2 = scmp.ne.s32.totalorder %s3352_s19, %s2529_s10  ;;  %p2534_p7 = scmp.lt.s32.totalorder %s3352_s19, %s3476_s5 }
 0x438   : > { %p2535_p6 = scmp.lt.s32.totalorder %s2533_s26, %s2529_s10 }
 0x439   : > { %p2531_p12 = pnand %p2530_p2, %p3529_p9 }
 0x43a   : > { %p2536_p0 = por %p2535_p6, %p2534_p7 }
 0x43b   : > { %p2532_p8 = pneg %p2531_p12 }
 0x43d   : > { %p2537_p5 = pnand %p2536_p0, %p2532_p8 }
 0x43f   : > { %2540 = shalt.err (!%p2537_p5)
}
 0x440   : > { %s2727_s25 = smov 128   ;;  %s2728_s22 = smov 256  }
 0x441   : > { %s2729_s12 = smov 8   ;;  %s2730_s23 = smov [#allocation17]  }
 0x442   : > { %2291 = dma.vmem_to_hbm [thread:$0]  (%p3529_p9), %s3355_s18, 256, %s3352_s19, %s3357_s20, %s2727_s25, %s2728_s22, %s2729_s12  }
 0x443   : > { %s1688_s1 = sshll.u32 %s2730_s23, 4  ;;  %s3388_s3 = scalar_lea.hbm %s3475_s4, %s1943_s21  ;;  %s1689_s1 = int_to_ptr.vmem [resolvable:$true] %s1688_s1 }
 0x444   : > { %s2541_s27 = scalar_lea.vmem %s1689_s1, 32  ;;  %p3530_p13 = scmp.eq.s32.totalorder %s2812_s11, 1 }
 0x445   : > { %p2542_p11 = scmp.ne.s32.totalorder %s1689_s1, %s2541_s27  ;;  %p2548_p3 = scmp.lt.s32.totalorder %s1689_s1, %s1689_s1 }
 0x446   : > { %p2549_p10 = scmp.lt.s32.totalorder %s2541_s27, %s2541_s27 }
 0x447   : > { %p2543_p4 = pnand %p2542_p11, %p3530_p13 }
 0x448   : > { %p2550_p2 = por %p2549_p10, %p2548_p3 }
 0x449   : > { %p2544_p1 = pneg %p2543_p4 }
 0x44b   : > { %p2551_p12 = pnand %p2550_p2, %p2544_p1 }
 0x44d   : > { %2554 = shalt.err (!%p2551_p12)
}
 0x44e   : > { %p3531_p8 = pmov %p3530_p13  ;;  %s1641_s30 = sshll.u32 %s2944_s16, 4  ;;  %s3398_s30 = int_to_ptr.vmem [resolvable:$true] %s1641_s30 }
 0x44f   : > { %s1621_s21 = scalar_lea.sflag [#allocation7], %s2924_s24  ;;  %s2565_s20 = scalar_lea.vmem %s3398_s30, 256 }
 0x450   : > { %2295 = dma.vmem_to_hbm [thread:$0]  (%p3531_p8), %s1689_s1, 32, %s3478_s7, [#allocation18]  }
 0x451   : > { %p2566_p7 = scmp.ne.s32.totalorder %s3398_s30, %s2565_s20  ;;  %s2731_s26 = smov [#allocation13]  }
 0x452   : > { %s2569_s17 = sshll.u32 %s2731_s26, 4  ;;  %s2570_s17 = int_to_ptr.vmem [resolvable:$false] %s2569_s17 }
 0x453   : > { %p2567_p6 = pnand %p2566_p7, %p3529_p9  ;;  %s2571_s14 = scalar_lea.vmem %s2570_s17, 512 }
 0x454   : > { %p2572_p5 = scmp.lt.s32.totalorder %s3398_s30, %s2570_s17  ;;  %p2573_p11 = scmp.lt.s32.totalorder %s2571_s14, %s2565_s20 }
 0x455   : > { %p2568_p0 = pneg %p2567_p6 }
 0x456   : > { %p2574_p13 = por %p2573_p11, %p2572_p5 }
 0x458   : > { %p2575_p4 = pnand %p2574_p13, %p2568_p0 }
 0x45a   : > { %2578 = shalt.err (!%p2575_p4)
}
 0x45b   : > { %s2579_s16 = scalar_lea.hbm %s3388_s3, 256  ;;  %s2583_s1 = scalar_lea.hbm %s3475_s4, 512 }
 0x45c   : > { %p2580_p1 = scmp.ne.s32.totalorder %s3388_s3, %s2579_s16  ;;  %p2584_p2 = scmp.lt.s32.totalorder %s3388_s3, %s3475_s4 }
 0x45d   : > { %p2585_p12 = scmp.lt.s32.totalorder %s2583_s1, %s2579_s16 }
 0x45e   : > { %p2581_p3 = pnand %p2580_p1, %p3529_p9 }
 0x45f   : > { %p2586_p8 = por %p2585_p12, %p2584_p2 }
 0x460   : > { %p2582_p10 = pneg %p2581_p3 }
 0x462   : > { %p2587_p7 = pnand %p2586_p8, %p2582_p10 }
 0x464   : > { %2590 = shalt.err (!%p2587_p7)
}
 0x465   : > { %2290 = dma.vmem_to_hbm [thread:$0]  (%p3529_p9), %s3398_s30, 256, %s3388_s3, %s1621_s21, %s2727_s25, %s2728_s22, %s2729_s12  }
 0x466   : > { %s2732_s27 = smov [#allocation16]   ;;  %s2733_s18 = smov [#allocation19]  }
 0x467   : > { %s1675_s19 = sshll.u32 %s2732_s27, 4  ;;  %s1701_s20 = sshll.u32 %s2733_s18, 4  ;;  %s1676_s19 = int_to_ptr.vmem [resolvable:$true] %s1675_s19  ;;  %s1702_s20 = int_to_ptr.vmem [resolvable:$true] %s1701_s20 }
 0x468   : > { %s2591_s26 = scalar_lea.vmem %s1676_s19, 32  ;;  %p3532_p0 = scmp.eq.s32.totalorder %s2812_s11, 1 }
 0x469   : > { %p2592_p6 = scmp.ne.s32.totalorder %s1676_s19, %s2591_s26  ;;  %p2598_p13 = scmp.lt.s32.totalorder %s1676_s19, %s1676_s19 }
 0x46a   : > { %p2599_p4 = scmp.lt.s32.totalorder %s2591_s26, %s2591_s26 }
 0x46b   : > { %p2593_p5 = pnand %p2592_p6, %p3532_p0 }
 0x46c   : > { %p2600_p1 = por %p2599_p4, %p2598_p13 }
 0x46d   : > { %p2594_p11 = pneg %p2593_p5 }
 0x46f   : > { %p2601_p3 = pnand %p2600_p1, %p2594_p11 }
 0x471   : > { %2604 = shalt.err (!%p2601_p3)
}
 0x472   : > { %p3533_p10 = pmov %p3532_p0  ;;  %s2615_s25 = scalar_lea.vmem %s1702_s20, 128 }
 0x473   : > { %p2616_p9 = scmp.ne.s32.totalorder %s1702_s20, %s2615_s25  ;;  %p3534_p2 = pmov %p3532_p0 }
 0x474   : > { %2293 = dma.vmem_to_hbm [thread:$0]  (%p3533_p10), %s1676_s19, 32, %s3477_s6, [#allocation15]  }
 0x475   : > { %p2617_p12 = pnand %p2616_p9, %p3534_p2  ;;  %p2622_p7 = scmp.lt.s32.totalorder %s1702_s20, %s1702_s20 }
 0x476   : > { %p2623_p6 = scmp.lt.s32.totalorder %s2615_s25, %s2615_s25 }
 0x477   : > { %p2618_p8 = pneg %p2617_p12 }
 0x478   : > { %p2624_p0 = por %p2623_p6, %p2622_p7 }
 0x47a   : > { %p2625_p5 = pnand %p2624_p0, %p2618_p8 }
 0x47c   : > { %2628 = shalt.err (!%p2625_p5)
}
 0x47d   : > { %s2734_s22 = smov 64   ;;  %s2735_s12 = smov 4  }
 0x47e   : > { %p3535_p11 = pmov %p3534_p2  ;;  %p3536_p13 = pmov %p3534_p2 }
 0x480   : > { %2297 = dma.vmem_to_hbm [thread:$0]  (%p3535_p11), %s1702_s20, 128, %s3479_s8, [#allocation18], %s2734_s22, %s2734_s22, %s2735_s12  }
 0x481   : > { %2676 = dma.done.wait (%p3536_p13), [#allocation15], 32   ;;  %p3537_p4 = pmov %p3534_p2 }
 0x482   : > { %p3538_p1 = pmov %p3534_p2 }
 0x483   : > { %2678 = vsyncadd (%p3537_p4), [#allocation15], 4294967264 }
 0x484   : > { %2680 = dma.done.wait (%p3538_p1), [#allocation18], 160   ;;  %p3539_p3 = pmov %p3538_p1 }
 0x486   : > { %2682 = vsyncadd (%p3539_p3), [#allocation18], 4294967136 }
 0x487 PF: > { %s3540_s21 = sld [smem:[#allocation27_spill]] }
 0x488   : > { %s3541_s14 = sld [smem:[#allocation29_spill]] }
 0x489   : > { %s3542_s16 = sld [smem:[#allocation28_spill]] }
 0x48d   : > { %s1728_s24 = sand.u32 1, %s3540_s21  }
 0x48e   : > { %p3543_p10 = scmp.ne.s32.totalorder %s3541_s14, 0  ;;  %s1729_s23 = scalar_lea.sflag [#allocation7], %s1728_s24 }
 0x48f   : > { %p3544_p9 = scmp.ge.s32.totalorder %s3542_s16, 2 }
 0x491   : > { %p2321_p2 = pnand %p3544_p9, %p3543_p10 }
 0x493   : > { %p2322_p12 = pneg %p2321_p2 }
 0x495   : > { %2684 = dma.done.wait (%p2322_p12), %s1729_s23, 256  }
 0x496   : > { %2686 = vsyncadd (%p2322_p12), %s1729_s23, 4294967040  ;;  %s3545_s1 = sadd.s32 4294967294, %s3542_s16  }
 0x497   : > { %s1737_s2 = sand.u32 1, %s3545_s1  }
 0x498   : > { %s1738_s10 = scalar_lea.sflag [#allocation15], %s1737_s2 }
 0x499   : > { %2688 = dma.done.wait (%p2322_p12), %s1738_s10, 256  }
 0x49a   : > { %2690 = vsyncadd (%p2322_p12), %s1738_s10, 4294967040  ;;  %s31_s10 = sadd.s32 1, %s3542_s16   ;;  %s3546_s11 = sld [smem:[#allocation30_spill]] }
 0x49b   : > { %p28_p8 = scmp.ge.s32.totalorder %s31_s10, 4   ;;  %s3547_s27 = smov %s2697_s28 }
 0x49c   : > { %s3548_s28 = smov %s2701_s29  ;;  %s3549_s29 = smov %s2913_s13 }
 0x49d   : > { %s3550_s30 = smov %s2709_s9  ;;  %30 = sbr.rel (!%p28_p8) target bundleno = 15 (0xf), region = 146 }
 0x4a0   : > { %s3551_s9 = smov %s3546_s11 }
 0x4a2   :  { %1743 = vsyncpa [#allocation6], 1 }
 0x4a3   :  { %1745 = vsyncpa [#allocation6 + $0x1], 1 }
 0x4a4   :  { %1746 = vsyncpa [#allocation9], 1 }
 0x4a5   :  { %1747 = vsyncpa [#allocation12], 1 }
 0x4a6   :  { %1748 = vsyncpa [#allocation7], 1 }
 0x4a7   :  { %1750 = vsyncpa [#allocation7 + $0x1], 1 }
 0x4a8   :  { %1751 = vsyncpa [#allocation15], 1 }
 0x4a9   :  { %1753 = vsyncpa [#allocation15 + $0x1], 1 }
 0x4aa   :  { %1754 = vsyncpa [#allocation18], 1 }

</bundles_post_ra>
